<compile_context>
chip_gen: v5e
topology: v5e:2x2
jax: 0.10.0
libtpu: 0.0.40
codegen_flags: <defaults>
</compile_context>

<pallas_src>
import jax
import jax.numpy as jnp
from jax.experimental import pallas as pl
from jax.experimental.pallas import tpu as pltpu

LEAKY_SLOPE = 0.01          # F.leaky_relu default negative_slope
INV_SQRT2 = 0.7071067811865476


def _erf(x):
    # Abramowitz & Stegun 7.1.26 polynomial erf, |abs err| < 1.5e-7.
    # TODO(synk): exact-erf F.gelu is approximated with this polynomial; swap to
    # lax.erf if/when the Pallas TPU lowering guarantees it.
    a1, a2, a3, a4, a5 = 0.254829592, -0.284496736, 1.421413741, -1.453152027, 1.061405429
    p = 0.3275911
    sgn = jnp.where(x >= 0, 1.0, -1.0)
    ax = jnp.abs(x)
    t = 1.0 / (1.0 + p * ax)
    poly = ((((a5 * t + a4) * t + a3) * t + a2) * t + a1) * t
    return sgn * (1.0 - poly * jnp.exp(-ax * ax))


# ------------------------------ Pallas kernel ------------------------------ #
def _mixtral_kernel(w_ref, x_ref, o_ref):
    # w_ref: SMEM (5,) f32 = softmax(weights) for [relu, tanh, leaky_relu, gelu, silu]
    # x_ref / o_ref: VMEM (BR, CP) f32 tiles (lane-dense, CP % 128 == 0)
    x = x_ref[...]
    w_relu, w_tanh, w_lrelu, w_gelu, w_silu = (
        w_ref[0], w_ref[1], w_ref[2], w_ref[3], w_ref[4])

    pos = jnp.maximum(x, 0.0)                  # relu(x); shared with leaky_relu
    neg = jnp.minimum(x, 0.0)                  # leaky_relu(x) = pos + slope * neg
    tanh = jnp.tanh(x)                         # EUP
    gelu = 0.5 * x * (1.0 + _erf(x * INV_SQRT2))
    silu = x * jax.nn.sigmoid(x)               # x * sigmoid(x)

    # w0*relu + w2*leaky_relu == (w0 + w2)*pos + (slope*w2)*neg  (fold scalar coeffs)
    o_ref[...] = ((w_relu + w_lrelu) * pos + (LEAKY_SLOPE * w_lrelu) * neg
                  + w_tanh * tanh + w_gelu * gelu + w_silu * silu)


# ------------------------------ host wrapper -------------------------------- #
def _round_up(a, b):
    return (a + b - 1) // b * b


def mixtral_activation(x, weights):
    """Forward of MixtralActivation: sum_i softmax(weights)[i] * act_i(x)."""
    w = jax.nn.softmax(weights.astype(jnp.float32))          # 5 scalars, host-side

    orig_shape = x.shape
    x2 = x.reshape(-1, orig_shape[-1]).astype(jnp.float32)
    R, C = x2.shape

    CP = _round_up(C, 128)                                    # lane-dense last dim
    BR = 256 if R >= 512 else _round_up(R, 8)                 # sublane-aligned row tile
    RP = _round_up(R, BR)
    xp = jnp.pad(x2, ((0, RP - R), (0, CP - C)))

    grid_spec = pltpu.PrefetchScalarGridSpec(
        num_scalar_prefetch=1,                                # weights -> SMEM
        grid=(RP // BR,),
        in_specs=[pl.BlockSpec((BR, CP), lambda i, w_ref: (i, 0))],
        out_specs=pl.BlockSpec((BR, CP), lambda i, w_ref: (i, 0)),
    )
    out = pl.pallas_call(
        _mixtral_kernel,
        out_shape=jax.ShapeDtypeStruct((RP, CP), jnp.float32),
        grid_spec=grid_spec,
        compiler_params=pltpu.CompilerParams(
            dimension_semantics=("parallel",)),               # megacore on v7x
    )(w, xp)

    return out[:R, :C].reshape(orig_shape).astype(x.dtype)


# ------------------------------ pure-JAX reference -------------------------- #
def mixtral_activation_ref(x, weights):
    w = jax.nn.softmax(weights.astype(jnp.float32))
    acts = [jax.nn.relu(x),
            jnp.tanh(x),
            jax.nn.leaky_relu(x, LEAKY_SLOPE),
            jax.nn.gelu(x, approximate=False),
            x * jax.nn.sigmoid(x)]
    out = jnp.zeros_like(x)
    for i, a in enumerate(acts):
        out = out + w[i] * a
    return out


# ----------------------------------- main ----------------------------------- #
if __name__ == "__main__":
    key = jax.random.PRNGKey(0)
    kx, _ = jax.random.split(key)

    BATCH, HIDDEN = 512, 128            # lane-dense hidden dim per perf feedback
    x = jax.random.normal(kx, (BATCH, HIDDEN), jnp.float32)
    weights = jnp.ones((5,), jnp.float32)   # nn.Parameter(torch.ones(5))

    fwd = jax.jit(mixtral_activation)
    out = fwd(x, weights)
    jax.block_until_ready(out)

    assert out.shape == x.shape, out.shape
    ref = mixtral_activation_ref(x, weights)
    assert jnp.max(jnp.abs(out - ref)) < 1e-4, float(jnp.max(jnp.abs(out - ref)))

    print("KERNEL_OK")
</pallas_src>

<mosaic_0001>
module attributes {stable_mosaic.version = 11 : i64} {
  func.func @_mixtral_kernel(%arg0: i32, %arg1: memref<5xf32, #tpu.memory_space<smem>>, %arg2: memref<256x128xf32, #tpu.memory_space<vmem>>, %arg3: memref<256x128xf32, #tpu.memory_space<vmem>>) attributes {dimension_semantics = [#tpu.dimension_semantics<parallel>], iteration_bounds = array<i64: 2>, scalar_prefetch = 1 : i64, scratch_operands = 0 : i64, tpu.core_type = #tpu.core_type<tc>, window_params = [{transform_indices = @transform_0, window_bounds = array<i64: 256, 128>}, {transform_indices = @transform_1, window_bounds = array<i64: 256, 128>}]} {
    %c0 = arith.constant 0 : index
    %c0_0 = arith.constant 0 : index
    %0 = vector.load %arg2[%c0, %c0_0] : memref<256x128xf32, #tpu.memory_space<vmem>>, vector<256x128xf32>
    %c0_1 = arith.constant 0 : index
    %1 = memref.load %arg1[%c0_1] : memref<5xf32, #tpu.memory_space<smem>>
    %c1 = arith.constant 1 : index
    %2 = memref.load %arg1[%c1] : memref<5xf32, #tpu.memory_space<smem>>
    %c2 = arith.constant 2 : index
    %3 = memref.load %arg1[%c2] : memref<5xf32, #tpu.memory_space<smem>>
    %c3 = arith.constant 3 : index
    %4 = memref.load %arg1[%c3] : memref<5xf32, #tpu.memory_space<smem>>
    %c4 = arith.constant 4 : index
    %5 = memref.load %arg1[%c4] : memref<5xf32, #tpu.memory_space<smem>>
    %cst = arith.constant 0.000000e+00 : f32
    %6 = vector.broadcast %cst : f32 to vector<256x128xf32>
    %7 = arith.maximumf %0, %6 : vector<256x128xf32>
    %cst_2 = arith.constant 0.000000e+00 : f32
    %8 = vector.broadcast %cst_2 : f32 to vector<256x128xf32>
    %9 = arith.minimumf %0, %8 : vector<256x128xf32>
    %10 = math.tanh %0 : vector<256x128xf32>
    %cst_3 = arith.constant 5.000000e-01 : f32
    %11 = vector.broadcast %cst_3 : f32 to vector<256x128xf32>
    %12 = arith.mulf %11, %0 : vector<256x128xf32>
    %cst_4 = arith.constant 0.707106769 : f32
    %13 = vector.broadcast %cst_4 : f32 to vector<256x128xf32>
    %14 = arith.mulf %0, %13 : vector<256x128xf32>
    %cst_5 = arith.constant 0.000000e+00 : f32
    %15 = vector.broadcast %cst_5 : f32 to vector<256x128xf32>
    %16 = arith.cmpf oge, %14, %15 : vector<256x128xf32>
    %cst_6 = arith.constant 1.000000e+00 : f32
    %cst_7 = arith.constant -1.000000e+00 : f32
    %17 = vector.broadcast %cst_6 : f32 to vector<256x128xf32>
    %18 = vector.broadcast %cst_7 : f32 to vector<256x128xf32>
    %19 = arith.select %16, %17, %18 : vector<256x128xi1>, vector<256x128xf32>
    %20 = math.absf %14 : vector<256x128xf32>
    %cst_8 = arith.constant 0.327591091 : f32
    %21 = vector.broadcast %cst_8 : f32 to vector<256x128xf32>
    %22 = arith.mulf %21, %20 : vector<256x128xf32>
    %cst_9 = arith.constant 1.000000e+00 : f32
    %23 = vector.broadcast %cst_9 : f32 to vector<256x128xf32>
    %24 = arith.addf %23, %22 : vector<256x128xf32>
    %cst_10 = arith.constant 1.000000e+00 : f32
    %25 = vector.broadcast %cst_10 : f32 to vector<256x128xf32>
    %26 = arith.divf %25, %24 : vector<256x128xf32>
    %cst_11 = arith.constant 1.06140542 : f32
    %27 = vector.broadcast %cst_11 : f32 to vector<256x128xf32>
    %28 = arith.mulf %27, %26 : vector<256x128xf32>
    %cst_12 = arith.constant -1.45315206 : f32
    %29 = vector.broadcast %cst_12 : f32 to vector<256x128xf32>
    %30 = arith.addf %28, %29 : vector<256x128xf32>
    %31 = arith.mulf %30, %26 : vector<256x128xf32>
    %cst_13 = arith.constant 1.42141378 : f32
    %32 = vector.broadcast %cst_13 : f32 to vector<256x128xf32>
    %33 = arith.addf %31, %32 : vector<256x128xf32>
    %34 = arith.mulf %33, %26 : vector<256x128xf32>
    %cst_14 = arith.constant -0.284496725 : f32
    %35 = vector.broadcast %cst_14 : f32 to vector<256x128xf32>
    %36 = arith.addf %34, %35 : vector<256x128xf32>
    %37 = arith.mulf %36, %26 : vector<256x128xf32>
    %cst_15 = arith.constant 0.254829586 : f32
    %38 = vector.broadcast %cst_15 : f32 to vector<256x128xf32>
    %39 = arith.addf %37, %38 : vector<256x128xf32>
    %40 = arith.mulf %39, %26 : vector<256x128xf32>
    %cst_16 = arith.constant 0.000000e+00 : f32
    %41 = vector.broadcast %cst_16 : f32 to vector<256x128xf32>
    %42 = arith.subf %41, %20 : vector<256x128xf32>
    %43 = arith.mulf %42, %20 : vector<256x128xf32>
    %44 = math.exp %43 : vector<256x128xf32>
    %45 = arith.mulf %40, %44 : vector<256x128xf32>
    %cst_17 = arith.constant 1.000000e+00 : f32
    %46 = vector.broadcast %cst_17 : f32 to vector<256x128xf32>
    %47 = arith.subf %46, %45 : vector<256x128xf32>
    %48 = arith.mulf %19, %47 : vector<256x128xf32>
    %cst_18 = arith.constant 1.000000e+00 : f32
    %49 = vector.broadcast %cst_18 : f32 to vector<256x128xf32>
    %50 = arith.addf %49, %48 : vector<256x128xf32>
    %51 = arith.mulf %12, %50 : vector<256x128xf32>
    %52 = arith.negf %0 : vector<256x128xf32>
    %53 = math.exp %52 : vector<256x128xf32>
    %cst_19 = arith.constant 1.000000e+00 : f32
    %54 = vector.broadcast %cst_19 : f32 to vector<256x128xf32>
    %55 = arith.addf %54, %53 : vector<256x128xf32>
    %56 = arith.divf %54, %55 : vector<256x128xf32>
    %57 = arith.mulf %0, %56 : vector<256x128xf32>
    %58 = arith.addf %1, %3 : f32
    %59 = vector.broadcast %58 : f32 to vector<256x128xf32>
    %60 = arith.mulf %59, %7 : vector<256x128xf32>
    %cst_20 = arith.constant 0.00999999977 : f32
    %61 = arith.mulf %cst_20, %3 : f32
    %62 = vector.broadcast %61 : f32 to vector<256x128xf32>
    %63 = arith.mulf %62, %9 : vector<256x128xf32>
    %64 = arith.addf %60, %63 : vector<256x128xf32>
    %65 = vector.broadcast %2 : f32 to vector<256x128xf32>
    %66 = arith.mulf %65, %10 : vector<256x128xf32>
    %67 = arith.addf %64, %66 : vector<256x128xf32>
    %68 = vector.broadcast %4 : f32 to vector<256x128xf32>
    %69 = arith.mulf %68, %51 : vector<256x128xf32>
    %70 = arith.addf %67, %69 : vector<256x128xf32>
    %71 = vector.broadcast %5 : f32 to vector<256x128xf32>
    %72 = arith.mulf %71, %57 : vector<256x128xf32>
    %73 = arith.addf %70, %72 : vector<256x128xf32>
    %c0_21 = arith.constant 0 : index
    %c0_22 = arith.constant 0 : index
    %74 = vector.load %arg3[%c0_21, %c0_22] : memref<256x128xf32, #tpu.memory_space<vmem>>, vector<256x128xf32>
    tpu.vector_store %arg3[%c0_21, %c0_22], %73 {strides = array<i32>} : memref<256x128xf32, #tpu.memory_space<vmem>>, vector<256x128xf32>,
    return
  }
  func.func @transform_0(%arg0: i32, %arg1: memref<5xf32, #tpu.memory_space<smem>>) -> (i32, i32) {
    %c0_i32 = arith.constant 0 : i32
    %c0_i32_0 = arith.constant 0 : i32
    return %arg0, %c0_i32 : i32, i32
  }
  func.func @transform_1(%arg0: i32, %arg1: memref<5xf32, #tpu.memory_space<smem>>) -> (i32, i32) {
    %c0_i32 = arith.constant 0 : i32
    %c0_i32_0 = arith.constant 0 : i32
    return %arg0, %c0_i32 : i32, i32
  }
}

</mosaic_0001>

<bundles_post_ra>
// kernel: mixtral_activation.1
= control target key start
LH: loop header
LB: loop body
LE: loop exit
PB: predicated region body
PF: predicated region fallthrough
CT: control target
= control target key end

     0   :  { %s3220_s12 = smov [#allocation3]   ;;  %s7639_s0 = inlined_call_operand.vmem [shape: f32[5], index: 0, kind: input, shape index: {}]   ;;  %s7640_s1 = inlined_call_operand.hbm [shape: f32[512,128], index: 1, kind: input, shape index: {}]   ;;  %s7641_s2 = inlined_call_operand.hbm [shape: f32[512,128], index: 2, kind: output, shape index: {}]  }
   0x1   :  { %s8_s11 = sshll.u32 %s7639_s0, 4  ;;  %s9_s11 = int_to_ptr.vmem [resolvable:$true] %s8_s11 }
   0x2   :  { %11 = dma.vmem_to_smem %s9_s11, 16, %s3220_s12, [#allocation2] }
   0x3   :  { %3194 = dma.done.wait [#allocation2], 16 }
   0x4   :  { %3195 = vsyncadd [#allocation2], 4294967280 }
   0x5   :  { %14 = sfence }
   0x6   :  { %15 = vsyncpa [#allocation5], 0 }
   0x7   :  { %17 = vsyncpa [#allocation5 + $0x1], 0 }
   0x8   :  { %18 = vsyncpa [#allocation6], 0 }
   0x9   :  { %20 = vsyncpa [#allocation6 + $0x1], 0  ;;  %s3244_s13 = smov 0   ;;  %s3246_s14 = smov 0  }
   0xa   :  { %s3248_s15 = smov 0   ;;  %s3250_s16 = smov 0  }
   0xb LB: > { %s3265_s0 = sadd.s32 4294967295, %s3218_s16   ;;  %s2617_s17 = sadd.s32 4294967294, %s3218_s16   ;;  %s3218_s16 = sphi %s3250_s16, %s8887_s16   ;;  %s3214_s15 = sphi %s3248_s15, %s8886_s15   ;;  %s3210_s14 = sphi %s3246_s14, %s8885_s14   ;;  %s3206_s13 = sphi %s3244_s13, %s8884_s13  }
   0xc   : > { %s3269_s18 = sadd.s32 1, %s3218_s16   ;;  %s33_s19 = sadd.s32 1, %s3214_s15 }
   0xd   : > { %s30_s20 = ssub.s32 %s3218_s16, %s3269_s18  ;;  %p40_p0 = scmp.ne.s32.totalorder %s3214_s15, %s3210_s14 }
   0xe   : > { %p31_p1 = scmp.eq.s32.totalorder %s30_s20, 0  ;;  %p41_p2 = scmp.eq.s32.totalorder %s3218_s16, 0 }
   0xf   : > { %p46_p3 = scmp.ne.s32.totalorder %s3210_s14, %s3206_s13  ;;  %p47_p4 = scmp.eq.s32.totalorder %s3265_s0, 0 }
  0x10   : > { %s3281_s21 = scalar_select %p31_p1, %s3214_s15, %s33_s19  }
  0x11   : > { %p3283_p5 = por %p41_p2, %p40_p0  ;;  %p3287_p6 = por %p47_p4, %p46_p3 }
  0x12   : > { %p70_p7 = scmp.eq.s32.totalorder %s3265_s0, 1  ;;  %p76_p8 = scmp.eq.s32.totalorder %s2617_s17, 1 }
  0x13   : > { %p2681_p10 = scmp.lt.s32.totalorder %s3218_s16, 2  ;;  %s96_s26 = sand.u32 1, %s3214_s15  }
  0x14   : > { %p3294_p11 = por %p70_p7, %p40_p0  ;;  %p3298_p12 = por %p76_p8, %p46_p3 }
  0x15   : > { %s2667_s27 = sshll.u32 %s3218_s16, 8  ;;  %s2620_s28 = sshll.u32 %s96_s26, 8 }
  0x16   : > { %s105_s3 = scalar_lea.hbm %s7640_s1, %s2667_s27  ;;  %s100_s5 = scalar_lea.vmem [#allocation4], %s2620_s28 }
  0x17   : > { %s106_s4 = sshll.u32 %s105_s3, 4  ;;  %s108_s6 = sshll.u32 %s100_s5, 4  ;;  %s107_s4 = int_to_ptr.hbm [resolvable:$true] %s106_s4  ;;  %s109_s6 = int_to_ptr.vmem [resolvable:$true] %s108_s6 }
  0x18   : > { %p3309_p13 = pnand %p2681_p10, %p3283_p5  ;;  %p2623_p0 = scmp.ge.s32.totalorder %s3218_s16, 1 }
  0x19   : > { %p116_p1 = scmp.lt.s32.totalorder %s3218_s16, 3  ;;  %s97_s8 = scalar_lea.sflag [#allocation5], %s96_s26 }
  0x1a   : > { %s3120_s9 = sshra.s32 %s107_s4, 4  ;;  %p3124_p3 = pneg %p3309_p13  ;;  %s3121_s9 = int_to_ptr.hbm [resolvable:$true] %s3120_s9 }
  0x1b   : > { %s3122_s10 = scalar_lea.hbm %s3121_s9, 256  ;;  %s3127_s17 = scalar_lea.hbm %s7640_s1, 512 }
  0x1c   : > { %p3123_p2 = scmp.ne.s32.totalorder %s3121_s9, %s3122_s10  ;;  %p3128_p5 = scmp.lt.s32.totalorder %s3121_s9, %s7640_s1 }
  0x1d   : > { %p3129_p8 = scmp.lt.s32.totalorder %s3127_s17, %s3122_s10 }
  0x1e   : > { %p3125_p4 = pnand %p3124_p3, %p3123_p2 }
  0x1f   : > { %p3130_p10 = por %p3129_p8, %p3128_p5 }
  0x20   : > { %p3126_p7 = pneg %p3125_p4 }
  0x22   : > { %p3131_p9 = pnand %p3130_p10, %p3126_p7 }
  0x24   : > { %3134 = shalt.err (!%p3131_p9)
}
  0x25   : > { %s3221_s22 = smov 128   ;;  %s3222_s26 = smov 8  }
  0x26   : > { %2676 = dma.hbm_to_vmem [thread:$0]  (!%p3309_p13), %s107_s4, 4096, %s109_s6, %s97_s8, %s3221_s22, %s3221_s22, %s3222_s26  }
  0x27   : > { %p117_p2 = pnand %p2623_p0, %p116_p1 }
  0x29   : > { %120 = sbr.rel (%p117_p2) target bundleno = 718 (0x2ce), region = 24 }
  0x2e   : > { %s3330_s27 = sand.u32 1, %s3210_s14  }
  0x2f   : > { %s2624_s28 = sshll.u32 %s3330_s27, 8  ;;  %s123_s29 = scalar_lea.sflag [#allocation5], %s3330_s27 }
  0x30   : > { %s3336_s30 = scalar_lea.vmem [#allocation4], %s2624_s28 }
  0x31   : > { %3197 = dma.done.wait (%p3287_p6), %s123_s29, 4096  }
  0x32   : > { %3199 = vsyncadd (%p3287_p6), %s123_s29, 4294963200  ;;  %v3343_v0 = vld [vmem:[%s3336_s30] sm:$0xff]  ;;  %v3346_v1 = vld [vmem:[%s3336_s30 + $0x8] sm:$0xff]  ;;  %s6731_s23 = sld [smem:[#allocation3]]  ;;  %s7464_s9 = scalar_lea.vmem [#allocation7], %s2624_s28 }
  0x33   : > { %7849 = vst [vmem:[#allocation11_spill] sm:$0xff] %v3343_v0  ;;  %v3349_v2 = vld [vmem:[%s3336_s30 + $0x10] sm:$0xff]  ;;  %v3352_v3 = vld [vmem:[%s3336_s30 + $0x18] sm:$0xff]  ;;  %v3355_v4 = vld [vmem:[%s3336_s30 + $0x20] sm:$0xff]  ;;  %2721 = vtanh.f32 %v3343_v0  ;;  %v3515_v42 = vmul.f32 0.5, %v3343_v0  ;;  %v3518_v61 = vmul.f32 0.5, %v3346_v1 }
  0x34   : > { %7850 = vst [vmem:[#allocation12_spill] sm:$0xff] %v3346_v1  ;;  %v3358_v5 = vld [vmem:[%s3336_s30 + $0x28] sm:$0xff]  ;;  %v3362_v7 = vld [vmem:[%s3336_s30 + $0x30] sm:$0xff]  ;;  %v3365_v8 = vld [vmem:[%s3336_s30 + $0x38] sm:$0xff]  ;;  %2723 = vtanh.f32 %v3346_v1  ;;  %v3521_v63 = vmul.f32 0.5, %v3349_v2  ;;  %v3524_v54 = vmul.f32 0.5, %v3352_v3 }
  0x35   : > { %7851 = vst [vmem:[#allocation13_spill] sm:$0xff] %v3349_v2  ;;  %v3368_v9 = vld [vmem:[%s3336_s30 + $0x40] sm:$0xff]  ;;  %v3374_v13 = vld [vmem:[%s3336_s30 + $0x48] sm:$0xff]  ;;  %v3377_v14 = vld [vmem:[%s3336_s30 + $0x50] sm:$0xff]  ;;  %2725 = vtanh.f32 %v3349_v2  ;;  %v3527_v52 = vmul.f32 0.5, %v3355_v4  ;;  %v3530_v57 = vmul.f32 0.5, %v3358_v5 }
  0x36   : > { %7852 = vst [vmem:[#allocation14_spill] sm:$0xff] %v3352_v3  ;;  %v3380_v15 = vld [vmem:[%s3336_s30 + $0x58] sm:$0xff]  ;;  %v3386_v19 = vld [vmem:[%s3336_s30 + $0x60] sm:$0xff]  ;;  %v3389_v20 = vld [vmem:[%s3336_s30 + $0x68] sm:$0xff]  ;;  %2727 = vtanh.f32 %v3352_v3  ;;  %v3533_v59 = vmul.f32 0.5, %v3362_v7  ;;  %v3536_v58 = vmul.f32 0.5, %v3365_v8 }
  0x37   : > { %7853 = vst [vmem:[#allocation15_spill] sm:$0xff] %v3355_v4  ;;  %v3392_v21 = vld [vmem:[%s3336_s30 + $0x70] sm:$0xff]  ;;  %v3398_v25 = vld [vmem:[%s3336_s30 + $0x78] sm:$0xff]  ;;  %v3401_v26 = vld [vmem:[%s3336_s30 + $0x80] sm:$0xff]  ;;  %v3539_v46 = vmul.f32 0.5, %v3368_v9  ;;  %v3542_v62 = vmul.f32 0.5, %v3374_v13  ;;  %2729 = vtanh.f32 %v3355_v4 }
  0x38   : > { %7854 = vst [vmem:[#allocation16_spill] sm:$0xff] %v3358_v5  ;;  %v3404_v27 = vld [vmem:[%s3336_s30 + $0x88] sm:$0xff]  ;;  %v3410_v31 = vld [vmem:[%s3336_s30 + $0x90] sm:$0xff]  ;;  %v3413_v32 = vld [vmem:[%s3336_s30 + $0x98] sm:$0xff]  ;;  %v3545_v41 = vmul.f32 0.5, %v3377_v14  ;;  %v3548_v40 = vmul.f32 0.5, %v3380_v15  ;;  %2731 = vtanh.f32 %v3358_v5 }
  0x39   : > { %7855 = vst [vmem:[#allocation17_spill] sm:$0xff] %v3362_v7  ;;  %v3416_v33 = vld [vmem:[%s3336_s30 + $0xa0] sm:$0xff]  ;;  %v3423_v37 = vld [vmem:[%s3336_s30 + $0xa8] sm:$0xff]  ;;  %v3426_v38 = vld [vmem:[%s3336_s30 + $0xb0] sm:$0xff]  ;;  %v3475_v53 = vpop.eup %2721  ;;  %v3551_v36 = vmul.f32 0.5, %v3386_v19  ;;  %v3554_v35 = vmul.f32 0.5, %v3389_v20  ;;  %2733 = vtanh.f32 %v3362_v7 }
  0x3a   : > { %7856 = vst [vmem:[#allocation18_spill] sm:$0xff] %v3365_v8  ;;  %v3429_v39 = vld [vmem:[%s3336_s30 + $0xb8] sm:$0xff]  ;;  %v3436_v43 = vld [vmem:[%s3336_s30 + $0xc0] sm:$0xff]  ;;  %v3439_v44 = vld [vmem:[%s3336_s30 + $0xc8] sm:$0xff]  ;;  %v3481_v48 = vpop.eup %2723  ;;  %v3557_v34 = vmul.f32 0.5, %v3392_v21  ;;  %v3560_v30 = vmul.f32 0.5, %v3398_v25  ;;  %2735 = vtanh.f32 %v3365_v8 }
  0x3b   : > { %7857 = vst [vmem:[#allocation19_spill] sm:$0xff] %v3368_v9  ;;  %v3442_v45 = vld [vmem:[%s3336_s30 + $0xd0] sm:$0xff]  ;;  %v3449_v49 = vld [vmem:[%s3336_s30 + $0xd8] sm:$0xff]  ;;  %v3452_v50 = vld [vmem:[%s3336_s30 + $0xe0] sm:$0xff]  ;;  %v3487_v60 = vpop.eup %2725  ;;  %v3563_v29 = vmul.f32 0.5, %v3401_v26  ;;  %v3566_v28 = vmul.f32 0.5, %v3404_v27  ;;  %2737 = vtanh.f32 %v3368_v9 }
  0x3c   : > { %7858 = vst [vmem:[#allocation20_spill] sm:$0xff] %v3374_v13  ;;  %v3455_v51 = vld [vmem:[%s3336_s30 + $0xe8] sm:$0xff]  ;;  %v3462_v55 = vld [vmem:[%s3336_s30 + $0xf0] sm:$0xff]  ;;  %v3465_v56 = vld [vmem:[%s3336_s30 + $0xf8] sm:$0xff]  ;;  %v3493_v47 = vpop.eup %2727  ;;  %v3569_v24 = vmul.f32 0.5, %v3410_v31  ;;  %v3572_v23 = vmul.f32 0.5, %v3413_v32  ;;  %2739 = vtanh.f32 %v3374_v13 }
  0x3d   : > { %7859 = vst [vmem:[#allocation21_spill] sm:$0xff] %v3377_v14  ;;  %v3575_v22 = vmul.f32 0.5, %v3416_v33  ;;  %v3578_v18 = vmul.f32 0.5, %v3423_v37  ;;  %v3581_v17 = vmul.f32 0.5, %v3426_v38  ;;  %v3584_v16 = vmul.f32 0.5, %v3429_v39  ;;  %s6737_s3 = sld [smem:[#allocation3 + $0x2]] }
  0x3e   : > { %7860 = vst [vmem:[#allocation22_spill] sm:$0xff] %v3380_v15  ;;  %v3587_v12 = vmul.f32 0.5, %v3436_v43  ;;  %v3590_v11 = vmul.f32 0.5, %v3439_v44  ;;  %v3593_v10 = vmul.f32 0.5, %v3442_v45  ;;  %v3596_v6 = vmul.f32 0.5, %v3449_v49  ;;  %s6824_s4 = sld [smem:[#allocation3 + $0x1]] }
  0x3f   : > { %7861 = vst [vmem:[#allocation23_spill] sm:$0xff] %v3386_v19  ;;  %2741 = vtanh.f32 %v3377_v14  ;;  %s7286_s7 = sld [smem:[#allocation3 + $0x3]]  ;;  %s2668_s10 = sshll.u32 %s3265_s0, 8 }
  0x40   : > { %7862 = vst [vmem:[#allocation24_spill] sm:$0xff] %v3389_v20  ;;  %2743 = vtanh.f32 %v3380_v15  ;;  %s7328_s8 = sld [smem:[#allocation3 + $0x4]]  ;;  %s2540_s12 = scalar_lea.hbm %s7641_s2, %s2668_s10 }
  0x41   : > { %7863 = vst [vmem:[#allocation25_spill] sm:$0xff] %v3392_v21  ;;  %2745 = vtanh.f32 %v3386_v19  ;;  %s2541_s17 = sshll.u32 %s7464_s9, 4  ;;  %s2543_s19 = sshll.u32 %s2540_s12, 4  ;;  %s2542_s17 = int_to_ptr.vmem [resolvable:$true] %s2541_s17  ;;  %s2544_s19 = int_to_ptr.hbm [resolvable:$true] %s2543_s19 }
  0x42   : > { %7864 = vst [vmem:[#allocation26_spill] sm:$0xff] %v3398_v25  ;;  %2747 = vtanh.f32 %v3389_v20  ;;  %s2529_s20 = scalar_lea.sflag [#allocation6], %s3330_s27  ;;  %s3164_s22 = sshra.s32 %s2544_s19, 4  ;;  %s3165_s22 = int_to_ptr.hbm [resolvable:$true] %s3164_s22 }
  0x43   : > { %7865 = vst [vmem:[#allocation27_spill] sm:$0xff] %v3401_v26  ;;  %2749 = vtanh.f32 %v3392_v21  ;;  %s2201_s5 = sadd.f32 %s6737_s3, %s6731_s23  ;;  %s2235_s6 = smul.f32 0.01, %s6737_s3 }
  0x44   : > { %7866 = vst [vmem:[#allocation28_spill] sm:$0xff] %v3404_v27  ;;  %2751 = vtanh.f32 %v3398_v25  ;;  %s3166_s26 = scalar_lea.hbm %s3165_s22, 256  ;;  %p3171_p0 = scmp.lt.s32.totalorder %s3165_s22, %s7641_s2 }
  0x45   : > { %7867 = vst [vmem:[#allocation29_spill] sm:$0xff] %v3410_v31  ;;  %2753 = vtanh.f32 %v3401_v26  ;;  %p3167_p6 = scmp.ne.s32.totalorder %s3165_s22, %s3166_s26 }
  0x46   : > { %7868 = vst [vmem:[#allocation30_spill] sm:$0xff] %v3413_v32  ;;  %2755 = vtanh.f32 %v3404_v27 }
  0x47   : > { %7869 = vst [vmem:[#allocation31_spill] sm:$0xff] %v3416_v33  ;;  %2757 = vtanh.f32 %v3410_v31  ;;  %p3168_p9 = pnand %p3167_p6, %p3294_p11 }
  0x48   : > { %7870 = vst [vmem:[#allocation32_spill] sm:$0xff] %v3423_v37  ;;  %2759 = vtanh.f32 %v3413_v32 }
  0x49   : > { %7871 = vst [vmem:[#allocation33_spill] sm:$0xff] %v3426_v38  ;;  %p3169_p13 = pneg %p3168_p9 }
  0x4a   : > { %7872 = vst [vmem:[#allocation34_spill] sm:$0xff] %v3429_v39 }
  0x4b   : > { %7873 = vst [vmem:[#allocation35_spill] sm:$0xff] %v3436_v43 }
  0x4c   : > { %7874 = vst [vmem:[#allocation36_spill] sm:$0xff] %v3439_v44 }
  0x4d   : > { %7875 = vst [vmem:[#allocation37_spill] sm:$0xff] %v3442_v45 }
  0x4e   : > { %7876 = vst [vmem:[#allocation38_spill] sm:$0xff] %v3449_v49 }
  0x4f   : > { %7877 = vst [vmem:[#allocation39_spill] sm:$0xff] %v3452_v50 }
  0x50   : > { %7878 = vst [vmem:[#allocation40_spill] sm:$0xff] %v3455_v51 }
  0x51   : > { %7879 = vst [vmem:[#allocation41_spill] sm:$0xff] %v3462_v55 }
  0x52   : > { %7880 = vst [vmem:[#allocation42_spill] sm:$0xff] %v3465_v56 }
  0x53   : > { %7881 = vst [vmem:[#allocation43_spill] sm:$0xff] %v3475_v53  ;;  %v3608_v53 = vmul.f32 0.5, %v3465_v56 }
  0x54   : > { %7882 = vst [vmem:[#allocation44_spill] sm:$0xff] %v3481_v48  ;;  %v3605_v48 = vmul.f32 0.5, %v3462_v55 }
  0x55   : > { %7883 = vst [vmem:[#allocation45_spill] sm:$0xff] %v3487_v60  ;;  %v3602_v60 = vmul.f32 0.5, %v3455_v51 }
  0x56   : > { %7884 = vst [vmem:[#allocation46_spill] sm:$0xff] %v3493_v47  ;;  %v3599_v47 = vmul.f32 0.5, %v3452_v50 }
  0x57   : > { %7885 = vst [vmem:[#allocation47_spill] sm:$0xff] %v3515_v42 }
  0x58   : > { %7886 = vst [vmem:[#allocation48_spill] sm:$0xff] %v3518_v61 }
  0x59   : > { %7887 = vst [vmem:[#allocation49_spill] sm:$0xff] %v3521_v63 }
  0x5a   : > { %7888 = vst [vmem:[#allocation50_spill] sm:$0xff] %v3524_v54 }
  0x5b   : > { %7889 = vst [vmem:[#allocation51_spill] sm:$0xff] %v3527_v52 }
  0x5c   : > { %7890 = vst [vmem:[#allocation52_spill] sm:$0xff] %v3530_v57 }
  0x5d   : > { %7891 = vst [vmem:[#allocation53_spill] sm:$0xff] %v3533_v59 }
  0x5e   : > { %7892 = vst [vmem:[#allocation54_spill] sm:$0xff] %v3536_v58 }
  0x5f   : > { %7893 = vst [vmem:[#allocation55_spill] sm:$0xff] %v3539_v46 }
  0x60   : > { %7894 = vst [vmem:[#allocation56_spill] sm:$0xff] %v3542_v62 }
  0x61   : > { %7895 = vst [vmem:[#allocation57_spill] sm:$0xff] %v3545_v41 }
  0x62   : > { %7896 = vst [vmem:[#allocation58_spill] sm:$0xff] %v3548_v40  ;;  %v3724_v40 = vmul.f32 0.70710677, %v3465_v56 }
  0x63   : > { %7897 = vst [vmem:[#allocation59_spill] sm:$0xff] %v3551_v36 }
  0x64   : > { %7898 = vst [vmem:[#allocation60_spill] sm:$0xff] %v3554_v35  ;;  %v3713_v35 = vmul.f32 0.70710677, %v3452_v50 }
  0x65   : > { %7899 = vst [vmem:[#allocation61_spill] sm:$0xff] %v3557_v34 }
  0x66   : > { %7900 = vst [vmem:[#allocation62_spill] sm:$0xff] %v3560_v30  ;;  %v3701_v30 = vmul.f32 0.70710677, %v3439_v44  ;;  %vm373_vm6 = vcmp.ge.f32.partialorder %v3713_v35, 0.0 }
  0x67   : > { %7901 = vst [vmem:[#allocation63_spill] sm:$0xff] %v3563_v29 }
  0x68   : > { %7902 = vst [vmem:[#allocation64_spill] sm:$0xff] %v3566_v28  ;;  %v3689_v28 = vmul.f32 0.70710677, %v3426_v38  ;;  %vm370_vm8 = vcmp.ge.f32.partialorder %v3701_v30, 0.0 }
  0x69   : > { %7903 = vst [vmem:[#allocation65_spill] sm:$0xff] %v3569_v24 }
  0x6a   : > { %7904 = vst [vmem:[#allocation66_spill] sm:$0xff] %v3572_v23  ;;  %v3680_v23 = vmul.f32 0.70710677, %v3416_v33  ;;  %vm367_vm14 = vcmp.ge.f32.partialorder %v3689_v28, 0.0 }
  0x6b   : > { %7905 = vst [vmem:[#allocation67_spill] sm:$0xff] %v3575_v22  ;;  %v3677_v22 = vmul.f32 0.70710677, %v3413_v32 }
  0x6c   : > { %7906 = vst [vmem:[#allocation68_spill] sm:$0xff] %v3578_v18  ;;  %v3671_v18 = vmul.f32 0.70710677, %v3410_v31  ;;  %vm365_vm12 = vcmp.ge.f32.partialorder %v3680_v23, 0.0 }
  0x6d   : > { %7907 = vst [vmem:[#allocation69_spill] sm:$0xff] %v3581_v17  ;;  %v3668_v17 = vmul.f32 0.70710677, %v3404_v27  ;;  %vm364_vm11 = vcmp.ge.f32.partialorder %v3677_v22, 0.0 }
  0x6e   : > { %7908 = vst [vmem:[#allocation70_spill] sm:$0xff] %v3584_v16  ;;  %v3661_v16 = vmul.f32 0.70710677, %v3398_v25 }
  0x6f   : > { %7909 = vst [vmem:[#allocation71_spill] sm:$0xff] %v3587_v12  ;;  %v3658_v12 = vmul.f32 0.70710677, %v3392_v21 }
  0x70   : > { %7910 = vst [vmem:[#allocation72_spill] sm:$0xff] %v3590_v11  ;;  %v3611_v11 = vmul.f32 0.70710677, %v3343_v0  ;;  %v3631_v0 = vmul.f32 0.70710677, %v3362_v7 }
  0x71   : > { %7911 = vst [vmem:[#allocation73_spill] sm:$0xff] %v3593_v10  ;;  %v3615_v10 = vmul.f32 0.70710677, %v3346_v1  ;;  %v3635_v1 = vmul.f32 0.70710677, %v3365_v8 }
  0x72   : > { %7912 = vst [vmem:[#allocation74_spill] sm:$0xff] %v3596_v6  ;;  %v3618_v6 = vmul.f32 0.70710677, %v3349_v2  ;;  %v3638_v2 = vmul.f32 0.70710677, %v3368_v9  ;;  %v3673_v9 = vpop.eup %2729  ;;  %vm345_vm0 = vcmp.ge.f32.partialorder %v3611_v11, 0.0  ;;  %2761 = vtanh.f32 %v3416_v33 }
  0x73   : > { %7913 = vst [vmem:[#allocation75_spill] sm:$0xff] %v3599_v47  ;;  %v3621_v47 = vmul.f32 0.70710677, %v3352_v3  ;;  %v3641_v3 = vmul.f32 0.70710677, %v3374_v13  ;;  %v3685_v24 = vpop.eup %2731  ;;  %vm346_vm1 = vcmp.ge.f32.partialorder %v3615_v10, 0.0  ;;  %2763 = vtanh.f32 %v3423_v37 }
  0x74   : > { %7914 = vst [vmem:[#allocation76_spill] sm:$0xff] %v3602_v60  ;;  %v3651_v60 = vmul.f32 0.70710677, %v3386_v19  ;;  %v3655_v7 = vmul.f32 0.70710677, %v3389_v20  ;;  %v3697_v29 = vpop.eup %2733  ;;  %vm347_vm2 = vcmp.ge.f32.partialorder %v3618_v6, 0.0  ;;  %2765 = vtanh.f32 %v3426_v38 }
  0x75   : > { %7915 = vst [vmem:[#allocation77_spill] sm:$0xff] %v3605_v48  ;;  %v3625_v48 = vmul.f32 0.70710677, %v3355_v4  ;;  %v3645_v4 = vmul.f32 0.70710677, %v3377_v14  ;;  %v3709_v34 = vpop.eup %2735  ;;  %vm348_vm3 = vcmp.ge.f32.partialorder %v3621_v47, 0.0  ;;  %2767 = vtanh.f32 %v3429_v39 }
  0x76   : > { %7916 = vst [vmem:[#allocation78_spill] sm:$0xff] %v3608_v53  ;;  %v3628_v53 = vmul.f32 0.70710677, %v3358_v5  ;;  %v3648_v5 = vmul.f32 0.70710677, %v3380_v15  ;;  %v3721_v36 = vpop.eup %2737  ;;  %2769 = vtanh.f32 %v3436_v43 }
  0x77   : > { %v3665_v8 = vmul.f32 0.70710677, %v3401_v26  ;;  %7917 = vst [vmem:[#allocation79_spill] sm:$0xff] %v3673_v9  ;;  %v3683_v13 = vmul.f32 0.70710677, %v3423_v37  ;;  %vm349_vm4 = vcmp.ge.f32.partialorder %v3625_v48, 0.0 }
  0x78   : > { %7918 = vst [vmem:[#allocation80_spill] sm:$0xff] %v3685_v24  ;;  %v3692_v9 = vmul.f32 0.70710677, %v3429_v39  ;;  %v3695_v14 = vmul.f32 0.70710677, %v3436_v43  ;;  %vm350_vm5 = vcmp.ge.f32.partialorder %v3628_v53, 0.0 }
  0x79   : > { %7919 = vst [vmem:[#allocation81_spill] sm:$0xff] %v3697_v29  ;;  %v3704_v24 = vmul.f32 0.70710677, %v3442_v45  ;;  %v3707_v15 = vmul.f32 0.70710677, %v3449_v49  ;;  %vm366_vm13 = vcmp.ge.f32.partialorder %v3683_v13, 0.0 }
  0x7a   : > { %7920 = vst [vmem:[#allocation82_spill] sm:$0xff] %v3709_v34  ;;  %v3716_v29 = vmul.f32 0.70710677, %v3455_v51  ;;  %v3719_v19 = vmul.f32 0.70710677, %v3462_v55  ;;  %v3729_v34 = vpop.eup %2739  ;;  %vm368_vm7 = vcmp.ge.f32.partialorder %v3692_v9, 0.0  ;;  %2771 = vtanh.f32 %v3439_v44 }
  0x7b   : > { %7921 = vst [vmem:[#allocation83_spill] sm:$0xff] %v3721_v36  ;;  %v3735_v36 = vpop.eup %2741  ;;  %vm369_vm15 = vcmp.ge.f32.partialorder %v3695_v14, 0.0  ;;  %vm371_vm9 = vcmp.ge.f32.partialorder %v3704_v24, 0.0  ;;  %vm372_vm10 = vcmp.ge.f32.partialorder %v3707_v15, 0.0  ;;  %v3784_v20 = vand.u32 2147483647, %v3615_v10 }
  0x7c   : > { %7922 = vst [vmem:[#allocation84_spill] sm:$0xff] %v3729_v34  ;;  %v3741_v56 = vpop.eup %2743  ;;  %v3995_v32 = vand.u32 2147483647, %v3695_v14  ;;  %v4016_v14 = vand.u32 2147483647, %v3716_v29  ;;  %2773 = vtanh.f32 %v3442_v45 }
  0x7d   : > { %7923 = vst [vmem:[#allocation85_spill] sm:$0xff] %v3735_v36  ;;  %v3747_v34 = vpop.eup %2745  ;;  %2775 = vtanh.f32 %v3449_v49 }
  0x7e   : > { %7924 = vst [vmem:[#allocation86_spill] sm:$0xff] %v3741_v56  ;;  %v3753_v36 = vpop.eup %2747  ;;  %2777 = vtanh.f32 %v3452_v50 }
  0x7f   : > { %7925 = vst [vmem:[#allocation87_spill] sm:$0xff] %v3747_v34  ;;  %v7676_v34 = vmov -1.0  }
  0x80   : > { %7926 = vst [vmem:[#allocation88_spill] sm:$0xff] %v3753_v36  ;;  %v3766_v36 = vand.u32 2147483647, %v3611_v11  ;;  %v3771_v56 = vsel %vm345_vm0, 1.0, %v7676_v34  ;;  %v3776_v55 = vsel %vm346_vm1, 1.0, %v7676_v34  ;;  %v3781_v51 = vsel %vm347_vm2, 1.0, %v7676_v34 }
  0x81   : > { %7928 = vst [vmem:[#allocation90_spill] sm:$0xff] %v3771_v56  ;;  %v3789_v41 = vsel %vm348_vm3, 1.0, %v7676_v34  ;;  %v3794_v11 = vsel %vm349_vm4, 1.0, %v7676_v34  ;;  %v3799_v62 = vsel %vm350_vm5, 1.0, %v7676_v34  ;;  %vm7935_vm0 = vcmp.ge.f32.partialorder %v3631_v0, 0.0 }
  0x82   : > { %7927 = vst [vmem:[#allocation89_spill] sm:$0xff] %v3766_v36  ;;  %v3804_v10 = vsel %vm7935_vm0, 1.0, %v7676_v34  ;;  %vm7937_vm1 = vcmp.ge.f32.partialorder %v3635_v1, 0.0  ;;  %vm7939_vm2 = vcmp.ge.f32.partialorder %v3638_v2, 0.0  ;;  %vm7941_vm3 = vcmp.ge.f32.partialorder %v3641_v3, 0.0 }
  0x83   : > { %7929 = vst [vmem:[#allocation91_spill] sm:$0xff] %v3776_v55  ;;  %v3809_v46 = vsel %vm7937_vm1, 1.0, %v7676_v34  ;;  %v3814_v58 = vsel %vm7939_vm2, 1.0, %v7676_v34  ;;  %v3819_v59 = vsel %vm7941_vm3, 1.0, %v7676_v34  ;;  %vm7943_vm4 = vcmp.ge.f32.partialorder %v3645_v4, 0.0 }
  0x84   : > { %7930 = vst [vmem:[#allocation92_spill] sm:$0xff] %v3781_v51  ;;  %v3824_v57 = vsel %vm7943_vm4, 1.0, %v7676_v34  ;;  %vm7945_vm5 = vcmp.ge.f32.partialorder %v3648_v5, 0.0  ;;  %vm7947_vm0 = vcmp.ge.f32.partialorder %v3651_v60, 0.0  ;;  %vm7949_vm1 = vcmp.ge.f32.partialorder %v3655_v7, 0.0 }
  0x85   : > { %7931 = vst [vmem:[#allocation93_spill] sm:$0xff] %v3784_v20  ;;  %v3829_v52 = vsel %vm7945_vm5, 1.0, %v7676_v34  ;;  %v3834_v54 = vsel %vm7947_vm0, 1.0, %v7676_v34  ;;  %v3839_v63 = vsel %vm7949_vm1, 1.0, %v7676_v34  ;;  %vm7951_vm2 = vcmp.ge.f32.partialorder %v3658_v12, 0.0 }
  0x86   : > { %7932 = vst [vmem:[#allocation94_spill] sm:$0xff] %v3789_v41  ;;  %v3844_v61 = vsel %vm7951_vm2, 1.0, %v7676_v34  ;;  %vm7953_vm3 = vcmp.ge.f32.partialorder %v3661_v16, 0.0  ;;  %vm7955_vm4 = vcmp.ge.f32.partialorder %v3665_v8, 0.0  ;;  %vm7957_vm5 = vcmp.ge.f32.partialorder %v3668_v17, 0.0 }
  0x87   : > { %7933 = vst [vmem:[#allocation95_spill] sm:$0xff] %v3794_v11  ;;  %v3849_v42 = vsel %vm7953_vm3, 1.0, %v7676_v34  ;;  %vm7959_vm0 = vcmp.ge.f32.partialorder %v3671_v18, 0.0 }
  0x88   : > { %7934 = vst [vmem:[#allocation96_spill] sm:$0xff] %v3799_v62 }
  0x89   : > { %7936 = vst [vmem:[#allocation97_spill] sm:$0xff] %v3804_v10 }
  0x8a   : > { %7938 = vst [vmem:[#allocation98_spill] sm:$0xff] %v3809_v46 }
  0x8b   : > { %7940 = vst [vmem:[#allocation99_spill] sm:$0xff] %v3814_v58 }
  0x8c   : > { %7942 = vst [vmem:[#allocation100_spill] sm:$0xff] %v3819_v59 }
  0x8d   : > { %7944 = vst [vmem:[#allocation101_spill] sm:$0xff] %v3824_v57  ;;  %v3927_v57 = vand.u32 2147483647, %v3628_v53  ;;  %v3947_v53 = vand.u32 2147483647, %v3648_v5 }
  0x8e   : > { %7946 = vst [vmem:[#allocation102_spill] sm:$0xff] %v3829_v52  ;;  %v3854_v52 = vsel %vm7955_vm4, 1.0, %v7676_v34  ;;  %v3969_v5 = vand.u32 2147483647, %v3668_v17  ;;  %v3989_v17 = vand.u32 2147483647, %v3689_v28 }
  0x8f   : > { %7948 = vst [vmem:[#allocation103_spill] sm:$0xff] %v3834_v54  ;;  %v3859_v54 = vsel %vm7957_vm5, 1.0, %v7676_v34  ;;  %v446_v39 = vmul.f32 0.3275911, %v3927_v57 }
  0x90   : > { %7950 = vst [vmem:[#allocation104_spill] sm:$0xff] %v3839_v63  ;;  %v3864_v63 = vsel %vm7959_vm0, 1.0, %v7676_v34  ;;  %v458_v62 = vmul.f32 0.3275911, %v3969_v5 }
  0x91   : > { %7952 = vst [vmem:[#allocation105_spill] sm:$0xff] %v3844_v61  ;;  %v3869_v61 = vsel %vm364_vm11, 1.0, %v7676_v34 }
  0x92   : > { %7954 = vst [vmem:[#allocation106_spill] sm:$0xff] %v3849_v42  ;;  %v3874_v42 = vsel %vm365_vm12, 1.0, %v7676_v34 }
  0x93   : > { %7956 = vst [vmem:[#allocation107_spill] sm:$0xff] %v3854_v52  ;;  %v3879_v52 = vsel %vm366_vm13, 1.0, %v7676_v34 }
  0x94   : > { %7958 = vst [vmem:[#allocation108_spill] sm:$0xff] %v3859_v54  ;;  %v3884_v54 = vsel %vm367_vm14, 1.0, %v7676_v34 }
  0x95   : > { %7960 = vst [vmem:[#allocation109_spill] sm:$0xff] %v3864_v63  ;;  %v3889_v63 = vsel %vm368_vm7, 1.0, %v7676_v34  ;;  %vm375_vm7 = vcmp.ge.f32.partialorder %v3719_v19, 0.0 }
  0x96   : > { %7961 = vst [vmem:[#allocation110_spill] sm:$0xff] %v3869_v61  ;;  %v3894_v61 = vsel %vm369_vm15, 1.0, %v7676_v34 }
  0x97   : > { %7962 = vst [vmem:[#allocation111_spill] sm:$0xff] %v3874_v42  ;;  %v3899_v42 = vsel %vm370_vm8, 1.0, %v7676_v34  ;;  %vm376_vm8 = vcmp.ge.f32.partialorder %v3724_v40, 0.0 }
  0x98   : > { %7963 = vst [vmem:[#allocation112_spill] sm:$0xff] %v3879_v52  ;;  %v3904_v52 = vsel %vm371_vm9, 1.0, %v7676_v34 }
  0x99   : > { %7964 = vst [vmem:[#allocation113_spill] sm:$0xff] %v3884_v54  ;;  %v3909_v54 = vsel %vm372_vm10, 1.0, %v7676_v34 }
  0x9a   : > { %7965 = vst [vmem:[#allocation114_spill] sm:$0xff] %v3889_v63  ;;  %v3914_v63 = vsel %vm373_vm6, 1.0, %v7676_v34  ;;  %v3934_v34 = vand.u32 2147483647, %v3635_v1  ;;  %vm374_vm6 = vcmp.ge.f32.partialorder %v3716_v29, 0.0 }
  0x9b   : > { %7966 = vst [vmem:[#allocation115_spill] sm:$0xff] %v3894_v61  ;;  %v3917_v61 = vand.u32 2147483647, %v3618_v6  ;;  %v3937_v6 = vand.u32 2147483647, %v3638_v2 }
  0x9c   : > { %7967 = vst [vmem:[#allocation116_spill] sm:$0xff] %v3899_v42  ;;  %v3920_v42 = vand.u32 2147483647, %v3621_v47  ;;  %v3940_v47 = vand.u32 2147483647, %v3641_v3 }
  0x9d   : > { %7968 = vst [vmem:[#allocation117_spill] sm:$0xff] %v3904_v52  ;;  %v3924_v52 = vand.u32 2147483647, %v3625_v48  ;;  %v3944_v48 = vand.u32 2147483647, %v3645_v4 }
  0x9e   : > { %7969 = vst [vmem:[#allocation118_spill] sm:$0xff] %v3909_v54  ;;  %v3930_v54 = vand.u32 2147483647, %v3631_v0  ;;  %v3950_v0 = vand.u32 2147483647, %v3651_v60 }
  0x9f   : > { %7970 = vst [vmem:[#allocation119_spill] sm:$0xff] %v3914_v63  ;;  %v3955_v1 = vand.u32 2147483647, %v3655_v7  ;;  %v3958_v2 = vand.u32 2147483647, %v3658_v12 }
  0xa0   : > { %7971 = vst [vmem:[#allocation120_spill] sm:$0xff] %v3917_v61  ;;  %v3961_v3 = vand.u32 2147483647, %v3661_v16  ;;  %v3966_v4 = vand.u32 2147483647, %v3665_v8  ;;  %v3985_v8 = vpop.eup %2749 }
  0xa1   : > { %7972 = vst [vmem:[#allocation121_spill] sm:$0xff] %v3920_v42  ;;  %v3972_v60 = vand.u32 2147483647, %v3671_v18  ;;  %v3977_v7 = vand.u32 2147483647, %v3677_v22  ;;  %v3997_v22 = vpop.eup %2751 }
  0xa2   : > { %7973 = vst [vmem:[#allocation122_spill] sm:$0xff] %v3924_v52  ;;  %v3980_v12 = vand.u32 2147483647, %v3680_v23  ;;  %v3983_v16 = vand.u32 2147483647, %v3683_v13  ;;  %v4009_v28 = vpop.eup %2753 }
  0xa3   : > { %7974 = vst [vmem:[#allocation123_spill] sm:$0xff] %v3927_v57  ;;  %v3992_v18 = vand.u32 2147483647, %v3692_v9  ;;  %v4001_v13 = vand.u32 2147483647, %v3701_v30  ;;  %v4021_v30 = vpop.eup %2755 }
  0xa4   : > { %7975 = vst [vmem:[#allocation124_spill] sm:$0xff] %v3930_v54  ;;  %v4004_v23 = vand.u32 2147483647, %v3704_v24  ;;  %v4013_v9 = vand.u32 2147483647, %v3713_v35  ;;  %v4029_v38 = vpop.eup %2757 }
  0xa5   : > { %7976 = vst [vmem:[#allocation125_spill] sm:$0xff] %v3934_v34  ;;  %v441_v24 = vmul.f32 0.3275911, %v3766_v36  ;;  %v443_v35 = vmul.f32 0.3275911, %v3917_v61 }
  0xa6   : > { %7977 = vst [vmem:[#allocation126_spill] sm:$0xff] %v3937_v6  ;;  %v444_v37 = vmul.f32 0.3275911, %v3920_v42  ;;  %v445_v33 = vmul.f32 0.3275911, %v3924_v52 }
  0xa7   : > { %7978 = vst [vmem:[#allocation127_spill] sm:$0xff] %v3940_v47  ;;  %v447_v31 = vmul.f32 0.3275911, %v3930_v54  ;;  %v448_v27 = vmul.f32 0.3275911, %v3934_v34 }
  0xa8   : > { %7979 = vst [vmem:[#allocation128_spill] sm:$0xff] %v3944_v48  ;;  %v450_v43 = vmul.f32 0.3275911, %v3940_v47  ;;  %v451_v25 = vmul.f32 0.3275911, %v3944_v48  ;;  %v4103_v55 = vadd.f32 1.0, %v445_v33 }
  0xa9   : > { %7980 = vst [vmem:[#allocation129_spill] sm:$0xff] %v3947_v53  ;;  %v453_v44 = vmul.f32 0.3275911, %v3950_v0  ;;  %v454_v63 = vmul.f32 0.3275911, %v3955_v1  ;;  %v4116_v33 = vadd.f32 1.0, %v448_v27 }
  0xaa   : > { %7981 = vst [vmem:[#allocation130_spill] sm:$0xff] %v3950_v0  ;;  %v455_v58 = vmul.f32 0.3275911, %v3958_v2  ;;  %v456_v46 = vmul.f32 0.3275911, %v3961_v3  ;;  %vm570_vm14 = vweird.f32 %v4103_v55 }
  0xab   : > { %7982 = vst [vmem:[#allocation131_spill] sm:$0xff] %v3955_v1  ;;  %v460_v11 = vmul.f32 0.3275911, %v3977_v7  ;;  %v462_v41 = vmul.f32 0.3275911, %v3983_v16  ;;  %v4134_v27 = vadd.f32 1.0, %v454_v63 }
  0xac   : > { %7983 = vst [vmem:[#allocation132_spill] sm:$0xff] %v3958_v2  ;;  %v467_v50 = vmul.f32 0.3275911, %v4004_v23  ;;  %v469_v56 = vmul.f32 0.3275911, %v4013_v9 }
  0xad   : > { %7984 = vst [vmem:[#allocation133_spill] sm:$0xff] %v3961_v3  ;;  %v574_v52 = vand.u32 2147483647, %v4103_v55 }
  0xae   : > { %7985 = vst [vmem:[#allocation134_spill] sm:$0xff] %v3966_v4 }
  0xaf   : > { %7986 = vst [vmem:[#allocation135_spill] sm:$0xff] %v3969_v5 }
  0xb0   : > { %7987 = vst [vmem:[#allocation136_spill] sm:$0xff] %v3972_v60 }
  0xb1   : > { %7988 = vst [vmem:[#allocation137_spill] sm:$0xff] %v3977_v7 }
  0xb2   : > { %7989 = vst [vmem:[#allocation138_spill] sm:$0xff] %v3980_v12 }
  0xb3   : > { %7990 = vst [vmem:[#allocation139_spill] sm:$0xff] %v3983_v16 }
  0xb4   : > { %7991 = vst [vmem:[#allocation140_spill] sm:$0xff] %v3985_v8  ;;  %v4007_v8 = vand.u32 2147483647, %v3707_v15  ;;  %v4025_v15 = vand.u32 2147483647, %v3724_v40 }
  0xb5   : > { %7992 = vst [vmem:[#allocation141_spill] sm:$0xff] %v3989_v17  ;;  %v465_v40 = vmul.f32 0.3275911, %v3995_v32 }
  0xb6   : > { %7993 = vst [vmem:[#allocation142_spill] sm:$0xff] %v3992_v18 }
  0xb7   : > { %7994 = vst [vmem:[#allocation143_spill] sm:$0xff] %v3995_v32  ;;  %v470_v32 = vmul.f32 0.3275911, %v4016_v14  ;;  %v4161_v16 = vadd.f32 1.0, %v465_v40 }
  0xb8   : > { %7995 = vst [vmem:[#allocation144_spill] sm:$0xff] %v3997_v22  ;;  %v4019_v22 = vand.u32 2147483647, %v3719_v19  ;;  %v4084_v19 = vadd.f32 1.0, %v443_v35 }
  0xb9   : > { %7996 = vst [vmem:[#allocation145_spill] sm:$0xff] %v4001_v13 }
  0xba   : > { %7997 = vst [vmem:[#allocation146_spill] sm:$0xff] %v4004_v23  ;;  %vm540_vm11 = vweird.f32 %v4084_v19 }
  0xbb   : > { %7998 = vst [vmem:[#allocation147_spill] sm:$0xff] %v4007_v8 }
  0xbc   : > { %7999 = vst [vmem:[#allocation148_spill] sm:$0xff] %v4009_v28  ;;  %v442_v28 = vmul.f32 0.3275911, %v3784_v20 }
  0xbd   : > { %8000 = vst [vmem:[#allocation149_spill] sm:$0xff] %v4013_v9 }
  0xbe   : > { %8001 = vst [vmem:[#allocation150_spill] sm:$0xff] %v4016_v14  ;;  %v4073_v29 = vadd.f32 1.0, %v442_v28  ;;  %v461_v28 = vmul.f32 0.3275911, %v3980_v12  ;;  %v4125_v14 = vadd.f32 1.0, %v451_v25  ;;  %v4144_v25 = vadd.f32 1.0, %v458_v62 }
  0xbf   : > { %8002 = vst [vmem:[#allocation151_spill] sm:$0xff] %v4019_v22 }
  0xc0   : > { %8003 = vst [vmem:[#allocation152_spill] sm:$0xff] %v4021_v30  ;;  %v4035_v30 = vpop.eup %2759  ;;  %v4153_v63 = vadd.f32 1.0, %v461_v28  ;;  %v4173_v28 = vadd.f32 1.0, %v469_v56  ;;  %v546_v56 = vand.u32 2147483648, %v4084_v19  ;;  %vm525_vm10 = vweird.f32 %v4073_v29 }
  0xc1   : > { %8004 = vst [vmem:[#allocation153_spill] sm:$0xff] %v4025_v15  ;;  %v4041_v26 = vpop.eup %2761 }
  0xc2   : > { %8005 = vst [vmem:[#allocation154_spill] sm:$0xff] %v4029_v38  ;;  %v449_v38 = vmul.f32 0.3275911, %v3937_v6  ;;  %v4047_v21 = vpop.eup %2763  ;;  %v4208_v47 = vor.u32 1.1754944e-38, %v546_v56 }
  0xc3   : > { %8006 = vst [vmem:[#allocation155_spill] sm:$0xff] %v4035_v30  ;;  %v452_v30 = vmul.f32 0.3275911, %v3947_v53  ;;  %v4053_v59 = vpop.eup %2765 }
  0xc4   : > { %8007 = vst [vmem:[#allocation156_spill] sm:$0xff] %v4041_v26  ;;  %v8010_v26 = vmov -1.0   ;;  %v4064_v49 = vpop.eup %2767  ;;  %v4118_v23 = vadd.f32 1.0, %v449_v38  ;;  %v4136_v38 = vadd.f32 1.0, %v455_v58  ;;  %v4155_v58 = vadd.f32 1.0, %v462_v41 }
  0xc5   : > { %8008 = vst [vmem:[#allocation157_spill] sm:$0xff] %v4047_v21  ;;  %v4058_v45 = vsel %vm374_vm6, 1.0, %v8010_v26  ;;  %v4062_v21 = vadd.f32 1.0, %v441_v24  ;;  %v4069_v10 = vsel %vm375_vm7, 1.0, %v8010_v26  ;;  %v4080_v24 = vsel %vm376_vm8, 1.0, %v8010_v26 }
  0xc6   : > { %8009 = vst [vmem:[#allocation158_spill] sm:$0xff] %v4053_v59  ;;  %v457_v59 = vmul.f32 0.3275911, %v3966_v4  ;;  %v464_v26 = vmul.f32 0.3275911, %v3992_v18  ;;  %v4112_v18 = vadd.f32 1.0, %v446_v39 }
  0xc7   : > { %8011 = vst [vmem:[#allocation159_spill] sm:$0xff] %v4058_v45  ;;  %v4075_v45 = vpop.eup %2769  ;;  %2779 = vrcp.f32 %v4062_v21  ;;  %v4138_v39 = vadd.f32 1.0, %v456_v46  ;;  %v4175_v41 = vadd.f32 1.0, %v470_v32  ;;  %vm510_vm9 = vweird.f32 %v4062_v21 }
  0xc8   : > { %8012 = vst [vmem:[#allocation160_spill] sm:$0xff] %v4064_v49  ;;  %v459_v49 = vmul.f32 0.3275911, %v3972_v60  ;;  %2781 = vrcp.f32 %v4073_v29  ;;  %v531_v32 = vand.u32 2147483648, %v4073_v29  ;;  %vm4256_vm6 = vcmp.eq.f32.partialorder %v574_v52, 8.507059e+37 }
  0xc9   : > { %8013 = vst [vmem:[#allocation161_spill] sm:$0xff] %v4069_v10  ;;  %v4086_v10 = vpop.eup %2771  ;;  %2783 = vrcp.f32 %v4084_v19  ;;  %v636_v20 = vand.u32 2147483648, %v4118_v23 }
  0xca   : > { %8014 = vst [vmem:[#allocation162_spill] sm:$0xff] %v4075_v45  ;;  %v463_v45 = vmul.f32 0.3275911, %v3989_v17  ;;  %v4092_v51 = vpop.eup %2773  ;;  %v4120_v17 = vadd.f32 1.0, %v450_v43  ;;  %v4140_v43 = vadd.f32 1.0, %v457_v59  ;;  %v4159_v59 = vadd.f32 1.0, %v464_v26 }
  0xcb   : > { %8015 = vst [vmem:[#allocation163_spill] sm:$0xff] %v4080_v24  ;;  %v4096_v24 = vadd.f32 1.0, %v444_v37  ;;  %v4099_v35 = vpop.eup %2775  ;;  %v471_v37 = vmul.f32 0.3275911, %v4019_v22  ;;  %v4129_v22 = vadd.f32 1.0, %v453_v44  ;;  %v4148_v44 = vadd.f32 1.0, %v460_v11 }
  0xcc   : > { %8016 = vst [vmem:[#allocation164_spill] sm:$0xff] %v4086_v10  ;;  %v466_v10 = vmul.f32 0.3275911, %v4001_v13  ;;  %v4114_v13 = vadd.f32 1.0, %v447_v31  ;;  %v4123_v9 = vpop.eup %2777  ;;  %v4157_v46 = vadd.f32 1.0, %v463_v45  ;;  %v4206_v48 = vor.u32 1.1754944e-38, %v531_v32 }
  0xcd   : > { %8017 = vst [vmem:[#allocation165_spill] sm:$0xff] %v4092_v51  ;;  %v468_v51 = vmul.f32 0.3275911, %v4007_v8  ;;  %2785 = vrcp.f32 %v4096_v24  ;;  %v4127_v8 = vadd.f32 1.0, %v452_v30  ;;  %v4132_v31 = vpop.eup %2779  ;;  %v4146_v30 = vadd.f32 1.0, %v459_v49 }
  0xce   : > { %8018 = vst [vmem:[#allocation166_spill] sm:$0xff] %v4099_v35  ;;  %v472_v35 = vmul.f32 0.3275911, %v4025_v15  ;;  %2787 = vrcp.f32 %v4103_v55  ;;  %v4142_v15 = vpop.eup %2781  ;;  %v4163_v62 = vadd.f32 1.0, %v466_v10  ;;  %v4165_v49 = vadd.f32 1.0, %v467_v50 }
  0xcf   : > { %8019 = vst [vmem:[#allocation167_spill] sm:$0xff] %v4123_v9  ;;  %2789 = vrcp.f32 %v4112_v18  ;;  %v4151_v9 = vpop.eup %2783  ;;  %v506_v11 = vmul.f32 %v4132_v31, %v4062_v21  ;;  %v4171_v7 = vadd.f32 1.0, %v468_v51  ;;  %v521_v45 = vmul.f32 %v4142_v15, %v4073_v29 }
  0xd0   : > { %v4181_v10 = vadd.f32 1.0, %v471_v37  ;;  %v516_v50 = vand.u32 2147483648, %v4062_v21  ;;  %v536_v40 = vmul.f32 %v4151_v9, %v4084_v19  ;;  %2791 = vrcp.f32 %v4114_v13 }
  0xd1   : > { %v4187_v51 = vadd.f32 1.0, %v472_v35  ;;  %v507_v5 = vsub.f32 1.0, %v506_v11  ;;  %v514_v37 = vand.u32 2147483647, %v4062_v21  ;;  %v522_v3 = vsub.f32 1.0, %v521_v45 }
  0xd2   : > { %v529_v35 = vand.u32 2147483647, %v4073_v29  ;;  %v4202_v1 = vor.u32 1.1754944e-38, %v516_v50  ;;  %v537_v0 = vsub.f32 1.0, %v536_v40  ;;  %v544_v11 = vand.u32 2147483647, %v4084_v19 }
  0xd3   : > { %v4169_v12 = vpop.eup %2785  ;;  %8020 = vst [vmem:[#allocation168_spill] sm:$0xff] %v4187_v51  ;;  %v561_v53 = vand.u32 2147483648, %v4096_v24  ;;  %vm555_vm12 = vweird.f32 %v4096_v24  ;;  %v508_v34 = vmul.f32 %v4132_v31, %v507_v5  ;;  %vm4216_vm13 = vcmp.eq.f32.partialorder %v514_v37, 8.507059e+37 }
  0xd4   : > { %v4179_v26 = vpop.eup %2787  ;;  %v551_v4 = vmul.f32 %v4169_v12, %v4096_v24  ;;  %v559_v54 = vand.u32 2147483647, %v4096_v24  ;;  %v523_v32 = vmul.f32 %v4142_v15, %v522_v3  ;;  %vm4223_vm15 = vcmp.eq.f32.partialorder %v529_v35, 8.507059e+37 }
  0xd5   : > { %v4192_v60 = vpop.eup %2789  ;;  %v566_v2 = vmul.f32 %v4179_v26, %v4103_v55  ;;  %2793 = vrcp.f32 %v4116_v33  ;;  %vm511_vm1 = vweird.f32 %v4132_v31  ;;  %v538_v5 = vmul.f32 %v4151_v9, %v537_v0 }
  0xd6   : > { %v581_v45 = vmul.f32 %v4192_v60, %v4112_v18  ;;  %v4213_v6 = vpop.eup %2791  ;;  %v552_v40 = vsub.f32 1.0, %v551_v4  ;;  %vm4231_vm2 = vcmp.eq.f32.partialorder %v544_v11, 8.507059e+37  ;;  %v562_v37 = vor.u32 1.1754944e-38, %v561_v53  ;;  %vm4250_vm0 = vmor %vm510_vm9, %vm511_vm1 }
  0xd7   : > { %v567_v57 = vsub.f32 1.0, %v566_v2  ;;  %v576_v3 = vand.u32 2147483648, %v4103_v55  ;;  %vm526_vm3 = vweird.f32 %v4142_v15  ;;  %vm541_vm4 = vweird.f32 %v4151_v9 }
  0xd8   : > { %v582_v2 = vsub.f32 1.0, %v581_v45  ;;  %v596_v35 = vmul.f32 %v4213_v6, %v4114_v13  ;;  %v509_v42 = vadd.f32 %v4132_v31, %v508_v34  ;;  %v553_v61 = vmul.f32 %v4169_v12, %v552_v40  ;;  %vm4263_vm7 = vmor %vm525_vm10, %vm526_vm3 }
  0xd9   : > { %vm4242_vm5 = vcmp.eq.f32.partialorder %v559_v54, 8.507059e+37  ;;  %v589_v53 = vand.u32 2147483647, %v4112_v18  ;;  %2795 = vrcp.f32 %v4118_v23  ;;  %v524_v45 = vadd.f32 %v4142_v15, %v523_v32  ;;  %vm4276_vm9 = vmor %vm540_vm11, %vm541_vm4 }
  0xda   : > { %v568_v34 = vmul.f32 %v4179_v26, %v567_v57  ;;  %v591_v54 = vand.u32 2147483648, %v4112_v18  ;;  %v539_v21 = vadd.f32 %v4151_v9, %v538_v5  ;;  %vm556_vm8 = vweird.f32 %v4169_v12 }
  0xdb   : > { %v577_v36 = vor.u32 1.1754944e-38, %v576_v3  ;;  %2797 = vrcp.f32 %v4120_v17  ;;  %v4270_v57 = vpop.eup %2793  ;;  %vm571_vm10 = vweird.f32 %v4179_v26  ;;  %v583_v29 = vmul.f32 %v4192_v60, %v582_v2  ;;  %vm4297_vm11 = vmor %vm555_vm12, %vm556_vm8 }
  0xdc   : > { %v597_v32 = vsub.f32 1.0, %v596_v35  ;;  %2799 = vrcp.f32 %v4125_v14  ;;  %v513_v5 = vsel %vm4250_vm0, %v4132_v31, %v509_v42  ;;  %v554_v3 = vadd.f32 %v4169_v12, %v553_v61  ;;  %vm4312_vm0 = vmor %vm570_vm14, %vm571_vm10 }
  0xdd   : > { %vm585_vm1 = vweird.f32 %v4112_v18  ;;  %vm4288_vm3 = vcmp.eq.f32.partialorder %v589_v53, 8.507059e+37  ;;  %v528_v51 = vsel %vm4263_vm7, %v4142_v15, %v524_v45  ;;  %v569_v42 = vadd.f32 %v4179_v26, %v568_v34 }
  0xde   : > { %vm586_vm4 = vweird.f32 %v4192_v60  ;;  %v592_v61 = vor.u32 1.1754944e-38, %v591_v54  ;;  %v543_v35 = vsel %vm4276_vm9, %v4151_v9, %v539_v21  ;;  %vm600_vm12 = vweird.f32 %v4114_v13 }
  0xdf   : > { %v4303_v31 = vpop.eup %2795  ;;  %v604_v15 = vand.u32 2147483647, %v4114_v13  ;;  %v611_v24 = vmul.f32 %v4270_v57, %v4116_v33  ;;  %v4323_v53 = vsel %vm4216_vm13, %v4202_v1, %v513_v5  ;;  %v584_v9 = vadd.f32 %v4192_v60, %v583_v29  ;;  %vm4342_vm13 = vmor %vm585_vm1, %vm586_vm4 }
  0xe0   : > { %v598_v55 = vmul.f32 %v4213_v6, %v597_v32  ;;  %2801 = vrcp.f32 %v4127_v8  ;;  %v4333_v45 = vsel %vm4223_vm15, %v4206_v48, %v528_v51  ;;  %v558_v34 = vsel %vm4297_vm11, %v4169_v12, %v554_v3 }
  0xe1   : > { %v4328_v11 = vpop.eup %2797  ;;  %v606_v50 = vand.u32 2147483648, %v4114_v13  ;;  %2803 = vrcp.f32 %v4129_v22  ;;  %v4353_v48 = vsel %vm4231_vm2, %v4208_v47, %v543_v35  ;;  %v573_v12 = vsel %vm4312_vm0, %v4179_v26, %v569_v42 }
  0xe2   : > { %v4348_v54 = vpop.eup %2799  ;;  %vm601_vm14 = vweird.f32 %v4213_v6  ;;  %v626_v18 = vmul.f32 %v4303_v31, %v4118_v23  ;;  %vm4361_vm15 = vcmp.eq.f32.partialorder %v604_v15, 8.507059e+37  ;;  %v612_v56 = vsub.f32 1.0, %v611_v24 }
  0xe3   : > { %v619_v21 = vand.u32 2147483647, %v4116_v33  ;;  %v621_v4 = vand.u32 2147483648, %v4116_v33  ;;  %v4369_v47 = vsel %vm4242_vm5, %v562_v37, %v558_v34  ;;  %v588_v26 = vsel %vm4342_vm13, %v4192_v60, %v584_v9  ;;  %vm4383_vm2 = vmor %vm600_vm12, %vm601_vm14 }
  0xe4   : > { %8047 = vst [vmem:[#allocation169_spill] sm:$0xff] %v4369_v47  ;;  %v599_v52 = vadd.f32 %v4213_v6, %v598_v55  ;;  %v641_v29 = vmul.f32 %v4328_v11, %v4120_v17  ;;  %v4379_v32 = vsel %vm4256_vm6, %v577_v36, %v573_v12  ;;  %v607_v37 = vor.u32 1.1754944e-38, %v606_v50 }
  0xe5   : > { %8048 = vst [vmem:[#allocation170_spill] sm:$0xff] %v4379_v32  ;;  %vm615_vm5 = vweird.f32 %v4116_v33  ;;  %v656_v60 = vmul.f32 %v4348_v54, %v4125_v14  ;;  %v627_v3 = vsub.f32 1.0, %v626_v18  ;;  %vm630_vm7 = vweird.f32 %v4118_v23 }
  0xe6   : > { %v4390_v0 = vpop.eup %2801  ;;  %v634_v36 = vand.u32 2147483647, %v4118_v23  ;;  %2805 = vrcp.f32 %v4134_v27  ;;  %v4399_v40 = vsel %vm4288_vm3, %v592_v61, %v588_v26  ;;  %v613_v2 = vmul.f32 %v4270_v57, %v612_v56 }
  0xe7   : > { %v4395_v13 = vpop.eup %2803  ;;  %8051 = vst [vmem:[#allocation171_spill] sm:$0xff] %v4399_v40  ;;  %vm4402_vm6 = vcmp.eq.f32.partialorder %v619_v21, 8.507059e+37  ;;  %v622_v35 = vor.u32 1.1754944e-38, %v621_v4  ;;  %v603_v15 = vsel %vm4383_vm2, %v4213_v6, %v599_v52  ;;  %v642_v24 = vsub.f32 1.0, %v641_v29 }
  0xe8   : > { %v649_v9 = vand.u32 2147483647, %v4120_v17  ;;  %v651_v19 = vand.u32 2147483648, %v4120_v17  ;;  %vm616_vm8 = vweird.f32 %v4270_v57  ;;  %v657_v61 = vsub.f32 1.0, %v656_v60 }
  0xe9   : > { %v664_v55 = vand.u32 2147483647, %v4125_v14  ;;  %v671_v34 = vmul.f32 %v4390_v0, %v4127_v8  ;;  %v628_v1 = vmul.f32 %v4303_v31, %v627_v3  ;;  %vm4417_vm9 = vcmp.eq.f32.partialorder %v634_v36, 8.507059e+37  ;;  %vm4435_vm3 = vmor %vm615_vm5, %vm616_vm8 }
  0xea   : > { %vm645_vm10 = vweird.f32 %v4120_v17  ;;  %v686_v6 = vmul.f32 %v4395_v13, %v4129_v22  ;;  %2807 = vrcp.f32 %v4136_v38  ;;  %v4427_v12 = vsel %vm4361_vm15, %v607_v37, %v603_v15 }
  0xeb   : > { %v614_v18 = vadd.f32 %v4270_v57, %v613_v2  ;;  %v637_v56 = vor.u32 1.1754944e-38, %v636_v20  ;;  %vm660_vm1 = vweird.f32 %v4125_v14  ;;  %vm631_vm11 = vweird.f32 %v4303_v31 }
  0xec   : > { %v4431_v21 = vpop.eup %2805  ;;  %v643_v26 = vmul.f32 %v4328_v11, %v642_v24  ;;  %vm4441_vm4 = vcmp.eq.f32.partialorder %v649_v9, 8.507059e+37  ;;  %v652_v52 = vor.u32 1.1754944e-38, %v651_v19  ;;  %v666_v29 = vand.u32 2147483648, %v4125_v14  ;;  %vm4463_vm13 = vmor %vm630_vm7, %vm631_vm11 }
  0xed   : > { %v658_v5 = vmul.f32 %v4348_v54, %v657_v61  ;;  %vm4447_vm0 = vcmp.eq.f32.partialorder %v664_v55, 8.507059e+37  ;;  %v672_v33 = vsub.f32 1.0, %v671_v34  ;;  %v679_v60 = vand.u32 2147483647, %v4127_v8 }
  0xee   : > { %v681_v3 = vand.u32 2147483648, %v4127_v8  ;;  %v629_v36 = vadd.f32 %v4303_v31, %v628_v1  ;;  %vm646_vm12 = vweird.f32 %v4328_v11  ;;  %v687_v2 = vsub.f32 1.0, %v686_v6 }
  0xef   : > { %2809 = vrcp.f32 %v4138_v39  ;;  %v618_v20 = vsel %vm4435_vm3, %v4270_v57, %v614_v18  ;;  %vm661_vm14 = vweird.f32 %v4348_v54  ;;  %v694_v24 = vand.u32 2147483647, %v4129_v22  ;;  %vm4478_vm2 = vmor %vm645_vm10, %vm646_vm12 }
  0xf0   : > { %v701_v9 = vmul.f32 %v4431_v21, %v4134_v27  ;;  %v4471_v19 = vpop.eup %2807  ;;  %v644_v61 = vadd.f32 %v4328_v11, %v643_v26  ;;  %v667_v57 = vor.u32 1.1754944e-38, %v666_v29  ;;  %vm675_vm15 = vweird.f32 %v4127_v8  ;;  %vm4500_vm8 = vmor %vm660_vm1, %vm661_vm14 }
  0xf1   : > { %2811 = vrcp.f32 %v4140_v43  ;;  %v659_v55 = vadd.f32 %v4348_v54, %v658_v5  ;;  %v673_v34 = vmul.f32 %v4390_v0, %v672_v33  ;;  %vm4484_vm5 = vcmp.eq.f32.partialorder %v679_v60, 8.507059e+37 }
  0xf2   : > { %v682_v6 = vor.u32 1.1754944e-38, %v681_v3  ;;  %vm690_vm7 = vweird.f32 %v4129_v22  ;;  %v4491_v18 = vsel %vm4402_vm6, %v622_v35, %v618_v20  ;;  %v633_v17 = vsel %vm4463_vm13, %v4303_v31, %v629_v36 }
  0xf3   : > { %8068 = vst [vmem:[#allocation172_spill] sm:$0xff] %v4491_v18  ;;  %v688_v26 = vmul.f32 %v4395_v13, %v687_v2  ;;  %v696_v29 = vand.u32 2147483648, %v4129_v22  ;;  %vm676_vm10 = vweird.f32 %v4390_v0  ;;  %vm4507_vm6 = vcmp.eq.f32.partialorder %v694_v24, 8.507059e+37 }
  0xf4   : > { %v702_v35 = vsub.f32 1.0, %v701_v9  ;;  %v716_v31 = vmul.f32 %v4471_v19, %v4136_v38  ;;  %v648_v14 = vsel %vm4478_vm2, %v4328_v11, %v644_v61  ;;  %vm691_vm1 = vweird.f32 %v4395_v13  ;;  %vm4534_vm3 = vmor %vm675_vm15, %vm676_vm10 }
  0xf5   : > { %v4513_v5 = vpop.eup %2809  ;;  %v709_v33 = vand.u32 2147483647, %v4134_v27  ;;  %2813 = vrcp.f32 %v4144_v25  ;;  %v4523_v60 = vsel %vm4417_vm9, %v637_v56, %v633_v17  ;;  %v663_v3 = vsel %vm4500_vm8, %v4348_v54, %v659_v55  ;;  %vm4547_vm11 = vmor %vm690_vm7, %vm691_vm1 }
  0xf6   : > { %8073 = vst [vmem:[#allocation173_spill] sm:$0xff] %v4523_v60  ;;  %v674_v36 = vadd.f32 %v4390_v0, %v673_v34  ;;  %v711_v2 = vand.u32 2147483648, %v4134_v27  ;;  %v689_v50 = vadd.f32 %v4395_v13, %v688_v26  ;;  %v697_v56 = vor.u32 1.1754944e-38, %v696_v29 }
  0xf7   : > { %v4530_v20 = vpop.eup %2811  ;;  %vm705_vm9 = vweird.f32 %v4134_v27  ;;  %2815 = vrcp.f32 %v4146_v30  ;;  %v4543_v54 = vsel %vm4441_vm4, %v652_v52, %v648_v14  ;;  %v703_v8 = vmul.f32 %v4431_v21, %v702_v35 }
  0xf8   : > { %8076 = vst [vmem:[#allocation174_spill] sm:$0xff] %v4543_v54  ;;  %v717_v24 = vsub.f32 1.0, %v716_v31  ;;  %v731_v9 = vmul.f32 %v4513_v5, %v4138_v39  ;;  %v4556_v61 = vsel %vm4447_vm0, %v667_v57, %v663_v3  ;;  %vm4558_vm12 = vcmp.eq.f32.partialorder %v709_v33, 8.507059e+37 }
  0xf9   : > { %8079 = vst [vmem:[#allocation175_spill] sm:$0xff] %v4556_v61  ;;  %v724_v22 = vand.u32 2147483647, %v4136_v38  ;;  %2817 = vrcp.f32 %v4148_v44  ;;  %v678_v52 = vsel %vm4534_vm3, %v4390_v0, %v674_v36  ;;  %vm706_vm4 = vweird.f32 %v4431_v21 }
  0xfa   : > { %v712_v23 = vor.u32 1.1754944e-38, %v711_v2  ;;  %v746_v37 = vmul.f32 %v4530_v20, %v4140_v43  ;;  %v693_v55 = vsel %vm4547_vm11, %v4395_v13, %v689_v50  ;;  %v726_v34 = vand.u32 2147483648, %v4136_v38  ;;  %vm4589_vm0 = vmor %vm705_vm9, %vm706_vm4 }
  0xfb   : > { %v4570_v57 = vpop.eup %2813  ;;  %v739_v17 = vand.u32 2147483647, %v4138_v39  ;;  %v741_v4 = vand.u32 2147483648, %v4138_v39  ;;  %v704_v0 = vadd.f32 %v4431_v21, %v703_v8  ;;  %v718_v26 = vmul.f32 %v4471_v19, %v717_v24 }
  0xfc   : > { %v732_v29 = vsub.f32 1.0, %v731_v9  ;;  %2819 = vrcp.f32 %v4153_v63  ;;  %v4585_v31 = vsel %vm4484_vm5, %v682_v6, %v678_v52  ;;  %vm720_vm13 = vweird.f32 %v4136_v38 }
  0xfd   : > { %v4581_v35 = vpop.eup %2815  ;;  %8082 = vst [vmem:[#allocation176_spill] sm:$0xff] %v4585_v31  ;;  %vm4594_vm14 = vcmp.eq.f32.partialorder %v724_v22, 8.507059e+37  ;;  %vm735_vm15 = vweird.f32 %v4138_v39  ;;  %vm721_vm2 = vweird.f32 %v4471_v19  ;;  %v747_v33 = vsub.f32 1.0, %v746_v37 }
  0xfe   : > { %v754_v1 = vand.u32 2147483647, %v4140_v43  ;;  %v761_v27 = vmul.f32 %v4570_v57, %v4144_v25  ;;  %v4607_v3 = vsel %vm4507_vm6, %v697_v56, %v693_v55  ;;  %v727_v36 = vor.u32 1.1754944e-38, %v726_v34  ;;  %vm4623_vm8 = vmor %vm720_vm13, %vm721_vm2 }
  0xff   : > { %v4603_v6 = vpop.eup %2817  ;;  %8087 = vst [vmem:[#allocation177_spill] sm:$0xff] %v4607_v3  ;;  %v742_v2 = vor.u32 1.1754944e-38, %v741_v4  ;;  %vm750_vm5 = vweird.f32 %v4140_v43  ;;  %v708_v11 = vsel %vm4589_vm0, %v4431_v21, %v704_v0  ;;  %v719_v50 = vadd.f32 %v4471_v19, %v718_v26 }
 0x100   : > { %v733_v15 = vmul.f32 %v4513_v5, %v732_v29  ;;  %vm4615_vm7 = vcmp.eq.f32.partialorder %v739_v17, 8.507059e+37  ;;  %v776_v42 = vmul.f32 %v4581_v35, %v4146_v30  ;;  %vm736_vm10 = vweird.f32 %v4513_v5 }
 0x101   : > { %v756_v21 = vand.u32 2147483648, %v4140_v43  ;;  %vm765_vm6 = vweird.f32 %v4144_v25  ;;  %v769_v24 = vand.u32 2147483647, %v4144_v25  ;;  %v748_v22 = vmul.f32 %v4530_v20, %v747_v33  ;;  %vm4656_vm9 = vmor %vm735_vm15, %vm736_vm10 }
 0x102   : > { %v4631_v9 = vpop.eup %2819  ;;  %vm4634_vm1 = vcmp.eq.f32.partialorder %v754_v1, 8.507059e+37  ;;  %v762_v38 = vsub.f32 1.0, %v761_v27  ;;  %v791_v37 = vmul.f32 %v4603_v6, %v4148_v44  ;;  %v4642_v55 = vsel %vm4558_vm12, %v712_v23, %v708_v11 }
 0x103   : > { %8094 = vst [vmem:[#allocation178_spill] sm:$0xff] %v4642_v55  ;;  %vm751_vm3 = vweird.f32 %v4530_v20  ;;  %v771_v34 = vand.u32 2147483648, %v4144_v25  ;;  %2821 = vrcp.f32 %v4155_v58  ;;  %v723_v17 = vsel %vm4623_vm8, %v4471_v19, %v719_v50 }
 0x104   : > { %v734_v4 = vadd.f32 %v4513_v5, %v733_v15  ;;  %v777_v0 = vsub.f32 1.0, %v776_v42  ;;  %v784_v26 = vand.u32 2147483647, %v4146_v30  ;;  %v757_v23 = vor.u32 1.1754944e-38, %v756_v21  ;;  %vm4679_vm4 = vmor %vm750_vm5, %vm751_vm3 }
 0x105   : > { %v786_v29 = vand.u32 2147483648, %v4146_v30  ;;  %v806_v13 = vmul.f32 %v4631_v9, %v4153_v63  ;;  %2823 = vrcp.f32 %v4157_v46  ;;  %v749_v19 = vadd.f32 %v4530_v20, %v748_v22 }
 0x106   : > { %v763_v33 = vmul.f32 %v4570_v57, %v762_v38  ;;  %vm4666_vm11 = vcmp.eq.f32.partialorder %v769_v24, 8.507059e+37  ;;  %vm780_vm12 = vweird.f32 %v4146_v30  ;;  %v792_v39 = vsub.f32 1.0, %v791_v37 }
 0x107   : > { %v4673_v27 = vsel %vm4594_vm14, %v727_v36, %v723_v17  ;;  %v772_v50 = vor.u32 1.1754944e-38, %v771_v34  ;;  %vm795_vm0 = vweird.f32 %v4148_v44  ;;  %v799_v15 = vand.u32 2147483647, %v4148_v44 }
 0x108   : > { %8099 = vst [vmem:[#allocation179_spill] sm:$0xff] %v4673_v27  ;;  %v738_v42 = vsel %vm4656_vm9, %v4513_v5, %v734_v4  ;;  %vm766_vm13 = vweird.f32 %v4570_v57  ;;  %v778_v14 = vmul.f32 %v4581_v35, %v777_v0  ;;  %vm4690_vm14 = vcmp.eq.f32.partialorder %v784_v26, 8.507059e+37 }
 0x109   : > { %2825 = vrcp.f32 %v4159_v59  ;;  %v4695_v43 = vpop.eup %2821  ;;  %v787_v56 = vor.u32 1.1754944e-38, %v786_v29  ;;  %v801_v21 = vand.u32 2147483648, %v4148_v44  ;;  %v807_v24 = vsub.f32 1.0, %v806_v13  ;;  %vm4715_vm2 = vmor %vm765_vm6, %vm766_vm13 }
 0x10a   : > { %2827 = vrcp.f32 %v4161_v16  ;;  %v753_v5 = vsel %vm4679_vm4, %v4530_v20, %v749_v19  ;;  %v764_v22 = vadd.f32 %v4570_v57, %v763_v33  ;;  %vm781_vm15 = vweird.f32 %v4581_v35 }
 0x10b   : > { %v793_v38 = vmul.f32 %v4603_v6, %v792_v39  ;;  %v4705_v37 = vpop.eup %2823  ;;  %v4709_v34 = vsel %vm4615_vm7, %v742_v2, %v738_v42  ;;  %vm4719_vm5 = vcmp.eq.f32.partialorder %v799_v15, 8.507059e+37  ;;  %vm810_vm8 = vweird.f32 %v4153_v63  ;;  %vm4736_vm10 = vmor %vm780_vm12, %vm781_vm15 }
 0x10c   : > { %8104 = vst [vmem:[#allocation180_spill] sm:$0xff] %v4709_v34  ;;  %v814_v4 = vand.u32 2147483647, %v4153_v63  ;;  %v779_v8 = vadd.f32 %v4581_v35, %v778_v14  ;;  %vm796_vm7 = vweird.f32 %v4603_v6  ;;  %v816_v2 = vand.u32 2147483648, %v4153_v63 }
 0x10d   : > { %v821_v25 = vmul.f32 %v4695_v43, %v4155_v58  ;;  %v4732_v0 = vsel %vm4634_vm1, %v757_v23, %v753_v5  ;;  %v802_v51 = vor.u32 1.1754944e-38, %v801_v21  ;;  %v808_v29 = vmul.f32 %v4631_v9, %v807_v24  ;;  %vm4755_vm6 = vmor %vm795_vm0, %vm796_vm7 }
 0x10e   : > { %8109 = vst [vmem:[#allocation181_spill] sm:$0xff] %v4732_v0  ;;  %2829 = vrcp.f32 %v4163_v62  ;;  %v768_v19 = vsel %vm4715_vm2, %v4570_v57, %v764_v22  ;;  %v794_v52 = vadd.f32 %v4603_v6, %v793_v38  ;;  %v836_v30 = vmul.f32 %v4705_v37, %v4157_v46 }
 0x10f   : > { %v4742_v13 = vpop.eup %2825  ;;  %2831 = vrcp.f32 %v4165_v49  ;;  %vm811_vm1 = vweird.f32 %v4631_v9  ;;  %vm4760_vm3 = vcmp.eq.f32.partialorder %v814_v4, 8.507059e+37  ;;  %vm825_vm9 = vweird.f32 %v4155_v58 }
 0x110   : > { %v4751_v23 = vpop.eup %2827  ;;  %v831_v57 = vand.u32 2147483648, %v4155_v58  ;;  %v783_v11 = vsel %vm4736_vm10, %v4581_v35, %v779_v8  ;;  %v817_v15 = vor.u32 1.1754944e-38, %v816_v2  ;;  %v822_v44 = vsub.f32 1.0, %v821_v25  ;;  %vm4783_vm12 = vmor %vm810_vm8, %vm811_vm1 }
 0x111   : > { %v829_v42 = vand.u32 2147483647, %v4155_v58  ;;  %v4772_v14 = vsel %vm4666_vm11, %v772_v50, %v768_v19  ;;  %v809_v21 = vadd.f32 %v4631_v9, %v808_v29  ;;  %v844_v24 = vand.u32 2147483647, %v4157_v46 }
 0x112   : > { %8116 = vst [vmem:[#allocation182_spill] sm:$0xff] %v4772_v14  ;;  %v851_v5 = vmul.f32 %v4742_v13, %v4159_v59  ;;  %v798_v22 = vsel %vm4755_vm6, %v4603_v6, %v794_v52  ;;  %v837_v1 = vsub.f32 1.0, %v836_v30  ;;  %v866_v50 = vmul.f32 %v4751_v23, %v4161_v16 }
 0x113   : > { %2833 = vrcp.f32 %v4171_v7  ;;  %v4794_v17 = vsel %vm4690_vm14, %v787_v56, %v783_v11  ;;  %v832_v4 = vor.u32 1.1754944e-38, %v831_v57  ;;  %vm840_vm11 = vweird.f32 %v4157_v46 }
 0x114   : > { %v4790_v38 = vpop.eup %2829  ;;  %8119 = vst [vmem:[#allocation183_spill] sm:$0xff] %v4794_v17  ;;  %v846_v63 = vand.u32 2147483648, %v4157_v46  ;;  %v823_v8 = vmul.f32 %v4695_v43, %v822_v44  ;;  %vm4801_vm4 = vcmp.eq.f32.partialorder %v829_v42, 8.507059e+37  ;;  %vm855_vm0 = vweird.f32 %v4159_v59 }
 0x115   : > { %v4798_v6 = vpop.eup %2831  ;;  %v859_v25 = vand.u32 2147483647, %v4159_v59  ;;  %v861_v36 = vand.u32 2147483648, %v4159_v59  ;;  %v4810_v56 = vsel %vm4719_vm5, %v802_v51, %v798_v22  ;;  %v813_v26 = vsel %vm4783_vm12, %v4631_v9, %v809_v21 }
 0x116   : > { %8122 = vst [vmem:[#allocation184_spill] sm:$0xff] %v4810_v56  ;;  %vm826_vm13 = vweird.f32 %v4695_v43  ;;  %v852_v29 = vsub.f32 1.0, %v851_v5  ;;  %v838_v19 = vmul.f32 %v4705_v37, %v837_v1  ;;  %vm4817_vm14 = vcmp.eq.f32.partialorder %v844_v24, 8.507059e+37 }
 0x117   : > { %v867_v30 = vsub.f32 1.0, %v866_v50  ;;  %v881_v33 = vmul.f32 %v4790_v38, %v4163_v62  ;;  %2835 = vrcp.f32 %v4173_v28  ;;  %v847_v20 = vor.u32 1.1754944e-38, %v846_v63  ;;  %vm4840_vm5 = vmor %vm825_vm9, %vm826_vm13 }
 0x118   : > { %vm870_vm15 = vweird.f32 %v4161_v16  ;;  %v874_v9 = vand.u32 2147483647, %v4161_v16  ;;  %v896_v51 = vmul.f32 %v4798_v6, %v4165_v49  ;;  %v4832_v11 = vsel %vm4760_vm3, %v817_v15, %v813_v26  ;;  %v8132_v26 = vld [vmem:[#allocation168_spill] sm:$0xff] }
 0x119   : > { %v4828_v57 = vpop.eup %2833  ;;  %8125 = vst [vmem:[#allocation185_spill] sm:$0xff] %v4832_v11  ;;  %v824_v44 = vadd.f32 %v4695_v43, %v823_v8  ;;  %vm841_vm2 = vweird.f32 %v4705_v37  ;;  %v862_v42 = vor.u32 1.1754944e-38, %v861_v36  ;;  %v853_v24 = vmul.f32 %v4742_v13, %v852_v29 }
 0x11a   : > { %vm856_vm8 = vweird.f32 %v4742_v13  ;;  %v876_v39 = vand.u32 2147483648, %v4161_v16  ;;  %v889_v15 = vand.u32 2147483647, %v4163_v62  ;;  %v839_v5 = vadd.f32 %v4705_v37, %v838_v19  ;;  %vm4857_vm10 = vmor %vm840_vm11, %vm841_vm2 }
 0x11b   : > { %vm4849_vm7 = vcmp.eq.f32.partialorder %v859_v25, 8.507059e+37  ;;  %v868_v58 = vmul.f32 %v4751_v23, %v867_v30  ;;  %v882_v35 = vsub.f32 1.0, %v881_v33  ;;  %2837 = vrcp.f32 %v4175_v41  ;;  %vm4886_vm9 = vmor %vm855_vm0, %vm856_vm8 }
 0x11c   : > { %v891_v50 = vand.u32 2147483648, %v4163_v62  ;;  %v897_v63 = vsub.f32 1.0, %v896_v51  ;;  %v911_v8 = vmul.f32 %v4828_v57, %v4171_v7  ;;  %2839 = vrcp.f32 %v4181_v10 }
 0x11d   : > { %v4865_v25 = vpop.eup %2835  ;;  %v828_v36 = vsel %vm4840_vm5, %v4695_v43, %v824_v44  ;;  %vm871_vm6 = vweird.f32 %v4751_v23  ;;  %v904_v46 = vand.u32 2147483647, %v4165_v49  ;;  %2841 = vrcp.f32 %v8132_v26 }
 0x11e   : > { %v854_v29 = vadd.f32 %v4742_v13, %v853_v24  ;;  %vm4874_vm1 = vcmp.eq.f32.partialorder %v874_v9, 8.507059e+37  ;;  %v877_v30 = vor.u32 1.1754944e-38, %v876_v39  ;;  %vm885_vm3 = vweird.f32 %v4163_v62  ;;  %vm4899_vm11 = vmor %vm870_vm15, %vm871_vm6 }
 0x11f   : > { %v843_v33 = vsel %vm4857_vm10, %v4705_v37, %v839_v5  ;;  %v869_v9 = vadd.f32 %v4751_v23, %v868_v58  ;;  %v883_v51 = vmul.f32 %v4790_v38, %v882_v35  ;;  %vm900_vm12 = vweird.f32 %v4165_v49 }
 0x120   : > { %v4895_v44 = vsel %vm4801_vm4, %v832_v4, %v828_v36  ;;  %vm4903_vm0 = vcmp.eq.f32.partialorder %v889_v15, 8.507059e+37  ;;  %v898_v21 = vmul.f32 %v4798_v6, %v897_v63  ;;  %v912_v24 = vsub.f32 1.0, %v911_v8 }
 0x121   : > { %8137 = vst [vmem:[#allocation168_spill] sm:$0xff] %v4895_v44  ;;  %v926_v39 = vmul.f32 %v4865_v25, %v4173_v28  ;;  %v4910_v5 = vpop.eup %2837  ;;  %vm886_vm4 = vweird.f32 %v4790_v38  ;;  %v892_v4 = vor.u32 1.1754944e-38, %v891_v50  ;;  %vm4913_vm13 = vcmp.eq.f32.partialorder %v904_v46, 8.507059e+37 }
 0x122   : > { %v906_v2 = vand.u32 2147483648, %v4165_v49  ;;  %v4918_v15 = vpop.eup %2839  ;;  %v4922_v58 = vsel %vm4817_vm14, %v847_v20, %v843_v33  ;;  %v858_v35 = vsel %vm4886_vm9, %v4742_v13, %v854_v29  ;;  %vm901_vm15 = vweird.f32 %v4798_v6  ;;  %vm4939_vm14 = vmor %vm885_vm3, %vm886_vm4 }
 0x123   : > { %8144 = vst [vmem:[#allocation186_spill] sm:$0xff] %v4922_v58  ;;  %v919_v1 = vand.u32 2147483647, %v4171_v7  ;;  %v4929_v50 = vpop.eup %2841  ;;  %v873_v63 = vsel %vm4899_vm11, %v4751_v23, %v869_v9  ;;  %v884_v8 = vadd.f32 %v4790_v38, %v883_v51  ;;  %v921_v52 = vand.u32 2147483648, %v4171_v7  ;;  %vm4949_vm2 = vmor %vm900_vm12, %vm901_vm15 }
 0x124   : > { %v934_v20 = vand.u32 2147483647, %v4173_v28  ;;  %v899_v36 = vadd.f32 %v4798_v6, %v898_v21  ;;  %v913_v46 = vmul.f32 %v4828_v57, %v912_v24  ;;  %v927_v29 = vsub.f32 1.0, %v926_v39 }
 0x125   : > { %v941_v23 = vmul.f32 %v4910_v5, %v4175_v41  ;;  %v907_v43 = vor.u32 1.1754944e-38, %v906_v2  ;;  %vm915_vm5 = vweird.f32 %v4171_v7  ;;  %v936_v62 = vand.u32 2147483648, %v4173_v28 }
 0x126   : > { %v956_v9 = vmul.f32 %v4918_v15, %v4181_v10  ;;  %v4959_v51 = vsel %vm4849_vm7, %v862_v42, %v858_v35  ;;  %vm916_vm8 = vweird.f32 %v4828_v57  ;;  %vm4962_vm10 = vcmp.eq.f32.partialorder %v919_v1, 8.507059e+37 }
 0x127   : > { %8149 = vst [vmem:[#allocation187_spill] sm:$0xff] %v4959_v51  ;;  %v971_v37 = vmul.f32 %v4929_v50, %v8132_v26  ;;  %v4970_v21 = vsel %vm4874_vm1, %v877_v30, %v873_v63  ;;  %v888_v24 = vsel %vm4939_vm14, %v4790_v38, %v884_v8  ;;  %v922_v22 = vor.u32 1.1754944e-38, %v921_v52  ;;  %vm4987_vm1 = vmor %vm915_vm5, %vm916_vm8 }
 0x128   : > { %8152 = vst [vmem:[#allocation188_spill] sm:$0xff] %v4970_v21  ;;  %vm930_vm7 = vweird.f32 %v4173_v28  ;;  %v903_v42 = vsel %vm4949_vm2, %v4798_v6, %v899_v36  ;;  %v914_v39 = vadd.f32 %v4828_v57, %v913_v46  ;;  %v928_v2 = vmul.f32 %v4865_v25, %v927_v29 }
 0x129   : > { %vm4981_vm6 = vcmp.eq.f32.partialorder %v934_v20, 8.507059e+37  ;;  %v942_v19 = vsub.f32 1.0, %v941_v23  ;;  %v937_v30 = vor.u32 1.1754944e-38, %v936_v62  ;;  %v949_v1 = vand.u32 2147483647, %v4175_v41 }
 0x12a   : > { %v951_v6 = vand.u32 2147483648, %v4175_v41  ;;  %v957_v63 = vsub.f32 1.0, %v956_v9  ;;  %vm931_vm3 = vweird.f32 %v4865_v25  ;;  %vm945_vm9 = vweird.f32 %v4175_v41 }
 0x12b   : > { %v964_v8 = vand.u32 2147483647, %v4181_v10  ;;  %v972_v52 = vsub.f32 1.0, %v971_v37  ;;  %v4998_v7 = vsel %vm4903_vm0, %v892_v4, %v888_v24  ;;  %v5002_v20 = vsel %vm4913_vm13, %v907_v43, %v903_v42  ;;  %vm5014_vm11 = vmor %vm930_vm7, %vm931_vm3 }
 0x12c   : > { %8157 = vst [vmem:[#allocation189_spill] sm:$0xff] %v4998_v7  ;;  %vm960_vm12 = vweird.f32 %v4181_v10  ;;  %v966_v13 = vand.u32 2147483648, %v4181_v10  ;;  %v918_v36 = vsel %vm4987_vm1, %v4828_v57, %v914_v39  ;;  %v929_v46 = vadd.f32 %v4865_v25, %v928_v2 }
 0x12d   : > { %8158 = vst [vmem:[#allocation190_spill] sm:$0xff] %v5002_v20  ;;  %v943_v29 = vmul.f32 %v4910_v5, %v942_v19  ;;  %v979_v59 = vand.u32 2147483647, %v8132_v26  ;;  %vm5018_vm0 = vcmp.eq.f32.partialorder %v949_v1, 8.507059e+37  ;;  %v952_v23 = vor.u32 1.1754944e-38, %v951_v6 }
 0x12e   : > { %v958_v33 = vmul.f32 %v4918_v15, %v957_v63  ;;  %v981_v57 = vand.u32 2147483648, %v8132_v26  ;;  %vm946_vm4 = vweird.f32 %v4910_v5  ;;  %vm5025_vm13 = vcmp.eq.f32.partialorder %v964_v8, 8.507059e+37 }
 0x12f   : > { %v973_v28 = vmul.f32 %v4929_v50, %v972_v52  ;;  %vm975_vm15 = vweird.f32 %v8132_v26  ;;  %v5033_v62 = vsel %vm4962_vm10, %v922_v22, %v918_v36  ;;  %vm961_vm14 = vweird.f32 %v4918_v15  ;;  %vm5048_vm8 = vmor %vm945_vm9, %vm946_vm4 }
 0x130   : > { %8165 = vst [vmem:[#allocation191_spill] sm:$0xff] %v5033_v62  ;;  %v967_v9 = vor.u32 1.1754944e-38, %v966_v13  ;;  %v985_v37 = vmul.f32 1.0614054, %v4323_v53  ;;  %v933_v24 = vsel %vm5014_vm11, %v4865_v25, %v929_v46  ;;  %v944_v42 = vadd.f32 %v4910_v5, %v943_v29  ;;  %vm5057_vm10 = vmor %vm960_vm12, %vm961_vm14 }
 0x131   : > { %vm976_vm2 = vweird.f32 %v4929_v50  ;;  %vm5042_vm5 = vcmp.eq.f32.partialorder %v979_v59, 8.507059e+37  ;;  %v959_v22 = vadd.f32 %v4918_v15, %v958_v33  ;;  %v982_v2 = vor.u32 1.1754944e-38, %v981_v57 }
 0x132   : > { %v986_v19 = vmul.f32 1.0614054, %v4333_v45  ;;  %v987_v25 = vmul.f32 1.0614054, %v4353_v48  ;;  %v974_v1 = vadd.f32 %v4929_v50, %v973_v28  ;;  %v988_v41 = vmul.f32 1.0614054, %v4369_v47  ;;  %vm5071_vm7 = vmor %vm975_vm15, %vm976_vm2 }
 0x133   : > { %v989_v6 = vmul.f32 1.0614054, %v4379_v32  ;;  %v990_v63 = vmul.f32 1.0614054, %v4399_v40  ;;  %v5067_v8 = vsel %vm4981_vm6, %v937_v30, %v933_v24  ;;  %v991_v52 = vmul.f32 1.0614054, %v4427_v12 }
 0x134   : > { %8172 = vst [vmem:[#allocation192_spill] sm:$0xff] %v5067_v8  ;;  %v992_v13 = vmul.f32 1.0614054, %v4491_v18  ;;  %v993_v36 = vmul.f32 1.0614054, %v4523_v60  ;;  %v948_v46 = vsel %vm5048_vm8, %v4910_v5, %v944_v42  ;;  %v963_v29 = vsel %vm5057_vm10, %v4918_v15, %v959_v22 }
 0x135   : > { %v994_v35 = vmul.f32 1.0614054, %v4543_v54  ;;  %v995_v30 = vmul.f32 1.0614054, %v4556_v61  ;;  %v996_v26 = vmul.f32 1.0614054, %v4585_v31  ;;  %v978_v5 = vsel %vm5071_vm7, %v4929_v50, %v974_v1 }
 0x136   : > { %v997_v59 = vmul.f32 1.0614054, %v4607_v3  ;;  %v998_v4 = vmul.f32 1.0614054, %v4642_v55  ;;  %v999_v33 = vmul.f32 1.0614054, %v4673_v27  ;;  %v5098_v15 = vsel %vm5018_vm0, %v952_v23, %v948_v46 }
 0x137   : > { %v1000_v57 = vmul.f32 1.0614054, %v4709_v34  ;;  %v1001_v28 = vmul.f32 1.0614054, %v4732_v0  ;;  %v1002_v24 = vmul.f32 1.0614054, %v4772_v14  ;;  %v5105_v50 = vsel %vm5025_vm13, %v967_v9, %v963_v29 }
 0x138   : > { %8175 = vst [vmem:[#allocation193_spill] sm:$0xff] %v5098_v15  ;;  %v1003_v42 = vmul.f32 1.0614054, %v4794_v17  ;;  %v1004_v49 = vmul.f32 1.0614054, %v4810_v56  ;;  %v5112_v23 = vsel %vm5042_vm5, %v982_v2, %v978_v5  ;;  %v3041_v56 = vld [vmem:[%s3336_s30 + $0xe8] sm:$0xff] }
 0x139   : > { %v1005_v22 = vmul.f32 1.0614054, %v4832_v11  ;;  %8176 = vst [vmem:[#allocation194_spill] sm:$0xff] %v5105_v50  ;;  %v1006_v38 = vmul.f32 1.0614054, %v4895_v44  ;;  %2843 = vtanh.f32 %v3041_v56  ;;  %v3043_v5 = vld [vmem:[%s3336_s30 + $0xf8] sm:$0xff] }
 0x13a   : > { %v1007_v1 = vmul.f32 1.0614054, %v4922_v58  ;;  %v1008_v16 = vmul.f32 1.0614054, %v4959_v51  ;;  %8177 = vst [vmem:[#allocation195_spill] sm:$0xff] %v5112_v23  ;;  %v3042_v58 = vld [vmem:[%s3336_s30 + $0xf0] sm:$0xff] }
 0x13b   : > { %v1009_v10 = vmul.f32 1.0614054, %v4970_v21  ;;  %v1010_v46 = vmul.f32 1.0614054, %v4998_v7  ;;  %v1017_v11 = vadd.f32 -1.4531521, %v985_v37  ;;  %2845 = vtanh.f32 %v3042_v58 }
 0x13c   : > { %v1011_v43 = vmul.f32 1.0614054, %v5002_v20  ;;  %v1012_v9 = vmul.f32 1.0614054, %v5033_v62  ;;  %v1018_v29 = vadd.f32 -1.4531521, %v986_v19  ;;  %2847 = vtanh.f32 %v3043_v5 }
 0x13d   : > { %v1013_v51 = vmul.f32 1.0614054, %v5067_v8  ;;  %v1014_v39 = vmul.f32 1.0614054, %v5098_v15  ;;  %v1019_v2 = vadd.f32 -1.4531521, %v987_v25  ;;  %v1049_v62 = vmul.f32 %v1017_v11, %v4323_v53 }
 0x13e   : > { %v1015_v21 = vmul.f32 1.0614054, %v5105_v50  ;;  %v1016_v37 = vmul.f32 1.0614054, %v5112_v23  ;;  %v1020_v7 = vadd.f32 -1.4531521, %v988_v41  ;;  %v1050_v8 = vmul.f32 %v1018_v29, %v4333_v45 }
 0x13f   : > { %v1021_v56 = vadd.f32 -1.4531521, %v989_v6  ;;  %v1022_v44 = vadd.f32 -1.4531521, %v990_v63  ;;  %v1023_v20 = vadd.f32 -1.4531521, %v991_v52  ;;  %v1051_v5 = vmul.f32 %v1019_v2, %v4353_v48  ;;  %v5128_v0 = vpop.eup %2843 }
 0x140   : > { %v1024_v19 = vadd.f32 -1.4531521, %v992_v13  ;;  %v1025_v17 = vadd.f32 -1.4531521, %v993_v36  ;;  %v1026_v58 = vadd.f32 -1.4531521, %v994_v35  ;;  %v1052_v6 = vmul.f32 %v1020_v7, %v4369_v47 }
 0x141   : > { %v1027_v14 = vadd.f32 -1.4531521, %v995_v30  ;;  %v1028_v15 = vadd.f32 -1.4531521, %v996_v26  ;;  %v1029_v25 = vadd.f32 -1.4531521, %v997_v59  ;;  %v5131_v63 = vpop.eup %2845  ;;  %v1053_v36 = vmul.f32 %v1021_v56, %v4379_v32 }
 0x142   : > { %8178 = vst [vmem:[#allocation196_spill] sm:$0xff] %v5128_v0  ;;  %v1030_v50 = vadd.f32 -1.4531521, %v998_v4  ;;  %v1031_v23 = vadd.f32 -1.4531521, %v999_v33  ;;  %v5134_v35 = vpop.eup %2847  ;;  %v1054_v29 = vmul.f32 %v1022_v44, %v4399_v40 }
 0x143   : > { %v1032_v41 = vadd.f32 -1.4531521, %v1000_v57  ;;  %8179 = vst [vmem:[#allocation197_spill] sm:$0xff] %v5131_v63  ;;  %v1033_v11 = vadd.f32 -1.4531521, %v1001_v28  ;;  %v1055_v57 = vmul.f32 %v1023_v20, %v4427_v12  ;;  %v1056_v28 = vmul.f32 %v1024_v19, %v4491_v18  ;;  %v8185_v19 = vld [vmem:[#allocation185_spill] sm:$0xff] }
 0x144   : > { %v1034_v52 = vadd.f32 -1.4531521, %v1002_v24  ;;  %v1035_v13 = vadd.f32 -1.4531521, %v1003_v42  ;;  %8180 = vst [vmem:[#allocation198_spill] sm:$0xff] %v5134_v35  ;;  %v1057_v35 = vmul.f32 %v1025_v17, %v4523_v60  ;;  %v1059_v44 = vmul.f32 %v1027_v14, %v4556_v61  ;;  %v8183_v17 = vld [vmem:[#allocation183_spill] sm:$0xff] }
 0x145   : > { %v1036_v30 = vadd.f32 -1.4531521, %v1004_v49  ;;  %v1037_v26 = vadd.f32 -1.4531521, %v1005_v22  ;;  %v1038_v59 = vadd.f32 -1.4531521, %v1006_v38  ;;  %v1058_v22 = vmul.f32 %v1026_v58, %v4543_v54 }
 0x146   : > { %v1039_v2 = vadd.f32 -1.4531521, %v1007_v1  ;;  %v1040_v4 = vadd.f32 -1.4531521, %v1008_v16  ;;  %v1041_v33 = vadd.f32 -1.4531521, %v1009_v10  ;;  %v1060_v38 = vmul.f32 %v1028_v15, %v4585_v31 }
 0x147   : > { %v1042_v7 = vadd.f32 -1.4531521, %v1010_v46  ;;  %v1043_v0 = vadd.f32 -1.4531521, %v1011_v43  ;;  %v1044_v63 = vadd.f32 -1.4531521, %v1012_v9  ;;  %v1061_v1 = vmul.f32 %v1029_v25, %v4607_v3 }
 0x148   : > { %v1045_v24 = vadd.f32 -1.4531521, %v1013_v51  ;;  %v1046_v42 = vadd.f32 -1.4531521, %v1014_v39  ;;  %v1047_v56 = vadd.f32 -1.4531521, %v1015_v21  ;;  %v1062_v20 = vmul.f32 %v1030_v50, %v4642_v55 }
 0x149   : > { %v1048_v49 = vadd.f32 -1.4531521, %v1016_v37  ;;  %v1063_v16 = vmul.f32 %v1031_v23, %v4673_v27  ;;  %v1064_v10 = vmul.f32 %v1032_v41, %v4709_v34  ;;  %v8181_v51 = vld [vmem:[#allocation181_spill] sm:$0xff]  ;;  %v8182_v21 = vld [vmem:[#allocation182_spill] sm:$0xff]  ;;  %v1067_v9 = vmul.f32 %v1035_v13, %v8183_v17  ;;  %v8184_v39 = vld [vmem:[#allocation184_spill] sm:$0xff] }
 0x14a   : > { %v1065_v46 = vmul.f32 %v1033_v11, %v8181_v51  ;;  %v1066_v43 = vmul.f32 %v1034_v52, %v8182_v21  ;;  %v1068_v37 = vmul.f32 %v1036_v30, %v8184_v39  ;;  %v1069_v14 = vmul.f32 %v1037_v26, %v8185_v19  ;;  %v8186_v58 = vld [vmem:[#allocation168_spill] sm:$0xff]  ;;  %v8187_v31 = vld [vmem:[#allocation186_spill] sm:$0xff]  ;;  %v8188_v3 = vld [vmem:[#allocation187_spill] sm:$0xff] }
 0x14b   : > { %v1070_v15 = vmul.f32 %v1038_v59, %v8186_v58  ;;  %v1071_v25 = vmul.f32 %v1039_v2, %v8187_v31  ;;  %v1072_v50 = vmul.f32 %v1040_v4, %v8188_v3  ;;  %v8189_v55 = vld [vmem:[#allocation188_spill] sm:$0xff]  ;;  %v8190_v27 = vld [vmem:[#allocation189_spill] sm:$0xff]  ;;  %v8191_v34 = vld [vmem:[#allocation190_spill] sm:$0xff]  ;;  %v1081_v51 = vadd.f32 1.4214138, %v1049_v62 }
 0x14c   : > { %v1073_v23 = vmul.f32 %v1041_v33, %v8189_v55  ;;  %v1074_v41 = vmul.f32 %v1042_v7, %v8190_v27  ;;  %v1075_v11 = vmul.f32 %v1043_v0, %v8191_v34  ;;  %v8192_v52 = vld [vmem:[#allocation191_spill] sm:$0xff]  ;;  %v8193_v13 = vld [vmem:[#allocation192_spill] sm:$0xff]  ;;  %v8194_v30 = vld [vmem:[#allocation193_spill] sm:$0xff]  ;;  %v1082_v26 = vadd.f32 1.4214138, %v1050_v8 }
 0x14d   : > { %v1076_v21 = vmul.f32 %v1044_v63, %v8192_v52  ;;  %v1077_v17 = vmul.f32 %v1045_v24, %v8193_v13  ;;  %v1078_v39 = vmul.f32 %v1046_v42, %v8194_v30  ;;  %v8195_v19 = vld [vmem:[#allocation194_spill] sm:$0xff]  ;;  %v1083_v58 = vadd.f32 1.4214138, %v1051_v5  ;;  %v8196_v4 = vld [vmem:[#allocation195_spill] sm:$0xff] }
 0x14e   : > { %v1079_v59 = vmul.f32 %v1047_v56, %v8195_v19  ;;  %v1084_v2 = vadd.f32 1.4214138, %v1052_v6  ;;  %v1085_v31 = vadd.f32 1.4214138, %v1053_v36  ;;  %v1080_v3 = vmul.f32 %v1048_v49, %v8196_v4 }
 0x14f   : > { %v1086_v33 = vadd.f32 1.4214138, %v1054_v29  ;;  %v1087_v55 = vadd.f32 1.4214138, %v1055_v57  ;;  %v1088_v7 = vadd.f32 1.4214138, %v1056_v28  ;;  %v1113_v63 = vmul.f32 %v1081_v51, %v4323_v53 }
 0x150   : > { %v1089_v27 = vadd.f32 1.4214138, %v1057_v35  ;;  %v1090_v0 = vadd.f32 1.4214138, %v1058_v22  ;;  %v1091_v62 = vadd.f32 1.4214138, %v1059_v44  ;;  %v1114_v8 = vmul.f32 %v1082_v26, %v4333_v45 }
 0x151   : > { %v1092_v52 = vadd.f32 1.4214138, %v1060_v38  ;;  %v1093_v24 = vadd.f32 1.4214138, %v1061_v1  ;;  %v1094_v13 = vadd.f32 1.4214138, %v1062_v20  ;;  %v1115_v6 = vmul.f32 %v1083_v58, %v4353_v48 }
 0x152   : > { %v1095_v42 = vadd.f32 1.4214138, %v1063_v16  ;;  %v1096_v56 = vadd.f32 1.4214138, %v1064_v10  ;;  %v1097_v5 = vadd.f32 1.4214138, %v1065_v46  ;;  %v1116_v57 = vmul.f32 %v1084_v2, %v4369_v47 }
 0x153   : > { %v1098_v36 = vadd.f32 1.4214138, %v1066_v43  ;;  %v1099_v49 = vadd.f32 1.4214138, %v1067_v9  ;;  %v1100_v29 = vadd.f32 1.4214138, %v1068_v37  ;;  %v1117_v44 = vmul.f32 %v1085_v31, %v4379_v32 }
 0x154   : > { %v1101_v35 = vadd.f32 1.4214138, %v1069_v14  ;;  %v1102_v28 = vadd.f32 1.4214138, %v1070_v15  ;;  %v1103_v22 = vadd.f32 1.4214138, %v1071_v25  ;;  %v1118_v51 = vmul.f32 %v1086_v33, %v4399_v40 }
 0x155   : > { %v1104_v38 = vadd.f32 1.4214138, %v1072_v50  ;;  %v1105_v1 = vadd.f32 1.4214138, %v1073_v23  ;;  %v1106_v20 = vadd.f32 1.4214138, %v1074_v41  ;;  %v1119_v58 = vmul.f32 %v1087_v55, %v4427_v12 }
 0x156   : > { %v1107_v16 = vadd.f32 1.4214138, %v1075_v11  ;;  %v1108_v10 = vadd.f32 1.4214138, %v1076_v21  ;;  %v1109_v46 = vadd.f32 1.4214138, %v1077_v17  ;;  %v1120_v26 = vmul.f32 %v1088_v7, %v4491_v18 }
 0x157   : > { %v1110_v43 = vadd.f32 1.4214138, %v1078_v39  ;;  %v1111_v9 = vadd.f32 1.4214138, %v1079_v59  ;;  %v1112_v37 = vadd.f32 1.4214138, %v1080_v3  ;;  %v1121_v14 = vmul.f32 %v1089_v27, %v4523_v60 }
 0x158   : > { %v1122_v15 = vmul.f32 %v1090_v0, %v4543_v54  ;;  %v1123_v31 = vmul.f32 %v1091_v62, %v4556_v61  ;;  %v8197_v25 = vld [vmem:[#allocation176_spill] sm:$0xff]  ;;  %v8198_v23 = vld [vmem:[#allocation177_spill] sm:$0xff]  ;;  %v8199_v11 = vld [vmem:[#allocation178_spill] sm:$0xff] }
 0x159   : > { %v1124_v50 = vmul.f32 %v1092_v52, %v8197_v25  ;;  %v1125_v41 = vmul.f32 %v1093_v24, %v8198_v23  ;;  %v1126_v21 = vmul.f32 %v1094_v13, %v8199_v11  ;;  %v8200_v17 = vld [vmem:[#allocation179_spill] sm:$0xff]  ;;  %v8201_v55 = vld [vmem:[#allocation180_spill] sm:$0xff]  ;;  %v8202_v59 = vld [vmem:[#allocation181_spill] sm:$0xff] }
 0x15a   : > { %v1127_v2 = vmul.f32 %v1095_v42, %v8200_v17  ;;  %v1128_v39 = vmul.f32 %v1096_v56, %v8201_v55  ;;  %v1129_v3 = vmul.f32 %v1097_v5, %v8202_v59  ;;  %v8203_v33 = vld [vmem:[#allocation182_spill] sm:$0xff]  ;;  %v8204_v18 = vld [vmem:[#allocation183_spill] sm:$0xff]  ;;  %v8205_v60 = vld [vmem:[#allocation184_spill] sm:$0xff]  ;;  %v1139_v5 = vmul.f32 %v1107_v16, %v8191_v34 }
 0x15b   : > { %v1130_v7 = vmul.f32 %v1098_v36, %v8203_v33  ;;  %v1131_v27 = vmul.f32 %v1099_v49, %v8204_v18  ;;  %v1132_v0 = vmul.f32 %v1100_v29, %v8205_v60  ;;  %v8206_v54 = vld [vmem:[#allocation185_spill] sm:$0xff]  ;;  %v8207_v61 = vld [vmem:[#allocation168_spill] sm:$0xff]  ;;  %v8208_v25 = vld [vmem:[#allocation186_spill] sm:$0xff]  ;;  %v1145_v59 = vadd.f32 -0.28449672, %v1113_v63 }
 0x15c   : > { %v1133_v62 = vmul.f32 %v1101_v35, %v8206_v54  ;;  %v1134_v52 = vmul.f32 %v1102_v28, %v8207_v61  ;;  %v1135_v24 = vmul.f32 %v1103_v22, %v8208_v25  ;;  %v8209_v23 = vld [vmem:[#allocation187_spill] sm:$0xff]  ;;  %v8210_v11 = vld [vmem:[#allocation188_spill] sm:$0xff]  ;;  %v8211_v17 = vld [vmem:[#allocation189_spill] sm:$0xff]  ;;  %v1142_v29 = vmul.f32 %v1110_v43, %v8194_v30 }
 0x15d   : > { %v1136_v13 = vmul.f32 %v1104_v38, %v8209_v23  ;;  %v1137_v42 = vmul.f32 %v1105_v1, %v8210_v11  ;;  %v1138_v56 = vmul.f32 %v1106_v20, %v8211_v17  ;;  %v8212_v36 = vld [vmem:[#allocation191_spill] sm:$0xff]  ;;  %v8213_v49 = vld [vmem:[#allocation192_spill] sm:$0xff]  ;;  %v1146_v35 = vadd.f32 -0.28449672, %v1114_v8 }
 0x15e   : > { %v1140_v33 = vmul.f32 %v1108_v10, %v8212_v36  ;;  %v1141_v18 = vmul.f32 %v1109_v46, %v8213_v49  ;;  %v1143_v28 = vmul.f32 %v1111_v9, %v8195_v19  ;;  %v1147_v61 = vadd.f32 -0.28449672, %v1115_v6 }
 0x15f   : > { %v1148_v22 = vadd.f32 -0.28449672, %v1116_v57  ;;  %v1149_v25 = vadd.f32 -0.28449672, %v1117_v44  ;;  %v1144_v38 = vmul.f32 %v1112_v37, %v8196_v4  ;;  %v1150_v1 = vadd.f32 -0.28449672, %v1118_v51 }
 0x160   : > { %v1151_v11 = vadd.f32 -0.28449672, %v1119_v58  ;;  %v1152_v20 = vadd.f32 -0.28449672, %v1120_v26  ;;  %v1153_v17 = vadd.f32 -0.28449672, %v1121_v14  ;;  %v1177_v10 = vmul.f32 %v1145_v59, %v4323_v53 }
 0x161   : > { %v1154_v16 = vadd.f32 -0.28449672, %v1122_v15  ;;  %v1155_v63 = vadd.f32 -0.28449672, %v1123_v31  ;;  %v1156_v36 = vadd.f32 -0.28449672, %v1124_v50  ;;  %v1178_v8 = vmul.f32 %v1146_v35, %v4333_v45 }
 0x162   : > { %v1157_v46 = vadd.f32 -0.28449672, %v1125_v41  ;;  %v1158_v49 = vadd.f32 -0.28449672, %v1126_v21  ;;  %v1159_v43 = vadd.f32 -0.28449672, %v1127_v2  ;;  %v1179_v57 = vmul.f32 %v1147_v61, %v4353_v48 }
 0x163   : > { %v1160_v9 = vadd.f32 -0.28449672, %v1128_v39  ;;  %v1161_v6 = vadd.f32 -0.28449672, %v1129_v3  ;;  %v1162_v44 = vadd.f32 -0.28449672, %v1130_v7  ;;  %v1180_v58 = vmul.f32 %v1148_v22, %v4369_v47 }
 0x164   : > { %v1163_v37 = vadd.f32 -0.28449672, %v1131_v27  ;;  %v1164_v51 = vadd.f32 -0.28449672, %v1132_v0  ;;  %v1165_v26 = vadd.f32 -0.28449672, %v1133_v62  ;;  %v1181_v31 = vmul.f32 %v1149_v25, %v4379_v32 }
 0x165   : > { %v1166_v14 = vadd.f32 -0.28449672, %v1134_v52  ;;  %v1167_v15 = vadd.f32 -0.28449672, %v1135_v24  ;;  %v1168_v50 = vadd.f32 -0.28449672, %v1136_v13  ;;  %v1182_v59 = vmul.f32 %v1150_v1, %v4399_v40 }
 0x166   : > { %v1169_v41 = vadd.f32 -0.28449672, %v1137_v42  ;;  %v1170_v21 = vadd.f32 -0.28449672, %v1138_v56  ;;  %v1171_v2 = vadd.f32 -0.28449672, %v1139_v5  ;;  %v1183_v61 = vmul.f32 %v1151_v11, %v4427_v12 }
 0x167   : > { %v1172_v39 = vadd.f32 -0.28449672, %v1140_v33  ;;  %v1173_v3 = vadd.f32 -0.28449672, %v1141_v18  ;;  %v1174_v7 = vadd.f32 -0.28449672, %v1142_v29  ;;  %v1192_v11 = vmul.f32 %v1160_v9, %v8201_v55 }
 0x168   : > { %v1175_v27 = vadd.f32 -0.28449672, %v1143_v28  ;;  %v1176_v0 = vadd.f32 -0.28449672, %v1144_v38  ;;  %v8214_v35 = vld [vmem:[#allocation172_spill] sm:$0xff]  ;;  %v8215_v62 = vld [vmem:[#allocation173_spill] sm:$0xff] }
 0x169   : > { %v1184_v22 = vmul.f32 %v1152_v20, %v8214_v35  ;;  %v1185_v52 = vmul.f32 %v1153_v17, %v8215_v62  ;;  %v8216_v24 = vld [vmem:[#allocation174_spill] sm:$0xff]  ;;  %v8217_v25 = vld [vmem:[#allocation175_spill] sm:$0xff]  ;;  %v8218_v42 = vld [vmem:[#allocation176_spill] sm:$0xff] }
 0x16a   : > { %v1186_v47 = vmul.f32 %v1154_v16, %v8216_v24  ;;  %v1187_v13 = vmul.f32 %v1155_v63, %v8217_v25  ;;  %v1188_v56 = vmul.f32 %v1156_v36, %v8218_v42  ;;  %v8219_v32 = vld [vmem:[#allocation177_spill] sm:$0xff]  ;;  %v8220_v5 = vld [vmem:[#allocation178_spill] sm:$0xff]  ;;  %v8221_v18 = vld [vmem:[#allocation179_spill] sm:$0xff]  ;;  %v1196_v16 = vmul.f32 %v1164_v51, %v8205_v60 }
 0x16b   : > { %v1189_v1 = vmul.f32 %v1157_v46, %v8219_v32  ;;  %v1190_v33 = vmul.f32 %v1158_v49, %v8220_v5  ;;  %v1191_v40 = vmul.f32 %v1159_v43, %v8221_v18  ;;  %v8222_v29 = vld [vmem:[#allocation181_spill] sm:$0xff]  ;;  %v8223_v38 = vld [vmem:[#allocation182_spill] sm:$0xff]  ;;  %v8224_v35 = vld [vmem:[#allocation183_spill] sm:$0xff]  ;;  %v1197_v63 = vmul.f32 %v1165_v26, %v8206_v54 }
 0x16c   : > { %v1193_v28 = vmul.f32 %v1161_v6, %v8222_v29  ;;  %v1194_v20 = vmul.f32 %v1162_v44, %v8223_v38  ;;  %v1195_v17 = vmul.f32 %v1163_v37, %v8224_v35  ;;  %v8225_v25 = vld [vmem:[#allocation168_spill] sm:$0xff]  ;;  %v8226_v42 = vld [vmem:[#allocation186_spill] sm:$0xff]  ;;  %v1209_v32 = vadd.f32 0.2548296, %v1177_v10  ;;  %v8228_v9 = vld [vmem:[#allocation189_spill] sm:$0xff] }
 0x16d   : > { %v1198_v36 = vmul.f32 %v1166_v14, %v8225_v25  ;;  %v1199_v46 = vmul.f32 %v1167_v15, %v8226_v42  ;;  %v1200_v49 = vmul.f32 %v1168_v50, %v8209_v23  ;;  %v8227_v43 = vld [vmem:[#allocation188_spill] sm:$0xff]  ;;  %v1202_v55 = vmul.f32 %v1170_v21, %v8228_v9  ;;  %v8229_v38 = vld [vmem:[#allocation191_spill] sm:$0xff] }
 0x16e   : > { %v1201_v18 = vmul.f32 %v1169_v41, %v8227_v43  ;;  %v1210_v6 = vadd.f32 0.2548296, %v1178_v8  ;;  %v1203_v44 = vmul.f32 %v1171_v2, %v8191_v34  ;;  %v1204_v37 = vmul.f32 %v1172_v39, %v8229_v38  ;;  %v8230_v35 = vld [vmem:[#allocation192_spill] sm:$0xff] }
 0x16f   : > { %v1205_v51 = vmul.f32 %v1173_v3, %v8230_v35  ;;  %v1211_v60 = vadd.f32 0.2548296, %v1179_v57  ;;  %v1206_v26 = vmul.f32 %v1174_v7, %v8194_v30  ;;  %v1207_v14 = vmul.f32 %v1175_v27, %v8195_v19 }
 0x170   : > { %v1208_v10 = vmul.f32 %v1176_v0, %v8196_v4  ;;  %v1212_v15 = vadd.f32 0.2548296, %v1180_v58  ;;  %v1213_v50 = vadd.f32 0.2548296, %v1181_v31  ;;  %v1214_v23 = vadd.f32 0.2548296, %v1182_v59 }
 0x171   : > { %v1215_v41 = vadd.f32 0.2548296, %v1183_v61  ;;  %v5228_v21 = vmul.f32 %v1209_v32, %v4323_v53  ;;  %v1216_v8 = vadd.f32 0.2548296, %v1184_v22  ;;  %v1217_v2 = vadd.f32 0.2548296, %v1185_v52 }
 0x172   : > { %v1218_v34 = vadd.f32 0.2548296, %v1186_v47  ;;  %v5231_v39 = vmul.f32 %v1210_v6, %v4333_v45  ;;  %v1219_v57 = vadd.f32 0.2548296, %v1187_v13  ;;  %v1220_v3 = vadd.f32 0.2548296, %v1188_v56 }
 0x173   : > { %8231 = vst [vmem:[#allocation193_spill] sm:$0xff] %v5228_v21  ;;  %v1221_v7 = vadd.f32 0.2548296, %v1189_v1  ;;  %v5234_v27 = vmul.f32 %v1211_v60, %v4353_v48  ;;  %v1222_v0 = vadd.f32 0.2548296, %v1190_v33  ;;  %v8234_v59 = vld [vmem:[#allocation169_spill] sm:$0xff] }
 0x174   : > { %8232 = vst [vmem:[#allocation194_spill] sm:$0xff] %v5231_v39  ;;  %v1223_v58 = vadd.f32 0.2548296, %v1191_v40  ;;  %v1224_v31 = vadd.f32 0.2548296, %v1192_v11  ;;  %v5237_v61 = vmul.f32 %v1212_v15, %v8234_v59  ;;  %v8236_v52 = vld [vmem:[#allocation170_spill] sm:$0xff]  ;;  %v5246_v40 = vmul.f32 %v1215_v41, %v4427_v12 }
 0x175   : > { %8233 = vst [vmem:[#allocation195_spill] sm:$0xff] %v5234_v27  ;;  %v1225_v53 = vadd.f32 0.2548296, %v1193_v28  ;;  %v1226_v32 = vadd.f32 0.2548296, %v1194_v20  ;;  %v5240_v47 = vmul.f32 %v1213_v50, %v8236_v52  ;;  %v8238_v56 = vld [vmem:[#allocation171_spill] sm:$0xff] }
 0x176   : > { %8235 = vst [vmem:[#allocation185_spill] sm:$0xff] %v5237_v61  ;;  %v1227_v22 = vadd.f32 0.2548296, %v1195_v17  ;;  %v1228_v45 = vadd.f32 0.2548296, %v1196_v16  ;;  %v5243_v1 = vmul.f32 %v1214_v23, %v8238_v56  ;;  %v8241_v20 = vld [vmem:[#allocation172_spill] sm:$0xff] }
 0x177   : > { %8237 = vst [vmem:[#allocation173_spill] sm:$0xff] %v5240_v47  ;;  %v1229_v6 = vadd.f32 0.2548296, %v1197_v63  ;;  %v1230_v13 = vadd.f32 0.2548296, %v1198_v36  ;;  %v5249_v17 = vmul.f32 %v1216_v8, %v8241_v20  ;;  %v5252_v63 = vmul.f32 %v1217_v2, %v8215_v62  ;;  %v8247_v12 = vld [vmem:[#allocation176_spill] sm:$0xff] }
 0x178   : > { %8239 = vst [vmem:[#allocation174_spill] sm:$0xff] %v5243_v1  ;;  %v1231_v48 = vadd.f32 0.2548296, %v1199_v46  ;;  %v1232_v60 = vadd.f32 0.2548296, %v1200_v49  ;;  %v5255_v36 = vmul.f32 %v1218_v34, %v8216_v24  ;;  %v8249_v49 = vld [vmem:[#allocation177_spill] sm:$0xff]  ;;  %v5276_v34 = vmul.f32 %v1225_v53, %v8222_v29 }
 0x179   : > { %v1233_v33 = vadd.f32 0.2548296, %v1201_v18  ;;  %8240 = vst [vmem:[#allocation178_spill] sm:$0xff] %v5246_v40  ;;  %v1234_v11 = vadd.f32 0.2548296, %v1202_v55  ;;  %v8245_v18 = vld [vmem:[#allocation175_spill] sm:$0xff]  ;;  %v5261_v55 = vmul.f32 %v1220_v3, %v8247_v12  ;;  %v5291_v3 = vmul.f32 %v1230_v13, %v8225_v25 }
 0x17a   : > { %v1235_v15 = vadd.f32 0.2548296, %v1203_v44  ;;  %v1236_v28 = vadd.f32 0.2548296, %v1204_v37  ;;  %8242 = vst [vmem:[#allocation181_spill] sm:$0xff] %v5249_v17  ;;  %v5258_v46 = vmul.f32 %v1219_v57, %v8245_v18  ;;  %v5264_v44 = vmul.f32 %v1221_v7, %v8249_v49  ;;  %v8254_v62 = vld [vmem:[#allocation180_spill] sm:$0xff] }
 0x17b   : > { %v1237_v50 = vadd.f32 0.2548296, %v1205_v51  ;;  %v1238_v59 = vadd.f32 0.2548296, %v1206_v26  ;;  %v1239_v16 = vadd.f32 0.2548296, %v1207_v14  ;;  %v5267_v37 = vmul.f32 %v1222_v0, %v8220_v5 }
 0x17c   : > { %8243 = vst [vmem:[#allocation168_spill] sm:$0xff] %v5252_v63  ;;  %v1240_v23 = vadd.f32 0.2548296, %v1208_v10  ;;  %v8252_v51 = vld [vmem:[#allocation179_spill] sm:$0xff]  ;;  %v5273_v14 = vmul.f32 %v1224_v31, %v8254_v62  ;;  %v8257_v24 = vld [vmem:[#allocation182_spill] sm:$0xff]  ;;  %v8261_v2 = vld [vmem:[#allocation184_spill] sm:$0xff]  ;;  %v5288_v5 = vmul.f32 %v1229_v6, %v8206_v54  ;;  %v5294_v7 = vmul.f32 %v1231_v48, %v8226_v42 }
 0x17d   : > { %8244 = vst [vmem:[#allocation186_spill] sm:$0xff] %v5255_v36  ;;  %v5270_v26 = vmul.f32 %v1223_v58, %v8252_v51  ;;  %v5279_v10 = vmul.f32 %v1226_v32, %v8257_v24  ;;  %v8259_v41 = vld [vmem:[#allocation183_spill] sm:$0xff]  ;;  %v5285_v57 = vmul.f32 %v1228_v45, %v8261_v2  ;;  %v5300_v58 = vmul.f32 %v1233_v33, %v8227_v43  ;;  %v8270_v53 = vld [vmem:[#allocation190_spill] sm:$0xff]  ;;  %v8276_v43 = vld [vmem:[#allocation89_spill] sm:$0xff] }
 0x17e   : > { %8246 = vst [vmem:[#allocation188_spill] sm:$0xff] %v5258_v46  ;;  %v5282_v8 = vmul.f32 %v1227_v22, %v8259_v41  ;;  %v8266_v29 = vld [vmem:[#allocation187_spill] sm:$0xff]  ;;  %v5303_v31 = vmul.f32 %v1234_v11, %v8228_v9  ;;  %v5306_v32 = vmul.f32 %v1235_v15, %v8270_v53  ;;  %v5309_v54 = vmul.f32 %v1236_v28, %v8229_v38  ;;  %v8278_v45 = vld [vmem:[#allocation93_spill] sm:$0xff]  ;;  %v8279_v13 = vld [vmem:[#allocation120_spill] sm:$0xff] }
 0x17f   : > { %8248 = vst [vmem:[#allocation189_spill] sm:$0xff] %v5261_v55  ;;  %v5297_v0 = vmul.f32 %v1232_v60, %v8266_v29  ;;  %v5312_v25 = vmul.f32 %v1237_v50, %v8230_v35  ;;  %v5315_v42 = vmul.f32 %v1238_v59, %v8194_v30  ;;  %v5318_v22 = vmul.f32 %v1239_v16, %v8195_v19  ;;  %v8280_v38 = vld [vmem:[#allocation121_spill] sm:$0xff]  ;;  %v8281_v60 = vld [vmem:[#allocation122_spill] sm:$0xff]  ;;  %v8282_v33 = vld [vmem:[#allocation123_spill] sm:$0xff] }
 0x180   : > { %8250 = vst [vmem:[#allocation191_spill] sm:$0xff] %v5264_v44  ;;  %v1273_v52 = vsub.f32 0.0, %v8276_v43  ;;  %v5322_v9 = vmul.f32 %v1240_v23, %v8196_v4  ;;  %v1274_v6 = vsub.f32 0.0, %v8278_v45  ;;  %v1275_v56 = vsub.f32 0.0, %v8279_v13  ;;  %v8283_v30 = vld [vmem:[#allocation124_spill] sm:$0xff]  ;;  %v8284_v28 = vld [vmem:[#allocation125_spill] sm:$0xff] }
 0x181   : > { %8251 = vst [vmem:[#allocation192_spill] sm:$0xff] %v5267_v37  ;;  %v1276_v48 = vsub.f32 0.0, %v8280_v38  ;;  %v1277_v35 = vsub.f32 0.0, %v8281_v60  ;;  %v1278_v11 = vsub.f32 0.0, %v8282_v33  ;;  %v1279_v15 = vsub.f32 0.0, %v8283_v30  ;;  %v8285_v20 = vld [vmem:[#allocation126_spill] sm:$0xff] }
 0x182   : > { %8253 = vst [vmem:[#allocation169_spill] sm:$0xff] %v5270_v26  ;;  %v1280_v19 = vsub.f32 0.0, %v8284_v28  ;;  %v1281_v50 = vsub.f32 0.0, %v8285_v20  ;;  %v8286_v59 = vld [vmem:[#allocation127_spill] sm:$0xff]  ;;  %v8287_v4 = vld [vmem:[#allocation128_spill] sm:$0xff]  ;;  %v8288_v18 = vld [vmem:[#allocation129_spill] sm:$0xff]  ;;  %v1305_v29 = vmul.f32 %v1273_v52, %v8276_v43 }
 0x183   : > { %8255 = vst [vmem:[#allocation170_spill] sm:$0xff] %v5273_v14  ;;  %v1282_v16 = vsub.f32 0.0, %v8286_v59  ;;  %v1283_v23 = vsub.f32 0.0, %v8287_v4  ;;  %v1284_v12 = vsub.f32 0.0, %v8288_v18  ;;  %v8289_v49 = vld [vmem:[#allocation130_spill] sm:$0xff]  ;;  %v8290_v62 = vld [vmem:[#allocation131_spill] sm:$0xff]  ;;  %v1308_v26 = vmul.f32 %v1276_v48, %v8280_v38 }
 0x184   : > { %8256 = vst [vmem:[#allocation171_spill] sm:$0xff] %v5276_v34  ;;  %v1285_v51 = vsub.f32 0.0, %v8289_v49  ;;  %v1286_v24 = vsub.f32 0.0, %v8290_v62  ;;  %v8291_v41 = vld [vmem:[#allocation132_spill] sm:$0xff]  ;;  %v8292_v53 = vld [vmem:[#allocation133_spill] sm:$0xff]  ;;  %v8300_v52 = vld [vmem:[#allocation142_spill] sm:$0xff]  ;;  %v1311_v38 = vmul.f32 %v1279_v15, %v8283_v30 }
 0x185   : > { %8258 = vst [vmem:[#allocation172_spill] sm:$0xff] %v5279_v10  ;;  %v1287_v2 = vsub.f32 0.0, %v8291_v41  ;;  %v8299_v34 = vld [vmem:[#allocation141_spill] sm:$0xff]  ;;  %v1296_v14 = vsub.f32 0.0, %v8300_v52  ;;  %v8301_v37 = vld [vmem:[#allocation143_spill] sm:$0xff]  ;;  %v8303_v36 = vld [vmem:[#allocation146_spill] sm:$0xff] }
 0x186   : > { %8260 = vst [vmem:[#allocation175_spill] sm:$0xff] %v5282_v8  ;;  %v8298_v8 = vld [vmem:[#allocation139_spill] sm:$0xff]  ;;  %v1295_v43 = vsub.f32 0.0, %v8299_v34  ;;  %v1297_v44 = vsub.f32 0.0, %v8301_v37  ;;  %v8302_v55 = vld [vmem:[#allocation145_spill] sm:$0xff]  ;;  %v1299_v63 = vsub.f32 0.0, %v8303_v36  ;;  %v1318_v15 = vmul.f32 %v1286_v24, %v8290_v62 }
 0x187   : > { %8262 = vst [vmem:[#allocation176_spill] sm:$0xff] %v5285_v57  ;;  %v1307_v57 = vmul.f32 %v1275_v56, %v8279_v13  ;;  %v1294_v10 = vsub.f32 0.0, %v8298_v8  ;;  %v1337_v46 = vmul.f32 1.442695, %v1305_v29  ;;  %v8304_v17 = vld [vmem:[#allocation147_spill] sm:$0xff]  ;;  %v1310_v13 = vmul.f32 %v1278_v11, %v8282_v33  ;;  %v8305_v1 = vld [vmem:[#allocation149_spill] sm:$0xff] }
 0x188   : > { %8263 = vst [vmem:[#allocation177_spill] sm:$0xff] %v5288_v5  ;;  %v1300_v40 = vsub.f32 0.0, %v8304_v17  ;;  %v1301_v47 = vsub.f32 0.0, %v8305_v1  ;;  %v8306_v61 = vld [vmem:[#allocation150_spill] sm:$0xff]  ;;  %v8307_v39 = vld [vmem:[#allocation151_spill] sm:$0xff]  ;;  %v1313_v29 = vmul.f32 %v1281_v50, %v8285_v20  ;;  %v1314_v17 = vmul.f32 %v1282_v16, %v8286_v59 }
 0x189   : > { %8264 = vst [vmem:[#allocation179_spill] sm:$0xff] %v5291_v3  ;;  %v8297_v3 = vld [vmem:[#allocation138_spill] sm:$0xff]  ;;  %v1302_v27 = vsub.f32 0.0, %v8306_v61  ;;  %v1341_v48 = vmul.f32 1.442695, %v1307_v57  ;;  %v1303_v21 = vsub.f32 0.0, %v8307_v39  ;;  %2849 = vpow2.f32 %v1337_v46 }
 0x18a   : > { %8265 = vst [vmem:[#allocation180_spill] sm:$0xff] %v5294_v7  ;;  %v1293_v5 = vsub.f32 0.0, %v8297_v3  ;;  %v1315_v33 = vmul.f32 %v1283_v23, %v8287_v4  ;;  %v1316_v11 = vmul.f32 %v1284_v12, %v8288_v18  ;;  %v1347_v30 = vmul.f32 1.442695, %v1310_v13 }
 0x18b   : > { %8267 = vst [vmem:[#allocation182_spill] sm:$0xff] %v5297_v0  ;;  %v8296_v0 = vld [vmem:[#allocation137_spill] sm:$0xff]  ;;  %v1317_v57 = vmul.f32 %v1285_v51, %v8289_v49  ;;  %v1353_v50 = vmul.f32 1.442695, %v1313_v29  ;;  %v1355_v4 = vmul.f32 1.442695, %v1314_v17  ;;  %v1326_v12 = vmul.f32 %v1294_v10, %v8298_v8 }
 0x18c   : > { %8268 = vst [vmem:[#allocation183_spill] sm:$0xff] %v5300_v58  ;;  %v1292_v7 = vsub.f32 0.0, %v8296_v0  ;;  %v1325_v18 = vmul.f32 %v1293_v5, %v8297_v3  ;;  %v1331_v5 = vmul.f32 %v1299_v63, %v8303_v36  ;;  %v8311_v10 = vld [vmem:[#allocation147_spill] sm:$0xff]  ;;  %v1363_v8 = vmul.f32 1.442695, %v1318_v15 }
 0x18d   : > { %8269 = vst [vmem:[#allocation184_spill] sm:$0xff] %v5303_v31  ;;  %v8295_v31 = vld [vmem:[#allocation136_spill] sm:$0xff]  ;;  %v1361_v17 = vmul.f32 1.442695, %v1317_v57 }
 0x18e   : > { %8271 = vst [vmem:[#allocation187_spill] sm:$0xff] %v5306_v32  ;;  %v1306_v32 = vmul.f32 %v1274_v6, %v8278_v45  ;;  %v1291_v58 = vsub.f32 0.0, %v8295_v31  ;;  %v1298_v45 = vsub.f32 0.0, %v8302_v55  ;;  %v1309_v6 = vmul.f32 %v1277_v35, %v8281_v60  ;;  %v8308_v55 = vld [vmem:[#allocation153_spill] sm:$0xff] }
 0x18f   : > { %8272 = vst [vmem:[#allocation190_spill] sm:$0xff] %v5309_v54  ;;  %v1304_v37 = vsub.f32 0.0, %v8308_v55  ;;  %v1312_v60 = vmul.f32 %v1280_v19, %v8284_v28  ;;  %v1343_v35 = vmul.f32 1.442695, %v1308_v26  ;;  %v1349_v55 = vmul.f32 1.442695, %v1311_v38  ;;  %v2850_v23 = vpop.eup %2849 }
 0x190   : > { %8273 = vst [vmem:[#allocation199_spill] sm:$0xff] %v5312_v25  ;;  %v8294_v25 = vld [vmem:[#allocation135_spill] sm:$0xff]  ;;  %v1339_v56 = vmul.f32 1.442695, %v1306_v32  ;;  %v1345_v32 = vmul.f32 1.442695, %v1309_v6  ;;  %v1319_v26 = vmul.f32 %v1287_v2, %v8291_v41  ;;  %v1323_v59 = vmul.f32 %v1291_v58, %v8295_v31 }
 0x191   : > { %8274 = vst [vmem:[#allocation200_spill] sm:$0xff] %v5315_v42  ;;  %v1290_v54 = vsub.f32 0.0, %v8294_v25  ;;  %v1351_v19 = vmul.f32 1.442695, %v1312_v60  ;;  %v1324_v16 = vmul.f32 %v1292_v7, %v8296_v0  ;;  %v8309_v58 = vld [vmem:[#allocation143_spill] sm:$0xff]  ;;  %v8310_v7 = vld [vmem:[#allocation145_spill] sm:$0xff] }
 0x192   : > { %8275 = vst [vmem:[#allocation201_spill] sm:$0xff] %v5318_v22  ;;  %v8293_v22 = vld [vmem:[#allocation134_spill] sm:$0xff]  ;;  %2851 = vpow2.f32 %v1339_v56  ;;  %v1329_v31 = vmul.f32 %v1297_v44, %v8309_v58  ;;  %v1330_v0 = vmul.f32 %v1298_v45, %v8310_v7  ;;  %v1365_v62 = vmul.f32 1.442695, %v1319_v26  ;;  %v8312_v41 = vld [vmem:[#allocation153_spill] sm:$0xff] }
 0x193   : > { %8277 = vst [vmem:[#allocation89_spill] sm:$0xff] %v5322_v9  ;;  %v1288_v9 = vsub.f32 0.0, %v8292_v53  ;;  %v1289_v42 = vsub.f32 0.0, %v8293_v22  ;;  %2853 = vpow2.f32 %v1341_v48  ;;  %v1322_v20 = vmul.f32 %v1290_v54, %v8294_v25  ;;  %v8315_v48 = vld [vmem:[#allocation195_spill] sm:$0xff] }
 0x194   : > { %2855 = vpow2.f32 %v1343_v35  ;;  %v1328_v54 = vmul.f32 %v1296_v14, %v8300_v52  ;;  %v1359_v25 = vmul.f32 1.442695, %v1316_v11  ;;  %v1334_v14 = vmul.f32 %v1302_v27, %v8306_v61 }
 0x195   : > { %v1320_v28 = vmul.f32 %v1288_v9, %v8292_v53  ;;  %v1321_v46 = vmul.f32 %v1289_v42, %v8293_v22  ;;  %2857 = vpow2.f32 %v1345_v32  ;;  %v1357_v9 = vmul.f32 1.442695, %v1315_v33  ;;  %v8316_v33 = vld [vmem:[#allocation185_spill] sm:$0xff] }
 0x196   : > { %2859 = vpow2.f32 %v1347_v30  ;;  %v1327_v42 = vmul.f32 %v1295_v43, %v8299_v34  ;;  %v1333_v34 = vmul.f32 %v1301_v47, %v8305_v1  ;;  %v1335_v44 = vmul.f32 %v1303_v21, %v8307_v39  ;;  %v8313_v1 = vld [vmem:[#allocation193_spill] sm:$0xff]  ;;  %v8314_v21 = vld [vmem:[#allocation194_spill] sm:$0xff] }
 0x197   : > { %2861 = vpow2.f32 %v1349_v55  ;;  %v1332_v55 = vmul.f32 %v1300_v40, %v8311_v10  ;;  %v1336_v2 = vmul.f32 %v1304_v37, %v8312_v41  ;;  %v1367_v53 = vmul.f32 1.442695, %v1320_v28 }
 0x198   : > { %v2852_v49 = vpop.eup %2851  ;;  %2863 = vpow2.f32 %v1351_v19  ;;  %v1369_v63 = vmul.f32 1.442695, %v1321_v46  ;;  %v1371_v40 = vmul.f32 1.442695, %v1322_v20  ;;  %v1373_v36 = vmul.f32 1.442695, %v1323_v59 }
 0x199   : > { %v2854_v22 = vpop.eup %2853  ;;  %2865 = vpow2.f32 %v1353_v50  ;;  %v1375_v45 = vmul.f32 1.442695, %v1324_v16  ;;  %v1377_v47 = vmul.f32 1.442695, %v1325_v18  ;;  %v1401_v27 = vmul.f32 %v2850_v23, %v8313_v1  ;;  %v8317_v46 = vld [vmem:[#allocation173_spill] sm:$0xff]  ;;  %v8329_v1 = vld [vmem:[#allocation191_spill] sm:$0xff] }
 0x19a   : > { %v2856_v51 = vpop.eup %2855  ;;  %2867 = vpow2.f32 %v1355_v4  ;;  %v1379_v6 = vmul.f32 1.442695, %v1326_v12  ;;  %v1381_v13 = vmul.f32 1.442695, %v1327_v42  ;;  %v1402_v39 = vmul.f32 %v2852_v49, %v8314_v21  ;;  %v8318_v4 = vld [vmem:[#allocation174_spill] sm:$0xff] }
 0x19b   : > { %v2858_v3 = vpop.eup %2857  ;;  %2869 = vpow2.f32 %v1357_v9  ;;  %v1383_v56 = vmul.f32 1.442695, %v1328_v54  ;;  %v1385_v38 = vmul.f32 1.442695, %v1329_v31  ;;  %v1403_v60 = vmul.f32 %v2854_v22, %v8315_v48  ;;  %v8319_v49 = vld [vmem:[#allocation178_spill] sm:$0xff]  ;;  %v8320_v22 = vld [vmem:[#allocation181_spill] sm:$0xff] }
 0x19c   : > { %v2860_v24 = vpop.eup %2859  ;;  %2871 = vpow2.f32 %v1359_v25  ;;  %v1387_v29 = vmul.f32 1.442695, %v1330_v0  ;;  %v1389_v32 = vmul.f32 1.442695, %v1331_v5  ;;  %v1404_v11 = vmul.f32 %v2856_v51, %v8316_v33  ;;  %v8321_v31 = vld [vmem:[#allocation90_spill] sm:$0xff]  ;;  %v3044_v0 = vld [vmem:[%s3336_s30] sm:$0xff] }
 0x19d   : > { %v2862_v43 = vpop.eup %2861  ;;  %2873 = vpow2.f32 %v1361_v17  ;;  %v1391_v57 = vmul.f32 1.442695, %v1332_v55  ;;  %v1393_v15 = vmul.f32 1.442695, %v1333_v34  ;;  %v1433_v26 = vsub.f32 1.0, %v1401_v27  ;;  %v8322_v5 = vld [vmem:[#allocation168_spill] sm:$0xff] }
 0x19e   : > { %v2864_v52 = vpop.eup %2863  ;;  %2875 = vpow2.f32 %v1363_v8  ;;  %v1395_v19 = vmul.f32 1.442695, %v1334_v14  ;;  %v1405_v20 = vmul.f32 %v2858_v3, %v8317_v46  ;;  %v1434_v50 = vsub.f32 1.0, %v1402_v39  ;;  %v8323_v8 = vld [vmem:[#allocation91_spill] sm:$0xff]  ;;  %v8324_v14 = vld [vmem:[#allocation186_spill] sm:$0xff]  ;;  %v8332_v48 = vld [vmem:[#allocation169_spill] sm:$0xff] }
 0x19f   : > { %v2866_v61 = vpop.eup %2865  ;;  %2877 = vpow2.f32 %v1365_v62  ;;  %v1397_v16 = vmul.f32 1.442695, %v1335_v44  ;;  %v1406_v23 = vmul.f32 %v2860_v24, %v8318_v4  ;;  %v1435_v18 = vsub.f32 1.0, %v1403_v60  ;;  %v8325_v44 = vld [vmem:[#allocation92_spill] sm:$0xff]  ;;  %v8336_v4 = vld [vmem:[#allocation98_spill] sm:$0xff] }
 0x1a0   : > { %v2868_v37 = vpop.eup %2867  ;;  %2879 = vpow2.f32 %v1367_v53  ;;  %v1399_v9 = vmul.f32 1.442695, %v1336_v2  ;;  %v1407_v42 = vmul.f32 %v2862_v43, %v8319_v49  ;;  %v1436_v54 = vsub.f32 1.0, %v1404_v11  ;;  %v8326_v53 = vld [vmem:[#allocation188_spill] sm:$0xff] }
 0x1a1   : > { %v2870_v35 = vpop.eup %2869  ;;  %2881 = vpow2.f32 %v1369_v63  ;;  %v1408_v58 = vmul.f32 %v2864_v52, %v8320_v22  ;;  %v5396_v7 = vmul.f32 %v1433_v26, %v8321_v31  ;;  %v5399_v17 = vmul.f32 -1.442695, %v3044_v0  ;;  %v8333_v33 = vld [vmem:[#allocation96_spill] sm:$0xff] }
 0x1a2   : > { %v2872_v30 = vpop.eup %2871  ;;  %2883 = vpow2.f32 %v1371_v40  ;;  %v1409_v10 = vmul.f32 %v2866_v61, %v8322_v5  ;;  %v1437_v55 = vsub.f32 1.0, %v1405_v20  ;;  %v5403_v3 = vmul.f32 %v1434_v50, %v8323_v8  ;;  %v8327_v40 = vld [vmem:[#allocation94_spill] sm:$0xff]  ;;  %v8341_v5 = vld [vmem:[#allocation176_spill] sm:$0xff] }
 0x1a3   : > { %v2874_v28 = vpop.eup %2873  ;;  %2885 = vpow2.f32 %v1373_v36  ;;  %v1410_v62 = vmul.f32 %v2868_v37, %v8324_v14  ;;  %v1438_v24 = vsub.f32 1.0, %v1406_v23  ;;  %v5407_v41 = vmul.f32 %v1435_v18, %v8325_v44  ;;  %v8331_v37 = vld [vmem:[#allocation95_spill] sm:$0xff]  ;;  %v8342_v8 = vld [vmem:[#allocation100_spill] sm:$0xff] }
 0x1a4   : > { %v2876_v59 = vpop.eup %2875  ;;  %2887 = vpow2.f32 %v1375_v45  ;;  %v1411_v43 = vmul.f32 %v2870_v35, %v8326_v53  ;;  %v1439_v63 = vsub.f32 1.0, %v1407_v42  ;;  %v5411_v36 = vmul.f32 %v1436_v54, %v8327_v40  ;;  %v8328_v45 = vld [vmem:[#allocation189_spill] sm:$0xff]  ;;  %v8337_v18 = vld [vmem:[#allocation171_spill] sm:$0xff] }
 0x1a5   : > { %v2878_v12 = vpop.eup %2877  ;;  %2889 = vpow2.f32 %v1377_v47  ;;  %v1412_v47 = vmul.f32 %v2872_v30, %v8328_v45  ;;  %v1413_v27 = vmul.f32 %v2874_v28, %v8329_v1  ;;  %v1440_v61 = vsub.f32 1.0, %v1408_v58  ;;  %v8334_v30 = vld [vmem:[#allocation170_spill] sm:$0xff]  ;;  %v8338_v42 = vld [vmem:[#allocation99_spill] sm:$0xff] }
 0x1a6   : > { %v2880_v25 = vpop.eup %2879  ;;  %2891 = vpow2.f32 %v1379_v6  ;;  %v1441_v39 = vsub.f32 1.0, %v1409_v10  ;;  %v1415_v60 = vmul.f32 %v2878_v12, %v8332_v48  ;;  %v1442_v35 = vsub.f32 1.0, %v1410_v62  ;;  %v8340_v58 = vld [vmem:[#allocation175_spill] sm:$0xff] }
 0x1a7   : > { %v2882_v51 = vpop.eup %2881  ;;  %2893 = vpow2.f32 %v1381_v13  ;;  %v8330_v13 = vld [vmem:[#allocation192_spill] sm:$0xff]  ;;  %v1416_v26 = vmul.f32 %v2880_v25, %v8334_v30  ;;  %v1443_v28 = vsub.f32 1.0, %v1411_v43  ;;  %v1444_v50 = vsub.f32 1.0, %v1412_v47  ;;  %v8345_v53 = vld [vmem:[#allocation179_spill] sm:$0xff]  ;;  %v8346_v43 = vld [vmem:[#allocation102_spill] sm:$0xff] }
 0x1a8   : > { %v2884_v34 = vpop.eup %2883  ;;  %2895 = vpow2.f32 %v1383_v56  ;;  %v1414_v21 = vmul.f32 %v2876_v59, %v8330_v13  ;;  %v5417_v56 = vmul.f32 %v1437_v55, %v8331_v37  ;;  %v1445_v59 = vsub.f32 1.0, %v1413_v27  ;;  %v8339_v25 = vld [vmem:[#allocation172_spill] sm:$0xff]  ;;  %v8349_v47 = vld [vmem:[#allocation182_spill] sm:$0xff] }
 0x1a9   : > { %v2886_v2 = vpop.eup %2885  ;;  %2897 = vpow2.f32 %v1385_v38  ;;  %v1417_v12 = vmul.f32 %v2882_v51, %v8337_v18  ;;  %v1418_v22 = vmul.f32 %v2884_v34, %v8339_v25  ;;  %v1448_v55 = vsub.f32 1.0, %v1416_v26  ;;  %v8354_v26 = vld [vmem:[#allocation187_spill] sm:$0xff] }
 0x1aa   : > { %v2888_v52 = vpop.eup %2887  ;;  %2899 = vpow2.f32 %v1387_v29  ;;  %v5421_v29 = vmul.f32 %v1438_v24, %v8333_v33  ;;  %v1446_v49 = vsub.f32 1.0, %v1414_v21  ;;  %v1419_v31 = vmul.f32 %v2886_v2, %v8340_v58  ;;  %v8344_v24 = vld [vmem:[#allocation177_spill] sm:$0xff]  ;;  %v8347_v2 = vld [vmem:[#allocation103_spill] sm:$0xff]  ;;  %v8353_v33 = vld [vmem:[#allocation184_spill] sm:$0xff] }
 0x1ab   : > { %v2890_v6 = vpop.eup %2889  ;;  %2901 = vpow2.f32 %v1389_v32  ;;  %v8335_v32 = vld [vmem:[#allocation97_spill] sm:$0xff]  ;;  %v1420_v10 = vmul.f32 %v2888_v52, %v8341_v5  ;;  %v5438_v14 = vmul.f32 %v1442_v35, %v8342_v8  ;;  %v5446_v34 = vmul.f32 %v1444_v50, %v8346_v43  ;;  %v8348_v52 = vld [vmem:[#allocation180_spill] sm:$0xff]  ;;  %v8355_v50 = vld [vmem:[#allocation106_spill] sm:$0xff] }
 0x1ac   : > { %v2892_v38 = vpop.eup %2891  ;;  %2903 = vpow2.f32 %v1391_v57  ;;  %v5425_v46 = vmul.f32 %v1439_v63, %v8335_v32  ;;  %v5428_v57 = vmul.f32 %v1440_v61, %v8336_v4  ;;  %v1421_v44 = vmul.f32 %v2890_v6, %v8344_v24  ;;  %v8350_v61 = vld [vmem:[#allocation104_spill] sm:$0xff]  ;;  %v8357_v18 = vld [vmem:[#allocation199_spill] sm:$0xff]  ;;  %v8360_v5 = vld [vmem:[#allocation201_spill] sm:$0xff] }
 0x1ad   : > { %v2894_v11 = vpop.eup %2893  ;;  %2905 = vpow2.f32 %v1393_v15  ;;  %v5432_v15 = vmul.f32 %v1441_v39, %v8338_v42  ;;  %v5449_v63 = vmul.f32 %v1445_v59, %v8347_v2  ;;  %v1449_v27 = vsub.f32 1.0, %v1417_v12  ;;  %v8351_v39 = vld [vmem:[#allocation183_spill] sm:$0xff]  ;;  %v8363_v24 = vld [vmem:[#allocation89_spill] sm:$0xff]  ;;  %v8364_v2 = vld [vmem:[#allocation110_spill] sm:$0xff] }
 0x1ae   : > { %v2896_v20 = vpop.eup %2895  ;;  %2907 = vpow2.f32 %v1395_v19  ;;  %v1447_v19 = vsub.f32 1.0, %v1415_v60  ;;  %v1423_v45 = vmul.f32 %v2894_v11, %v8348_v52  ;;  %v1478_v13 = vmul.f32 %v1446_v49, %v8350_v61  ;;  %v8365_v52 = vld [vmem:[#allocation111_spill] sm:$0xff]  ;;  %v8367_v61 = vld [vmem:[#allocation113_spill] sm:$0xff] }
 0x1af   : > { %v2898_v23 = vpop.eup %2897  ;;  %2909 = vpow2.f32 %v1397_v16  ;;  %v8343_v16 = vld [vmem:[#allocation101_spill] sm:$0xff]  ;;  %v1424_v1 = vmul.f32 %v2896_v20, %v8349_v47  ;;  %v1450_v6 = vsub.f32 1.0, %v1418_v22  ;;  %v1451_v48 = vsub.f32 1.0, %v1419_v31  ;;  %v8356_v20 = vld [vmem:[#allocation190_spill] sm:$0xff]  ;;  %v8359_v31 = vld [vmem:[#allocation107_spill] sm:$0xff] }
 0x1b0   : > { %v2900_v54 = vpop.eup %2899  ;;  %2911 = vpow2.f32 %v1399_v9  ;;  %v5441_v51 = vmul.f32 %v1443_v28, %v8343_v16  ;;  %v1422_v9 = vmul.f32 %v2892_v38, %v8345_v53  ;;  %v1425_v37 = vmul.f32 %v2898_v23, %v8351_v39  ;;  %v8352_v38 = vld [vmem:[#allocation105_spill] sm:$0xff]  ;;  %v8358_v23 = vld [vmem:[#allocation200_spill] sm:$0xff]  ;;  %v8368_v39 = vld [vmem:[#allocation114_spill] sm:$0xff] }
 0x1b1   : > { %v2902_v0 = vpop.eup %2901  ;;  %v1479_v60 = vmul.f32 %v1447_v19, %v8352_v38  ;;  %v1426_v30 = vmul.f32 %v2900_v54, %v8353_v33  ;;  %v1452_v32 = vsub.f32 1.0, %v1420_v10  ;;  %v1480_v11 = vmul.f32 %v1448_v55, %v8355_v50  ;;  %v8362_v16 = vld [vmem:[#allocation109_spill] sm:$0xff]  ;;  %v8366_v47 = vld [vmem:[#allocation112_spill] sm:$0xff]  ;;  %v8369_v38 = vld [vmem:[#allocation115_spill] sm:$0xff] }
 0x1b2   : > { %v2904_v62 = vpop.eup %2903  ;;  %v1427_v28 = vmul.f32 %v2902_v0, %v8354_v26  ;;  %v1453_v49 = vsub.f32 1.0, %v1421_v44  ;;  %v1454_v42 = vsub.f32 1.0, %v1422_v9  ;;  %v1455_v22 = vsub.f32 1.0, %v1423_v45  ;;  %v8361_v0 = vld [vmem:[#allocation108_spill] sm:$0xff]  ;;  %v8371_v50 = vld [vmem:[#allocation117_spill] sm:$0xff] }
 0x1b3   : > { %v2906_v40 = vpop.eup %2905  ;;  %v1428_v4 = vmul.f32 %v2904_v62, %v8356_v20  ;;  %v1456_v58 = vsub.f32 1.0, %v1424_v1  ;;  %v1481_v19 = vmul.f32 %v1449_v27, %v8359_v31  ;;  %v1457_v8 = vsub.f32 1.0, %v1425_v37  ;;  %v3045_v31 = vld [vmem:[%s3336_s30 + $0x8] sm:$0xff] }
 0x1b4   : > { %v2908_v21 = vpop.eup %2907  ;;  %v1429_v12 = vmul.f32 %v2906_v40, %v8357_v18  ;;  %v1482_v10 = vmul.f32 %v1450_v6, %v8361_v0  ;;  %v1483_v55 = vmul.f32 %v1451_v48, %v8362_v16  ;;  %v1458_v62 = vsub.f32 1.0, %v1426_v30  ;;  %v8373_v18 = vld [vmem:[#allocation119_spill] sm:$0xff] }
 0x1b5   : > { %v2910_v35 = vpop.eup %2909  ;;  %v1430_v25 = vmul.f32 %v2908_v21, %v8358_v23  ;;  %v1459_v43 = vsub.f32 1.0, %v1427_v28  ;;  %v1484_v44 = vmul.f32 %v1452_v32, %v8364_v2  ;;  %v1460_v9 = vsub.f32 1.0, %v1428_v4  ;;  %v8370_v28 = vld [vmem:[#allocation116_spill] sm:$0xff] }
 0x1b6   : > { %v2912_v59 = vpop.eup %2911  ;;  %v1431_v54 = vmul.f32 %v2910_v35, %v8360_v5  ;;  %v1461_v40 = vsub.f32 1.0, %v1429_v12  ;;  %v1485_v45 = vmul.f32 %v1453_v49, %v8365_v52  ;;  %v1486_v1 = vmul.f32 %v1454_v42, %v8366_v47  ;;  %v8374_v49 = vld [vmem:[#allocation159_spill] sm:$0xff] }
 0x1b7   : > { %v1432_v53 = vmul.f32 %v2912_v59, %v8363_v24  ;;  %v1462_v27 = vsub.f32 1.0, %v1430_v25  ;;  %v1487_v21 = vmul.f32 %v1455_v22, %v8367_v61  ;;  %v1488_v37 = vmul.f32 %v1456_v58, %v8368_v39  ;;  %v8375_v22 = vld [vmem:[#allocation161_spill] sm:$0xff]  ;;  %v3047_v24 = vld [vmem:[%s3336_s30 + $0x18] sm:$0xff] }
 0x1b8   : > { %v5473_v6 = vadd.f32 1.0, %v5396_v7  ;;  %v1463_v48 = vsub.f32 1.0, %v1431_v54  ;;  %v1489_v35 = vmul.f32 %v1457_v8, %v8369_v38  ;;  %v5477_v33 = vadd.f32 1.0, %v5403_v3  ;;  %v8372_v7 = vld [vmem:[#allocation118_spill] sm:$0xff] }
 0x1b9   : > { %v5480_v30 = vadd.f32 1.0, %v5407_v41  ;;  %v1464_v26 = vsub.f32 1.0, %v1432_v53  ;;  %v1490_v32 = vmul.f32 %v1458_v62, %v8370_v28  ;;  %v1491_v59 = vmul.f32 %v1459_v43, %v8371_v50 }
 0x1ba   : > { %v5485_v20 = vadd.f32 1.0, %v5411_v36  ;;  %v1492_v4 = vmul.f32 %v1460_v9, %v8372_v7  ;;  %v1493_v12 = vmul.f32 %v1461_v40, %v8373_v18  ;;  %v5490_v3 = vadd.f32 1.0, %v5417_v56  ;;  %v3055_v7 = vld [vmem:[%s3336_s30 + $0x58] sm:$0xff] }
 0x1bb   : > { %v5493_v41 = vadd.f32 1.0, %v5421_v29  ;;  %v1494_v42 = vmul.f32 %v1462_v27, %v8374_v49  ;;  %v5497_v23 = vadd.f32 1.0, %v5425_v46  ;;  %v5500_v36 = vadd.f32 1.0, %v5428_v57  ;;  %v8376_v46 = vld [vmem:[#allocation163_spill] sm:$0xff] }
 0x1bc   : > { %v5503_v25 = vadd.f32 1.0, %v5432_v15  ;;  %v1495_v58 = vmul.f32 %v1463_v48, %v8375_v22  ;;  %v5507_v56 = vadd.f32 1.0, %v5438_v14  ;;  %v5510_v29 = vadd.f32 1.0, %v5441_v51  ;;  %v3046_v15 = vld [vmem:[%s3336_s30 + $0x10] sm:$0xff]  ;;  %v8377_v49 = vld [vmem:[#allocation47_spill] sm:$0xff] }
 0x1bd   : > { %v2631_v5 = vmul.f32 -1.442695, %v3045_v31  ;;  %v1496_v54 = vmul.f32 %v1464_v26, %v8376_v46  ;;  %v5515_v8 = vadd.f32 1.0, %v5446_v34  ;;  %v5518_v57 = vadd.f32 1.0, %v5449_v63  ;;  %v3048_v34 = vld [vmem:[%s3336_s30 + $0x20] sm:$0xff]  ;;  %v3054_v26 = vld [vmem:[%s3336_s30 + $0x50] sm:$0xff] }
 0x1be   : > { %v2632_v0 = vmul.f32 -1.442695, %v3046_v15  ;;  %v5521_v16 = vadd.f32 1.0, %v1478_v13  ;;  %v5523_v14 = vadd.f32 1.0, %v1479_v60  ;;  %v5525_v51 = vadd.f32 1.0, %v1480_v11  ;;  %v3049_v60 = vld [vmem:[%s3336_s30 + $0x28] sm:$0xff] }
 0x1bf   : > { %v2633_v53 = vmul.f32 -1.442695, %v3047_v24  ;;  %v5528_v62 = vadd.f32 1.0, %v1481_v19  ;;  %v5530_v43 = vadd.f32 1.0, %v1482_v10  ;;  %2913 = vpow2.f32 %v5399_v17  ;;  %v3050_v19 = vld [vmem:[%s3336_s30 + $0x30] sm:$0xff]  ;;  %v3056_v31 = vld [vmem:[%s3336_s30 + $0x60] sm:$0xff] }
 0x1c0   : > { %v2634_v63 = vmul.f32 -1.442695, %v3048_v34  ;;  %v5534_v2 = vadd.f32 1.0, %v1483_v55  ;;  %v5536_v13 = vadd.f32 1.0, %v1484_v44  ;;  %2915 = vpow2.f32 %v2631_v5  ;;  %v3051_v55 = vld [vmem:[%s3336_s30 + $0x38] sm:$0xff]  ;;  %v8381_v46 = vld [vmem:[#allocation49_spill] sm:$0xff] }
 0x1c1   : > { %v2635_v11 = vmul.f32 -1.442695, %v3049_v60  ;;  %v5539_v9 = vadd.f32 1.0, %v1485_v45  ;;  %v5541_v40 = vadd.f32 1.0, %v1486_v1  ;;  %2917 = vpow2.f32 %v2632_v0  ;;  %v3052_v45 = vld [vmem:[%s3336_s30 + $0x40] sm:$0xff]  ;;  %v8383_v15 = vld [vmem:[#allocation50_spill] sm:$0xff] }
 0x1c2   : > { %v2636_v10 = vmul.f32 -1.442695, %v3050_v19  ;;  %v5544_v17 = vadd.f32 1.0, %v1487_v21  ;;  %v5546_v52 = vadd.f32 1.0, %v1488_v37  ;;  %2919 = vpow2.f32 %v2633_v53  ;;  %v3053_v21 = vld [vmem:[%s3336_s30 + $0x48] sm:$0xff] }
 0x1c3   : > { %v2637_v44 = vmul.f32 -1.442695, %v3051_v55  ;;  %v5549_v47 = vadd.f32 1.0, %v1489_v35  ;;  %v5551_v27 = vadd.f32 1.0, %v1490_v32  ;;  %2921 = vpow2.f32 %v2634_v63  ;;  %v8387_v63 = vld [vmem:[#allocation52_spill] sm:$0xff]  ;;  %v8391_v55 = vld [vmem:[#allocation54_spill] sm:$0xff] }
 0x1c4   : > { %v2638_v1 = vmul.f32 -1.442695, %v3052_v45  ;;  %v5554_v61 = vadd.f32 1.0, %v1491_v59  ;;  %v5556_v39 = vadd.f32 1.0, %v1492_v4  ;;  %2923 = vpow2.f32 %v2635_v11 }
 0x1c5   : > { %v2639_v37 = vmul.f32 -1.442695, %v3053_v21  ;;  %v5559_v48 = vpop.eup %2913  ;;  %v5561_v38 = vadd.f32 1.0, %v1493_v12  ;;  %v5563_v35 = vadd.f32 1.0, %v1494_v42  ;;  %2925 = vpow2.f32 %v2636_v10  ;;  %v8379_v42 = vld [vmem:[#allocation48_spill] sm:$0xff] }
 0x1c6   : > { %v2640_v28 = vmul.f32 -1.442695, %v3054_v26  ;;  %v5566_v32 = vpop.eup %2915  ;;  %v5568_v50 = vadd.f32 1.0, %v1495_v58  ;;  %v5570_v59 = vadd.f32 1.0, %v1496_v54  ;;  %2927 = vpow2.f32 %v2637_v44 }
 0x1c7   : > { %v2641_v4 = vmul.f32 -1.442695, %v3055_v7  ;;  %v5573_v18 = vpop.eup %2917  ;;  %v5577_v12 = vmul.f32 %v5473_v6, %v8377_v49  ;;  %v5581_v22 = vmul.f32 %v5477_v33, %v8379_v42  ;;  %2929 = vpow2.f32 %v2638_v1  ;;  %v3057_v6 = vld [vmem:[%s3336_s30 + $0x68] sm:$0xff]  ;;  %v8385_v33 = vld [vmem:[#allocation51_spill] sm:$0xff]  ;;  %v8399_v49 = vld [vmem:[#allocation58_spill] sm:$0xff] }
 0x1c8   : > { %v2642_v58 = vmul.f32 -1.442695, %v3056_v31  ;;  %v5584_v5 = vpop.eup %2919  ;;  %v5588_v54 = vmul.f32 %v5480_v30, %v8381_v46  ;;  %v5592_v0 = vmul.f32 %v5485_v20, %v8383_v15  ;;  %2931 = vpow2.f32 %v2639_v37  ;;  %v3058_v30 = vld [vmem:[%s3336_s30 + $0x70] sm:$0xff]  ;;  %v8395_v37 = vld [vmem:[#allocation56_spill] sm:$0xff] }
 0x1c9   : > { %8378 = vst [vmem:[#allocation93_spill] sm:$0xff] %v5577_v12  ;;  %v2643_v24 = vmul.f32 -1.442695, %v3057_v6  ;;  %v5595_v53 = vpop.eup %2921  ;;  %v5599_v34 = vmul.f32 %v5490_v3, %v8385_v33  ;;  %v5603_v60 = vmul.f32 %v5493_v41, %v8387_v63  ;;  %2933 = vpow2.f32 %v2640_v28  ;;  %v8389_v20 = vld [vmem:[#allocation53_spill] sm:$0xff]  ;;  %v3059_v3 = vld [vmem:[%s3336_s30 + $0x78] sm:$0xff]  ;;  %v8393_v41 = vld [vmem:[#allocation55_spill] sm:$0xff] }
 0x1ca   : > { %8380 = vst [vmem:[#allocation120_spill] sm:$0xff] %v5581_v22  ;;  %v2644_v11 = vmul.f32 -1.442695, %v3058_v30  ;;  %v5606_v19 = vpop.eup %2923  ;;  %v5610_v10 = vmul.f32 %v5497_v23, %v8389_v20  ;;  %v5614_v44 = vmul.f32 %v5500_v36, %v8391_v55  ;;  %2935 = vpow2.f32 %v2641_v4  ;;  %v3060_v23 = vld [vmem:[%s3336_s30 + $0x80] sm:$0xff]  ;;  %v8397_v36 = vld [vmem:[#allocation57_spill] sm:$0xff]  ;;  %v8403_v15 = vld [vmem:[#allocation60_spill] sm:$0xff] }
 0x1cb   : > { %8382 = vst [vmem:[#allocation121_spill] sm:$0xff] %v5588_v54  ;;  %v2645_v45 = vmul.f32 -1.442695, %v3059_v3  ;;  %v5617_v1 = vpop.eup %2925  ;;  %v5621_v21 = vmul.f32 %v5503_v25, %v8393_v41  ;;  %v5625_v26 = vmul.f32 %v5507_v56, %v8395_v37  ;;  %2937 = vpow2.f32 %v2642_v58  ;;  %v3061_v25 = vld [vmem:[%s3336_s30 + $0x88] sm:$0xff]  ;;  %v8401_v56 = vld [vmem:[#allocation59_spill] sm:$0xff]  ;;  %v8407_v30 = vld [vmem:[#allocation62_spill] sm:$0xff] }
 0x1cc   : > { %8384 = vst [vmem:[#allocation122_spill] sm:$0xff] %v5592_v0  ;;  %v2646_v28 = vmul.f32 -1.442695, %v3060_v23  ;;  %v5628_v7 = vpop.eup %2927  ;;  %v5632_v4 = vmul.f32 %v5510_v29, %v8397_v36  ;;  %v5636_v42 = vmul.f32 %v5515_v8, %v8399_v49  ;;  %2939 = vpow2.f32 %v2643_v24  ;;  %v3062_v29 = vld [vmem:[%s3336_s30 + $0x90] sm:$0xff]  ;;  %v8411_v41 = vld [vmem:[#allocation64_spill] sm:$0xff]  ;;  %v8415_v49 = vld [vmem:[#allocation66_spill] sm:$0xff] }
 0x1cd   : > { %8386 = vst [vmem:[#allocation123_spill] sm:$0xff] %v5599_v34  ;;  %v2647_v31 = vmul.f32 -1.442695, %v3061_v25  ;;  %v5639_v46 = vpop.eup %2929  ;;  %v5643_v58 = vmul.f32 %v5518_v57, %v8401_v56  ;;  %v5647_v6 = vmul.f32 %v5521_v16, %v8403_v15  ;;  %2941 = vpow2.f32 %v2644_v11  ;;  %v8405_v8 = vld [vmem:[#allocation61_spill] sm:$0xff]  ;;  %v3063_v57 = vld [vmem:[%s3336_s30 + $0x98] sm:$0xff]  ;;  %v8409_v16 = vld [vmem:[#allocation63_spill] sm:$0xff] }
 0x1ce   : > { %8388 = vst [vmem:[#allocation124_spill] sm:$0xff] %v5603_v60  ;;  %v2648_v33 = vmul.f32 -1.442695, %v3062_v29  ;;  %v5650_v63 = vpop.eup %2931  ;;  %v5654_v24 = vmul.f32 %v5523_v14, %v8405_v8  ;;  %v5658_v20 = vmul.f32 %v5525_v51, %v8407_v30  ;;  %2943 = vpow2.f32 %v2645_v45  ;;  %v3064_v14 = vld [vmem:[%s3336_s30 + $0xa0] sm:$0xff]  ;;  %v8413_v51 = vld [vmem:[#allocation65_spill] sm:$0xff]  ;;  %v8419_v29 = vld [vmem:[#allocation68_spill] sm:$0xff] }
 0x1cf   : > { %8390 = vst [vmem:[#allocation125_spill] sm:$0xff] %v5610_v10  ;;  %v2649_v55 = vmul.f32 -1.442695, %v3063_v57  ;;  %v5661_v3 = vpop.eup %2933  ;;  %v5665_v11 = vmul.f32 %v5528_v62, %v8409_v16  ;;  %v5669_v37 = vmul.f32 %v5530_v43, %v8411_v41  ;;  %2945 = vpow2.f32 %v2646_v28  ;;  %v3065_v62 = vld [vmem:[%s3336_s30 + $0xa8] sm:$0xff]  ;;  %v8417_v43 = vld [vmem:[#allocation67_spill] sm:$0xff]  ;;  %v8423_v16 = vld [vmem:[#allocation70_spill] sm:$0xff] }
 0x1d0   : > { %8392 = vst [vmem:[#allocation126_spill] sm:$0xff] %v5614_v44  ;;  %v2650_v23 = vmul.f32 -1.442695, %v3064_v14  ;;  %v5672_v36 = vpop.eup %2935  ;;  %v5676_v45 = vmul.f32 %v5534_v2, %v8413_v51  ;;  %v5680_v25 = vmul.f32 %v5536_v13, %v8415_v49  ;;  %2947 = vpow2.f32 %v2647_v31  ;;  %v3066_v2 = vld [vmem:[%s3336_s30 + $0xb0] sm:$0xff]  ;;  %v8427_v49 = vld [vmem:[#allocation72_spill] sm:$0xff] }
 0x1d1   : > { %8394 = vst [vmem:[#allocation127_spill] sm:$0xff] %v5621_v21  ;;  %v2651_v56 = vmul.f32 -1.442695, %v3065_v62  ;;  %v5683_v15 = vpop.eup %2937  ;;  %v5687_v28 = vmul.f32 %v5539_v9, %v8417_v43  ;;  %v5691_v8 = vmul.f32 %v5541_v40, %v8419_v29  ;;  %2949 = vpow2.f32 %v2648_v33  ;;  %v8421_v13 = vld [vmem:[#allocation69_spill] sm:$0xff]  ;;  %v3067_v9 = vld [vmem:[%s3336_s30 + $0xb8] sm:$0xff]  ;;  %v8425_v40 = vld [vmem:[#allocation71_spill] sm:$0xff] }
 0x1d2   : > { %8396 = vst [vmem:[#allocation128_spill] sm:$0xff] %v5625_v26  ;;  %v2652_v30 = vmul.f32 -1.442695, %v3066_v2  ;;  %v5694_v57 = vpop.eup %2939  ;;  %v5698_v31 = vmul.f32 %v5544_v17, %v8421_v13  ;;  %v5702_v41 = vmul.f32 %v5546_v52, %v8423_v16  ;;  %2951 = vpow2.f32 %v2649_v55  ;;  %v3068_v17 = vld [vmem:[%s3336_s30 + $0xc0] sm:$0xff]  ;;  %v8429_v52 = vld [vmem:[#allocation73_spill] sm:$0xff]  ;;  %v8431_v2 = vld [vmem:[#allocation74_spill] sm:$0xff] }
 0x1d3   : > { %8398 = vst [vmem:[#allocation129_spill] sm:$0xff] %v5632_v4  ;;  %v2653_v14 = vmul.f32 -1.442695, %v3067_v9  ;;  %v5705_v51 = vpop.eup %2941  ;;  %v5709_v33 = vmul.f32 %v5549_v47, %v8425_v40  ;;  %v5713_v62 = vmul.f32 %v5551_v27, %v8427_v49  ;;  %2953 = vpow2.f32 %v2650_v23  ;;  %v3069_v47 = vld [vmem:[%s3336_s30 + $0xc8] sm:$0xff]  ;;  %v8433_v23 = vld [vmem:[#allocation75_spill] sm:$0xff] }
 0x1d4   : > { %8400 = vst [vmem:[#allocation130_spill] sm:$0xff] %v5636_v42  ;;  %v2654_v43 = vmul.f32 -1.442695, %v3068_v17  ;;  %v5716_v29 = vpop.eup %2943  ;;  %v5720_v55 = vmul.f32 %v5554_v61, %v8429_v52  ;;  %v5724_v13 = vmul.f32 %v5556_v39, %v8431_v2  ;;  %2955 = vpow2.f32 %v2651_v56  ;;  %v8435_v40 = vld [vmem:[#allocation76_spill] sm:$0xff]  ;;  %v3070_v61 = vld [vmem:[%s3336_s30 + $0xd0] sm:$0xff]  ;;  %v8439_v2 = vld [vmem:[#allocation78_spill] sm:$0xff] }
 0x1d5   : > { %8402 = vst [vmem:[#allocation131_spill] sm:$0xff] %v5643_v58  ;;  %v2655_v16 = vmul.f32 -1.442695, %v3069_v47  ;;  %v5727_v27 = vpop.eup %2945  ;;  %v5731_v9 = vmul.f32 %v5561_v38, %v8433_v23  ;;  %v5735_v49 = vmul.f32 %v5563_v35, %v8435_v40  ;;  %2957 = vpow2.f32 %v2652_v30  ;;  %v8437_v56 = vld [vmem:[#allocation77_spill] sm:$0xff]  ;;  %v3071_v38 = vld [vmem:[%s3336_s30 + $0xd8] sm:$0xff]  ;;  %v3072_v30 = vld [vmem:[%s3336_s30 + $0xe0] sm:$0xff] }
 0x1d6   : > { %8404 = vst [vmem:[#allocation132_spill] sm:$0xff] %v5647_v6  ;;  %v2656_v17 = vmul.f32 -1.442695, %v3070_v61  ;;  %v5738_v39 = vpop.eup %2947  ;;  %v5742_v52 = vmul.f32 %v5568_v50, %v8437_v56  ;;  %v5746_v47 = vmul.f32 %v5570_v59, %v8439_v2  ;;  %2959 = vpow2.f32 %v2653_v14  ;;  %v3073_v61 = vld [vmem:[%s3336_s30 + $0xe8] sm:$0xff]  ;;  %v3074_v50 = vld [vmem:[%s3336_s30 + $0xf0] sm:$0xff] }
 0x1d7   : > { %8406 = vst [vmem:[#allocation133_spill] sm:$0xff] %v5654_v24  ;;  %v2657_v23 = vmul.f32 -1.442695, %v3071_v38  ;;  %v2950_v35 = vpop.eup %2949  ;;  %2961 = vpow2.f32 %v2654_v43  ;;  %v2658_v40 = vmul.f32 -1.442695, %v3072_v30  ;;  %v5757_v59 = vadd.f32 1.0, %v5566_v32 }
 0x1d8   : > { %8408 = vst [vmem:[#allocation134_spill] sm:$0xff] %v5658_v20  ;;  %2963 = vpow2.f32 %v2655_v16  ;;  %v2660_v56 = vmul.f32 -1.442695, %v3074_v50  ;;  %v5760_v43 = vadd.f32 1.0, %v5573_v18  ;;  %v5763_v2 = vadd.f32 1.0, %v5584_v5 }
 0x1d9   : > { %8410 = vst [vmem:[#allocation135_spill] sm:$0xff] %v5665_v11  ;;  %2965 = vpow2.f32 %v2656_v17  ;;  %v5767_v16 = vadd.f32 1.0, %v5595_v53  ;;  %v5773_v32 = vadd.f32 1.0, %v5617_v1  ;;  %v5776_v18 = vadd.f32 1.0, %v5628_v7 }
 0x1da   : > { %8412 = vst [vmem:[#allocation136_spill] sm:$0xff] %v5669_v37  ;;  %2967 = vpow2.f32 %v2657_v23  ;;  %v5779_v5 = vadd.f32 1.0, %v5639_v46  ;;  %v1715_v23 = vand.u32 2147483648, %v5757_v59  ;;  %v5784_v53 = vadd.f32 1.0, %v5650_v63 }
 0x1db   : > { %8414 = vst [vmem:[#allocation137_spill] sm:$0xff] %v5676_v45  ;;  %v5790_v7 = vadd.f32 1.0, %v5661_v3  ;;  %v1730_v50 = vand.u32 2147483648, %v5760_v43  ;;  %v5797_v63 = vadd.f32 1.0, %v5672_v36  ;;  %v5806_v3 = vadd.f32 1.0, %v5694_v57 }
 0x1dc   : > { %8416 = vst [vmem:[#allocation138_spill] sm:$0xff] %v5680_v25  ;;  %v5812_v36 = vadd.f32 1.0, %v5705_v51  ;;  %v5830_v51 = vadd.f32 1.0, %v5738_v39  ;;  %vm1709_vm1 = vweird.f32 %v5757_v59  ;;  %vm1724_vm3 = vweird.f32 %v5760_v43 }
 0x1dd   : > { %8418 = vst [vmem:[#allocation139_spill] sm:$0xff] %v5687_v28  ;;  %v5823_v57 = vor.u32 1.1754944e-38, %v1730_v50  ;;  %v1820_v21 = vand.u32 2147483648, %v5779_v5  ;;  %vm1739_vm9 = vweird.f32 %v5763_v2  ;;  %vm1754_vm12 = vweird.f32 %v5767_v16 }
 0x1de   : > { %8420 = vst [vmem:[#allocation141_spill] sm:$0xff] %v5691_v8 }
 0x1df   : > { %8422 = vst [vmem:[#allocation142_spill] sm:$0xff] %v5698_v31  ;;  %v5935_v12 = vor.u32 1.1754944e-38, %v1820_v21 }
 0x1e0   : > { %8424 = vst [vmem:[#allocation146_spill] sm:$0xff] %v5702_v41 }
 0x1e1   : > { %8426 = vst [vmem:[#allocation149_spill] sm:$0xff] %v5709_v33  ;;  %v1745_v33 = vand.u32 2147483648, %v5763_v2 }
 0x1e2   : > { %8428 = vst [vmem:[#allocation150_spill] sm:$0xff] %v5713_v62 }
 0x1e3   : > { %8430 = vst [vmem:[#allocation151_spill] sm:$0xff] %v5720_v55  ;;  %v5840_v50 = vor.u32 1.1754944e-38, %v1745_v33 }
 0x1e4   : > { %8432 = vst [vmem:[#allocation143_spill] sm:$0xff] %v5724_v13  ;;  %v2952_v13 = vpop.eup %2951 }
 0x1e5   : > { %8434 = vst [vmem:[#allocation145_spill] sm:$0xff] %v5731_v9  ;;  %v5752_v9 = vadd.f32 1.0, %v5559_v48  ;;  %v2954_v14 = vpop.eup %2953 }
 0x1e6   : > { %8436 = vst [vmem:[#allocation147_spill] sm:$0xff] %v5735_v49  ;;  %v2659_v49 = vmul.f32 -1.442695, %v3073_v61  ;;  %v2956_v38 = vpop.eup %2955  ;;  %v5844_v25 = vadd.f32 1.0, %v2954_v14 }
 0x1e7   : > { %8438 = vst [vmem:[#allocation153_spill] sm:$0xff] %v5742_v52  ;;  %v3075_v52 = vld [vmem:[%s3336_s30 + $0xf8] sm:$0xff]  ;;  %v1700_v48 = vand.u32 2147483648, %v5752_v9  ;;  %v2958_v17 = vpop.eup %2957  ;;  %2969 = vrcp.f32 %v5752_v9  ;;  %v5855_v11 = vadd.f32 1.0, %v2956_v38  ;;  %vm1694_vm6 = vweird.f32 %v5752_v9 }
 0x1e8   : > { %8440 = vst [vmem:[#allocation193_spill] sm:$0xff] %v5746_v47  ;;  %v2661_v55 = vmul.f32 -1.442695, %v3075_v52  ;;  %v5770_v52 = vadd.f32 1.0, %v5606_v19  ;;  %v2960_v30 = vpop.eup %2959  ;;  %2971 = vrcp.f32 %v5757_v59  ;;  %v5800_v19 = vadd.f32 1.0, %v5683_v15 }
 0x1e9   : > { %v2962_v61 = vpop.eup %2961  ;;  %v5792_v46 = vor.u32 1.1754944e-38, %v1700_v48  ;;  %2973 = vrcp.f32 %v5760_v43  ;;  %v5808_v48 = vor.u32 1.1754944e-38, %v1715_v23  ;;  %v5815_v15 = vadd.f32 1.0, %v5716_v29  ;;  %8442 = vst [vmem:[#allocation195_spill] sm:$0xff] %v5844_v25 }
 0x1ea   : > { %v2964_v47 = vpop.eup %2963  ;;  %2975 = vpow2.f32 %v2658_v40  ;;  %v1760_v40 = vand.u32 2147483648, %v5767_v16  ;;  %v5832_v29 = vadd.f32 1.0, %v2950_v35  ;;  %v1775_v23 = vand.u32 2147483648, %v5770_v52  ;;  %8443 = vst [vmem:[#allocation185_spill] sm:$0xff] %v5855_v11 }
 0x1eb   : > { %v5803_v62 = vpop.eup %2965  ;;  %2977 = vpow2.f32 %v2659_v49  ;;  %v5821_v49 = vadd.f32 1.0, %v5727_v27  ;;  %v5838_v27 = vadd.f32 1.0, %v2952_v13  ;;  %v1790_v35 = vand.u32 2147483648, %v5773_v32 }
 0x1ec   : > { %v2968_v41 = vpop.eup %2967  ;;  %2979 = vpow2.f32 %v2660_v56  ;;  %v5846_v39 = vor.u32 1.1754944e-38, %v1760_v40  ;;  %v5857_v14 = vadd.f32 1.0, %v2958_v17  ;;  %v5865_v20 = vadd.f32 1.0, %v2960_v30 }
 0x1ed   : > { %v5818_v1 = vpop.eup %2969  ;;  %2981 = vrcp.f32 %v5763_v2  ;;  %8441 = vst [vmem:[#allocation194_spill] sm:$0xff] %v5838_v27  ;;  %v5868_v24 = vor.u32 1.1754944e-38, %v1775_v23  ;;  %v5874_v45 = vadd.f32 1.0, %v2962_v61  ;;  %v5876_v6 = vadd.f32 1.0, %v2964_v47 }
 0x1ee   : > { %v5827_v56 = vpop.eup %2971  ;;  %2983 = vrcp.f32 %v5767_v16  ;;  %v1690_v13 = vmul.f32 %v5818_v1, %v5752_v9  ;;  %8444 = vst [vmem:[#allocation173_spill] sm:$0xff] %v5857_v14  ;;  %v5879_v58 = vor.u32 1.1754944e-38, %v1790_v35  ;;  %v1805_v30 = vand.u32 2147483648, %v5776_v18 }
 0x1ef   : > { %v5836_v8 = vpop.eup %2973  ;;  %2985 = vrcp.f32 %v5770_v52  ;;  %v1705_v33 = vmul.f32 %v5827_v56, %v5757_v59  ;;  %8445 = vst [vmem:[#allocation174_spill] sm:$0xff] %v5865_v20  ;;  %v5893_v44 = vadd.f32 1.0, %v5803_v62  ;;  %vm1695_vm11 = vweird.f32 %v5818_v1 }
 0x1f0   : > { %v2976_v28 = vpop.eup %2975  ;;  %2987 = vrcp.f32 %v5773_v32  ;;  %v1720_v40 = vmul.f32 %v5836_v8, %v5760_v43  ;;  %8446 = vst [vmem:[#allocation178_spill] sm:$0xff] %v5874_v45  ;;  %v1691_v23 = vsub.f32 1.0, %v1690_v13  ;;  %v5895_v13 = vadd.f32 1.0, %v2968_v41  ;;  %vm5962_vm8 = vmor %vm1694_vm6, %vm1695_vm11 }
 0x1f1   : > { %v2978_v31 = vpop.eup %2977  ;;  %2989 = vpow2.f32 %v2661_v55  ;;  %8447 = vst [vmem:[#allocation181_spill] sm:$0xff] %v5876_v6  ;;  %v1706_v4 = vsub.f32 1.0, %v1705_v33  ;;  %v5909_v62 = vor.u32 1.1754944e-38, %v1805_v30  ;;  %vm1710_vm15 = vweird.f32 %v5827_v56 }
 0x1f2   : > { %v2980_v37 = vpop.eup %2979  ;;  %2991 = vrcp.f32 %v5776_v18  ;;  %v1721_v61 = vsub.f32 1.0, %v1720_v40  ;;  %8448 = vst [vmem:[#allocation90_spill] sm:$0xff] %v5893_v44  ;;  %v5902_v40 = vadd.f32 1.0, %v2976_v28  ;;  %v5904_v60 = vadd.f32 1.0, %v2978_v31  ;;  %vm5973_vm7 = vmor %vm1709_vm1, %vm1710_vm15 }
 0x1f3   : > { %v5863_v55 = vpop.eup %2981  ;;  %2993 = vrcp.f32 %v5779_v5  ;;  %8449 = vst [vmem:[#allocation168_spill] sm:$0xff] %v5895_v13  ;;  %v5913_v0 = vadd.f32 1.0, %v2980_v37  ;;  %v1692_v54 = vmul.f32 %v5818_v1, %v1691_v23  ;;  %v1707_v38 = vmul.f32 %v5827_v56, %v1706_v4 }
 0x1f4   : > { %v5872_v17 = vpop.eup %2983  ;;  %2995 = vrcp.f32 %v5784_v53  ;;  %v1735_v47 = vmul.f32 %v5863_v55, %v5763_v2  ;;  %8450 = vst [vmem:[#allocation91_spill] sm:$0xff] %v5902_v40  ;;  %v8453_v31 = vand.u32 2147483647, %v5752_v9  ;;  %v8456_v37 = vand.u32 2147483647, %v5757_v59 }
 0x1f5   : > { %v5882_v42 = vpop.eup %2985  ;;  %2997 = vrcp.f32 %v5790_v7  ;;  %v1750_v33 = vmul.f32 %v5872_v17, %v5767_v16  ;;  %8451 = vst [vmem:[#allocation186_spill] sm:$0xff] %v5904_v60  ;;  %v1722_v4 = vmul.f32 %v5836_v8, %v1721_v61  ;;  %vm1725_vm5 = vweird.f32 %v5836_v8 }
 0x1f6   : > { %v5886_v26 = vpop.eup %2987  ;;  %v1765_v34 = vmul.f32 %v5882_v42, %v5770_v52  ;;  %8452 = vst [vmem:[#allocation92_spill] sm:$0xff] %v5913_v0  ;;  %vm5923_vm0 = vcmp.eq.f32.partialorder %v8453_v31, 8.507059e+37  ;;  %vm5929_vm4 = vcmp.eq.f32.partialorder %v8456_v37, 8.507059e+37  ;;  %v1736_v23 = vsub.f32 1.0, %v1735_v47  ;;  %vm5987_vm10 = vmor %vm1724_vm3, %vm1725_vm5 }
 0x1f7   : > { %v2990_v35 = vpop.eup %2989  ;;  %v1780_v28 = vmul.f32 %v5886_v26, %v5773_v32  ;;  %v8459_v31 = vand.u32 2147483647, %v5760_v43  ;;  %v1751_v37 = vsub.f32 1.0, %v1750_v33  ;;  %v1833_v47 = vand.u32 2147483647, %v5784_v53 }
 0x1f8   : > { %v5900_v10 = vpop.eup %2991  ;;  %v5952_v40 = vadd.f32 1.0, %v2990_v35  ;;  %v1766_v13 = vsub.f32 1.0, %v1765_v34  ;;  %v1693_v44 = vadd.f32 %v5818_v1, %v1692_v54  ;;  %v1708_v6 = vadd.f32 %v5827_v56, %v1707_v38 }
 0x1f9   : > { %v5911_v41 = vpop.eup %2993  ;;  %vm5942_vm14 = vcmp.eq.f32.partialorder %v8459_v31, 8.507059e+37  ;;  %v1795_v61 = vmul.f32 %v5900_v10, %v5776_v18  ;;  %v1781_v35 = vsub.f32 1.0, %v1780_v28  ;;  %v1835_v34 = vand.u32 2147483648, %v5784_v53 }
 0x1fa   : > { %v5937_v0 = vpop.eup %2995  ;;  %8462 = vst [vmem:[#allocation188_spill] sm:$0xff] %v5952_v40  ;;  %v1810_v31 = vmul.f32 %v5911_v41, %v5779_v5  ;;  %v1723_v9 = vadd.f32 %v5836_v8, %v1722_v4  ;;  %v1737_v40 = vmul.f32 %v5863_v55, %v1736_v23  ;;  %vm1740_vm6 = vweird.f32 %v5863_v55 }
 0x1fb   : > { %v5950_v21 = vpop.eup %2997  ;;  %v1825_v38 = vmul.f32 %v5937_v0, %v5784_v53  ;;  %v8469_v28 = vand.u32 2147483647, %v5763_v2  ;;  %v1752_v23 = vmul.f32 %v5872_v17, %v1751_v37  ;;  %vm1755_vm15 = vweird.f32 %v5872_v17 }
 0x1fc   : > { %v8472_v45 = vand.u32 2147483647, %v5767_v16  ;;  %v1796_v43 = vsub.f32 1.0, %v1795_v61  ;;  %v1840_v14 = vmul.f32 %v5950_v21, %v5790_v7  ;;  %v1767_v11 = vmul.f32 %v5882_v42, %v1766_v13 }
 0x1fd   : > { %vm5993_vm1 = vcmp.eq.f32.partialorder %v8469_v28, 8.507059e+37  ;;  %v8475_v28 = vand.u32 2147483647, %v5770_v52  ;;  %vm1785_vm2 = vweird.f32 %v5886_v26  ;;  %v1697_v61 = vsel %vm5962_vm8, %v5818_v1, %v1693_v44  ;;  %vm6040_vm8 = vmor %vm1739_vm9, %vm1740_vm6 }
 0x1fe   : > { %vm6001_vm11 = vcmp.eq.f32.partialorder %v8472_v45, 8.507059e+37  ;;  %v1811_v45 = vsub.f32 1.0, %v1810_v31  ;;  %v1712_v13 = vsel %vm5973_vm7, %v5827_v56, %v1708_v6  ;;  %v1782_v25 = vmul.f32 %v5886_v26, %v1781_v35  ;;  %vm6057_vm9 = vmor %vm1754_vm12, %vm1755_vm15 }
 0x1ff   : > { %vm6011_vm5 = vcmp.eq.f32.partialorder %v8475_v28, 8.507059e+37  ;;  %v8478_v28 = vand.u32 2147483647, %v5773_v32  ;;  %2999 = vrcp.f32 %v5797_v63  ;;  %v1727_v31 = vsel %vm5987_vm10, %v5836_v8, %v1723_v9 }
 0x200   : > { %v1738_v44 = vadd.f32 %v5863_v55, %v1737_v40  ;;  %v1826_v1 = vsub.f32 1.0, %v1825_v38  ;;  %3001 = vrcp.f32 %v5800_v19  ;;  %v1753_v56 = vadd.f32 %v5872_v17, %v1752_v23 }
 0x201   : > { %vm6026_vm3 = vcmp.eq.f32.partialorder %v8478_v28, 8.507059e+37  ;;  %v1797_v33 = vmul.f32 %v5900_v10, %v1796_v43  ;;  %v8483_v35 = vand.u32 2147483647, %v5776_v18  ;;  %v1841_v40 = vsub.f32 1.0, %v1840_v14 }
 0x202   : > { %3003 = vrcp.f32 %v5806_v3  ;;  %v1768_v54 = vadd.f32 %v5882_v42, %v1767_v11  ;;  %v1812_v9 = vmul.f32 %v5911_v41, %v1811_v45  ;;  %v8488_v38 = vand.u32 2147483647, %v5779_v5 }
 0x203   : > { %vm6048_vm10 = vcmp.eq.f32.partialorder %v8483_v35, 8.507059e+37  ;;  %v6069_v14 = vor.u32 1.1754944e-38, %v1835_v34  ;;  %v6075_v16 = vsel %vm5923_vm0, %v5792_v46, %v1697_v61  ;;  %v6080_v11 = vsel %vm5929_vm4, %v5808_v48, %v1712_v13 }
 0x204   : > { %vm6065_vm7 = vcmp.eq.f32.partialorder %v8488_v38, 8.507059e+37  ;;  %vm8491_vm12 = vweird.f32 %v5882_v42  ;;  %vm8492_vm15 = vweird.f32 %v5770_v52  ;;  %v1783_v34 = vadd.f32 %v5886_v26, %v1782_v25 }
 0x205   : > { %vm6086_vm13 = vmor %vm8492_vm15, %vm8491_vm12  ;;  %vm1800_vm6 = vweird.f32 %v5900_v10  ;;  %v6095_v46 = vsel %vm5942_vm14, %v5823_v57, %v1727_v31  ;;  %v1742_v22 = vsel %vm6040_vm8, %v5863_v55, %v1738_v44  ;;  %vm8495_vm0 = vweird.f32 %v5773_v32  ;;  %v6114_v48 = vpop.eup %2999 }
 0x206   : > { %vm6104_vm4 = vmor %vm8495_vm0, %vm1785_vm2  ;;  %vm1815_vm12 = vweird.f32 %v5911_v41  ;;  %v1827_v25 = vmul.f32 %v5937_v0, %v1826_v1  ;;  %vm6110_vm15 = vcmp.eq.f32.partialorder %v1833_v47, 8.507059e+37  ;;  %v1757_v57 = vsel %vm6057_vm9, %v5872_v17, %v1753_v56  ;;  %v6122_v30 = vpop.eup %3001 }
 0x207   : > { %v1798_v32 = vadd.f32 %v5900_v10, %v1797_v33  ;;  %v1842_v55 = vmul.f32 %v5950_v21, %v1841_v40  ;;  %3005 = vrcp.f32 %v5812_v36  ;;  %v1772_v47 = vsel %vm6086_vm13, %v5882_v42, %v1768_v54 }
 0x208   : > { %vm8500_vm14 = vweird.f32 %v5776_v18  ;;  %v1813_v17 = vadd.f32 %v5911_v41, %v1812_v9  ;;  %vm1830_vm8 = vweird.f32 %v5937_v0  ;;  %3007 = vrcp.f32 %v5815_v15  ;;  %v6136_v45 = vpop.eup %3003 }
 0x209   : > { %vm6129_vm2 = vmor %vm8500_vm14, %vm1800_vm6  ;;  %v1787_v61 = vsel %vm6104_vm4, %v5886_v26, %v1783_v34  ;;  %vm8503_vm13 = vweird.f32 %v5779_v5  ;;  %vm1845_vm6 = vweird.f32 %v5950_v21  ;;  %v1848_v18 = vand.u32 2147483647, %v5790_v7 }
 0x20a   : > { %vm6145_vm9 = vmor %vm8503_vm13, %vm1815_vm12  ;;  %v1850_v13 = vand.u32 2147483648, %v5790_v7  ;;  %v6155_v28 = vsel %vm5993_vm1, %v5840_v50, %v1742_v22  ;;  %v6160_v26 = vsel %vm6001_vm11, %v5846_v39, %v1757_v57  ;;  %v1828_v5 = vadd.f32 %v5937_v0, %v1827_v25 }
 0x20b   : > { %v1855_v31 = vmul.f32 %v6114_v48, %v5797_v63  ;;  %v6168_v44 = vsel %vm6011_vm5, %v5868_v24, %v1772_v47  ;;  %v1802_v50 = vsel %vm6129_vm2, %v5900_v10, %v1798_v32  ;;  %vm8506_vm1 = vweird.f32 %v5784_v53 }
 0x20c   : > { %vm6175_vm0 = vmor %vm8506_vm1, %vm1830_vm8  ;;  %v1843_v39 = vadd.f32 %v5950_v21, %v1842_v55  ;;  %v1870_v4 = vmul.f32 %v6122_v30, %v5800_v19  ;;  %v6185_v24 = vsel %vm6026_vm3, %v5879_v58, %v1787_v61  ;;  %v1817_v10 = vsel %vm6145_vm9, %v5911_v41, %v1813_v17 }
 0x20d   : > { %vm8509_vm11 = vweird.f32 %v5790_v7  ;;  %v1885_v37 = vmul.f32 %v6136_v45, %v5806_v3  ;;  %3009 = vrcp.f32 %v5821_v49  ;;  %v6199_v1 = vpop.eup %3005  ;;  %vm6201_vm4 = vcmp.eq.f32.partialorder %v1848_v18, 8.507059e+37 }
 0x20e   : > { %vm6192_vm5 = vmor %vm8509_vm11, %vm1845_vm6  ;;  %v1851_v27 = vor.u32 1.1754944e-38, %v1850_v13  ;;  %vm1859_vm3 = vweird.f32 %v5797_v63  ;;  %v1865_v7 = vand.u32 2147483648, %v5797_v63  ;;  %v6207_v41 = vpop.eup %3007  ;;  %v6212_v6 = vsel %vm6048_vm10, %v5909_v62, %v1802_v50 }
 0x20f   : > { %v1832_v56 = vsel %vm6175_vm0, %v5937_v0, %v1828_v5  ;;  %v1856_v33 = vsub.f32 1.0, %v1855_v31  ;;  %v1863_v35 = vand.u32 2147483647, %v5797_v63  ;;  %v6221_v40 = vsel %vm6065_vm7, %v5935_v12, %v1817_v10 }
 0x210   : > { %v1847_v2 = vsel %vm6192_vm5, %v5950_v21, %v1843_v39  ;;  %v1871_v54 = vsub.f32 1.0, %v1870_v4  ;;  %vm1874_vm10 = vweird.f32 %v5800_v19  ;;  %v1880_v62 = vand.u32 2147483648, %v5800_v19  ;;  %v8544_v4 = vld [vmem:[#allocation174_spill] sm:$0xff] }
 0x211   : > { %v1886_v8 = vsub.f32 1.0, %v1885_v37  ;;  %v1900_v0 = vmul.f32 %v6199_v1, %v5812_v36  ;;  %3011 = vrcp.f32 %v5830_v51  ;;  %v6234_v12 = vsel %vm6110_vm15, %v6069_v14, %v1832_v56  ;;  %v8526_v37 = vld [vmem:[#allocation194_spill] sm:$0xff] }
 0x212   : > { %v6236_v9 = vor.u32 1.1754944e-38, %v1865_v7  ;;  %v1878_v21 = vand.u32 2147483647, %v5800_v19  ;;  %v1915_v38 = vmul.f32 %v6207_v41, %v5815_v15  ;;  %v6245_v23 = vsel %vm6201_vm4, %v1851_v27, %v1847_v2 }
 0x213   : > { %v6241_v59 = vpop.eup %3009  ;;  %v1857_v34 = vmul.f32 %v6114_v48, %v1856_v33  ;;  %vm1860_vm7 = vweird.f32 %v6114_v48  ;;  %vm1889_vm12 = vweird.f32 %v5806_v3  ;;  %vm6250_vm15 = vcmp.eq.f32.partialorder %v1863_v35, 8.507059e+37 }
 0x214   : > { %v1872_v22 = vmul.f32 %v6122_v30, %v1871_v54  ;;  %v1893_v52 = vand.u32 2147483647, %v5806_v3  ;;  %v1895_v25 = vand.u32 2147483648, %v5806_v3  ;;  %v1910_v60 = vand.u32 2147483648, %v5812_v36  ;;  %vm6278_vm9 = vmor %vm1859_vm3, %vm1860_vm7 }
 0x215   : > { %v1881_v57 = vor.u32 1.1754944e-38, %v1880_v62  ;;  %v1887_v32 = vmul.f32 %v6136_v45, %v1886_v8  ;;  %v1901_v55 = vsub.f32 1.0, %v1900_v0  ;;  %v1908_v47 = vand.u32 2147483647, %v5812_v36  ;;  %v8531_v62 = vld [vmem:[#allocation195_spill] sm:$0xff] }
 0x216   : > { %vm1875_vm14 = vweird.f32 %v6122_v30  ;;  %vm6261_vm2 = vcmp.eq.f32.partialorder %v1878_v21, 8.507059e+37  ;;  %v1916_v17 = vsub.f32 1.0, %v1915_v38  ;;  %v1923_v61 = vand.u32 2147483647, %v5815_v15  ;;  %v8532_v38 = vld [vmem:[#allocation185_spill] sm:$0xff] }
 0x217   : > { %v1930_v42 = vmul.f32 %v6241_v59, %v5821_v49  ;;  %v6268_v18 = vpop.eup %3011  ;;  %v1858_v13 = vadd.f32 %v6114_v48, %v1857_v34  ;;  %vm1890_vm8 = vweird.f32 %v6136_v45  ;;  %vm1904_vm13 = vweird.f32 %v5812_v36  ;;  %vm6291_vm1 = vmor %vm1874_vm10, %vm1875_vm14 }
 0x218   : > { %3013 = vrcp.f32 %v5832_v29  ;;  %v1873_v31 = vadd.f32 %v6122_v30, %v1872_v22  ;;  %vm6283_vm6 = vcmp.eq.f32.partialorder %v1893_v52, 8.507059e+37  ;;  %v1896_v20 = vor.u32 1.1754944e-38, %v1895_v25  ;;  %vm6305_vm5 = vmor %vm1889_vm12, %vm1890_vm8  ;;  %v8535_v25 = vld [vmem:[#allocation173_spill] sm:$0xff] }
 0x219   : > { %v1911_v39 = vor.u32 1.1754944e-38, %v1910_v60  ;;  %v1888_v63 = vadd.f32 %v6136_v45, %v1887_v32  ;;  %v1902_v10 = vmul.f32 %v6199_v1, %v1901_v55  ;;  %vm6297_vm0 = vcmp.eq.f32.partialorder %v1908_v47, 8.507059e+37 }
 0x21a   : > { %vm1919_vm11 = vweird.f32 %v5815_v15  ;;  %3015 = vrcp.f32 %v8526_v37  ;;  %v1917_v58 = vmul.f32 %v6207_v41, %v1916_v17  ;;  %vm6310_vm4 = vcmp.eq.f32.partialorder %v1923_v61, 8.507059e+37 }
 0x21b   : > { %v1931_v7 = vsub.f32 1.0, %v1930_v42  ;;  %v1945_v56 = vmul.f32 %v6268_v18, %v5830_v51  ;;  %v1862_v33 = vsel %vm6278_vm9, %v6114_v48, %v1858_v13  ;;  %vm1905_vm3 = vweird.f32 %v6199_v1 }
 0x21c   : > { %v1925_v3 = vand.u32 2147483648, %v5815_v15  ;;  %v1938_v35 = vand.u32 2147483647, %v5821_v49  ;;  %v1877_v2 = vsel %vm6291_vm1, %v6122_v30, %v1873_v31  ;;  %vm1920_vm10 = vweird.f32 %v6207_v41  ;;  %vm6338_vm7 = vmor %vm1904_vm13, %vm1905_vm3 }
 0x21d   : > { %v1940_v54 = vand.u32 2147483648, %v5821_v49  ;;  %3017 = vrcp.f32 %v8531_v62  ;;  %v1892_v48 = vsel %vm6305_vm5, %v6136_v45, %v1888_v63  ;;  %v1903_v0 = vadd.f32 %v6199_v1, %v1902_v10  ;;  %vm6356_vm12 = vmor %vm1919_vm11, %vm1920_vm10 }
 0x21e   : > { %v6328_v8 = vpop.eup %3013  ;;  %v1953_v21 = vand.u32 2147483647, %v5830_v51  ;;  %3019 = vrcp.f32 %v8532_v38  ;;  %v1918_v34 = vadd.f32 %v6207_v41, %v1917_v58  ;;  %v1932_v22 = vmul.f32 %v6241_v59, %v1931_v7 }
 0x21f   : > { %v1946_v52 = vsub.f32 1.0, %v1945_v56  ;;  %3021 = vrcp.f32 %v8535_v25  ;;  %v6350_v60 = vsel %vm6250_vm15, %v6236_v9, %v1862_v33  ;;  %v1926_v32 = vor.u32 1.1754944e-38, %v1925_v3 }
 0x220   : > { %v6345_v45 = vpop.eup %3015  ;;  %vm1934_vm14 = vweird.f32 %v5821_v49  ;;  %v1955_v55 = vand.u32 2147483648, %v5830_v51  ;;  %vm1935_vm8 = vweird.f32 %v6241_v59  ;;  %vm6363_vm13 = vcmp.eq.f32.partialorder %v1938_v35, 8.507059e+37 }
 0x221   : > { %vm1949_vm15 = vweird.f32 %v5830_v51  ;;  %v1960_v15 = vmul.f32 %v6328_v8, %v5832_v29  ;;  %v6372_v9 = vsel %vm6261_vm2, %v1881_v57, %v1877_v2  ;;  %v6376_v14 = vsel %vm6283_vm6, %v1896_v20, %v1892_v48  ;;  %vm6400_vm9 = vmor %vm1934_vm14, %vm1935_vm8 }
 0x222   : > { %v1907_v17 = vsel %vm6338_vm7, %v6199_v1, %v1903_v0  ;;  %v1941_v61 = vor.u32 1.1754944e-38, %v1940_v54  ;;  %v1922_v13 = vsel %vm6356_vm12, %v6207_v41, %v1918_v34  ;;  %v1933_v5 = vadd.f32 %v6241_v59, %v1932_v22 }
 0x223   : > { %v6381_v42 = vpop.eup %3017  ;;  %v1947_v57 = vmul.f32 %v6268_v18, %v1946_v52  ;;  %vm6388_vm2 = vcmp.eq.f32.partialorder %v1953_v21, 8.507059e+37  ;;  %v1975_v31 = vmul.f32 %v6345_v45, %v8526_v37  ;;  %v1956_v41 = vor.u32 1.1754944e-38, %v1955_v55 }
 0x224   : > { %v6394_v50 = vpop.eup %3019  ;;  %vm1964_vm6 = vweird.f32 %v5832_v29  ;;  %v1970_v20 = vand.u32 2147483648, %v5832_v29  ;;  %3023 = vrcp.f32 %v8544_v4  ;;  %v6411_v10 = vsel %vm6297_vm0, %v1911_v39, %v1907_v17 }
 0x225   : > { %v6407_v63 = vpop.eup %3021  ;;  %vm1950_vm1 = vweird.f32 %v6268_v18  ;;  %v1961_v49 = vsub.f32 1.0, %v1960_v15  ;;  %v1968_v19 = vand.u32 2147483647, %v5832_v29  ;;  %v6417_v58 = vsel %vm6310_vm4, %v1926_v32, %v1922_v13  ;;  %v8552_v13 = vld [vmem:[#allocation181_spill] sm:$0xff] }
 0x226   : > { %v1983_v7 = vand.u32 2147483647, %v8526_v37  ;;  %v1985_v56 = vand.u32 2147483648, %v8526_v37  ;;  %v2000_v33 = vand.u32 2147483648, %v8531_v62  ;;  %v1937_v39 = vsel %vm6400_vm9, %v6241_v59, %v1933_v5  ;;  %vm6430_vm0 = vmor %vm1949_vm15, %vm1950_vm1  ;;  %v8547_v59 = vld [vmem:[#allocation178_spill] sm:$0xff] }
 0x227   : > { %v1948_v53 = vadd.f32 %v6268_v18, %v1947_v57  ;;  %v1976_v3 = vsub.f32 1.0, %v1975_v31  ;;  %v1990_v35 = vmul.f32 %v6381_v42, %v8531_v62  ;;  %v1971_v2 = vor.u32 1.1754944e-38, %v1970_v20  ;;  %v8572_v20 = vld [vmem:[#allocation186_spill] sm:$0xff] }
 0x228   : > { %v2005_v54 = vmul.f32 %v6394_v50, %v8532_v38  ;;  %v2020_v48 = vmul.f32 %v6407_v63, %v8535_v25  ;;  %3025 = vrcp.f32 %v8547_v59  ;;  %v1962_v0 = vmul.f32 %v6328_v8, %v1961_v49 }
 0x229   : > { %vm6440_vm11 = vcmp.eq.f32.partialorder %v1968_v19, 8.507059e+37  ;;  %vm1979_vm5 = vweird.f32 %v8526_v37  ;;  %vm1994_vm4 = vweird.f32 %v8531_v62  ;;  %v1998_v51 = vand.u32 2147483647, %v8531_v62 }
 0x22a   : > { %v6447_v30 = vpop.eup %3023  ;;  %v6451_v34 = vsel %vm6363_vm13, %v1941_v61, %v1937_v39  ;;  %vm1965_vm3 = vweird.f32 %v6328_v8  ;;  %v1986_v22 = vor.u32 1.1754944e-38, %v1985_v56  ;;  %v6454_v52 = vor.u32 1.1754944e-38, %v2000_v33 }
 0x22b   : > { %v1952_v36 = vsel %vm6430_vm0, %v6268_v18, %v1948_v53  ;;  %v1977_v32 = vmul.f32 %v6345_v45, %v1976_v3  ;;  %vm6460_vm10 = vcmp.eq.f32.partialorder %v1983_v7, 8.507059e+37  ;;  %v1991_v15 = vsub.f32 1.0, %v1990_v35  ;;  %vm6482_vm14 = vmor %vm1964_vm6, %vm1965_vm3  ;;  %v8557_v7 = vld [vmem:[#allocation90_spill] sm:$0xff] }
 0x22c   : > { %vm2009_vm7 = vweird.f32 %v8532_v38  ;;  %v2006_v47 = vsub.f32 1.0, %v2005_v54  ;;  %v2015_v17 = vand.u32 2147483648, %v8532_v38  ;;  %v2021_v61 = vsub.f32 1.0, %v2020_v48 }
 0x22d   : > { %3027 = vrcp.f32 %v8552_v13  ;;  %v1963_v5 = vadd.f32 %v6328_v8, %v1962_v0  ;;  %vm1980_vm12 = vweird.f32 %v6345_v45  ;;  %v2013_v18 = vand.u32 2147483647, %v8532_v38  ;;  %v8564_v0 = vld [vmem:[#allocation168_spill] sm:$0xff] }
 0x22e   : > { %v2035_v57 = vmul.f32 %v6447_v30, %v8544_v4  ;;  %v6472_v31 = vpop.eup %3025  ;;  %v6476_v1 = vsel %vm6388_vm2, %v1956_v41, %v1952_v36  ;;  %vm1995_vm8 = vweird.f32 %v6381_v42  ;;  %vm2024_vm13 = vweird.f32 %v8535_v25  ;;  %vm6499_vm2 = vmor %vm1979_vm5, %vm1980_vm12 }
 0x22f   : > { %v2028_v49 = vand.u32 2147483647, %v8535_v25  ;;  %v1978_v19 = vadd.f32 %v6345_v45, %v1977_v32  ;;  %v1992_v43 = vmul.f32 %v6381_v42, %v1991_v15  ;;  %vm6491_vm15 = vcmp.eq.f32.partialorder %v1998_v51, 8.507059e+37  ;;  %vm6533_vm3 = vmor %vm1994_vm4, %vm1995_vm8 }
 0x230   : > { %v2030_v29 = vand.u32 2147483648, %v8535_v25  ;;  %3029 = vrcp.f32 %v8557_v7  ;;  %v2007_v33 = vmul.f32 %v6394_v50, %v2006_v47  ;;  %v2016_v39 = vor.u32 1.1754944e-38, %v2015_v17 }
 0x231   : > { %v2022_v53 = vmul.f32 %v6407_v63, %v2021_v61  ;;  %vm2039_vm9 = vweird.f32 %v8544_v4  ;;  %v1967_v3 = vsel %vm6482_vm14, %v6328_v8, %v1963_v5  ;;  %vm2010_vm6 = vweird.f32 %v6394_v50  ;;  %v8569_v5 = vld [vmem:[#allocation91_spill] sm:$0xff] }
 0x232   : > { %vm6510_vm1 = vcmp.eq.f32.partialorder %v2013_v18, 8.507059e+37  ;;  %v2036_v37 = vsub.f32 1.0, %v2035_v57  ;;  %v2050_v27 = vmul.f32 %v6472_v31, %v8547_v59  ;;  %vm2025_vm0 = vweird.f32 %v6407_v63  ;;  %vm6547_vm12 = vmor %vm2009_vm7, %vm2010_vm6 }
 0x233   : > { %v6516_v54 = vpop.eup %3027  ;;  %vm6519_vm5 = vcmp.eq.f32.partialorder %v2028_v49, 8.507059e+37  ;;  %v2043_v8 = vand.u32 2147483647, %v8544_v4  ;;  %3031 = vrcp.f32 %v8564_v0  ;;  %v1982_v51 = vsel %vm6499_vm2, %v6345_v45, %v1978_v19 }
 0x234   : > { %v1993_v36 = vadd.f32 %v6381_v42, %v1992_v43  ;;  %v2031_v15 = vor.u32 1.1754944e-38, %v2030_v29  ;;  %v2045_v47 = vand.u32 2147483648, %v8544_v4  ;;  %v6540_v17 = vsel %vm6440_vm11, %v1971_v2, %v1967_v3  ;;  %vm6559_vm11 = vmor %vm2024_vm13, %vm2025_vm0  ;;  %v8575_v3 = vld [vmem:[#allocation92_spill] sm:$0xff] }
 0x235   : > { %v2008_v61 = vadd.f32 %v6394_v50, %v2007_v33  ;;  %v2023_v62 = vadd.f32 %v6407_v63, %v2022_v53  ;;  %3033 = vrcp.f32 %v8569_v5  ;;  %v2037_v38 = vmul.f32 %v6447_v30, %v2036_v37 }
 0x236   : > { %v6553_v18 = vpop.eup %3029  ;;  %v2051_v21 = vsub.f32 1.0, %v2050_v27  ;;  %v2065_v57 = vmul.f32 %v6516_v54, %v8552_v13  ;;  %3035 = vrcp.f32 %v8572_v20  ;;  %v6569_v49 = vsel %vm6460_vm10, %v1986_v22, %v1982_v51 }
 0x237   : > { %vm6571_vm4 = vcmp.eq.f32.partialorder %v2043_v8, 8.507059e+37  ;;  %vm2054_vm7 = vweird.f32 %v8547_v59  ;;  %v2058_v25 = vand.u32 2147483647, %v8547_v59  ;;  %v1997_v43 = vsel %vm6533_vm3, %v6381_v42, %v1993_v36  ;;  %v8576_v8 = vld [vmem:[#allocation188_spill] sm:$0xff] }
 0x238   : > { %vm2040_vm14 = vweird.f32 %v6447_v30  ;;  %v2046_v29 = vor.u32 1.1754944e-38, %v2045_v47  ;;  %v2060_v56 = vand.u32 2147483648, %v8547_v59  ;;  %v2012_v22 = vsel %vm6547_vm12, %v6394_v50, %v2008_v61 }
 0x239   : > { %v6582_v55 = vpop.eup %3031  ;;  %v2027_v33 = vsel %vm6559_vm11, %v6407_v63, %v2023_v62  ;;  %v2080_v53 = vmul.f32 %v6553_v18, %v8557_v7  ;;  %3037 = vrcp.f32 %v8575_v3  ;;  %v2038_v42 = vadd.f32 %v6447_v30, %v2037_v38  ;;  %vm6605_vm10 = vmor %vm2039_vm9, %vm2040_vm14 }
 0x23a   : > { %v2052_v37 = vmul.f32 %v6472_v31, %v2051_v21  ;;  %v2066_v27 = vsub.f32 1.0, %v2065_v57  ;;  %3039 = vrcp.f32 %v8576_v8  ;;  %v6601_v50 = vsel %vm6491_vm15, %v6454_v52, %v1997_v43 }
 0x23b   : > { %v6596_v51 = vpop.eup %3033  ;;  %vm6609_vm8 = vcmp.eq.f32.partialorder %v2058_v25, 8.507059e+37  ;;  %v2073_v32 = vand.u32 2147483647, %v8552_v13  ;;  %v2075_v47 = vand.u32 2147483648, %v8552_v13  ;;  %vm2055_vm13 = vweird.f32 %v6472_v31 }
 0x23c   : > { %v6615_v61 = vpop.eup %3035  ;;  %v2061_v52 = vor.u32 1.1754944e-38, %v2060_v56  ;;  %vm2069_vm15 = vweird.f32 %v8552_v13  ;;  %v2095_v4 = vmul.f32 %v6582_v55, %v8564_v0  ;;  %v6623_v41 = vsel %vm6510_vm1, %v2016_v39, %v2012_v22  ;;  %vm6641_vm2 = vmor %vm2054_vm7, %vm2055_vm13 }
 0x23d   : > { %v6627_v45 = vsel %vm6519_vm5, %v2031_v15, %v2027_v33  ;;  %v2081_v62 = vsub.f32 1.0, %v2080_v53  ;;  %v2088_v2 = vand.u32 2147483647, %v8557_v7  ;;  %v2042_v38 = vsel %vm6605_vm10, %v6447_v30, %v2038_v42 }
 0x23e   : > { %v2053_v21 = vadd.f32 %v6472_v31, %v2052_v37  ;;  %v2067_v57 = vmul.f32 %v6516_v54, %v2066_v27  ;;  %v2110_v35 = vmul.f32 %v6596_v51, %v8569_v5  ;;  %vm6645_vm9 = vcmp.eq.f32.partialorder %v2073_v32, 8.507059e+37 }
 0x23f   : > { %v6637_v39 = vpop.eup %3037  ;;  %v2076_v30 = vor.u32 1.1754944e-38, %v2075_v47  ;;  %vm2084_vm6 = vweird.f32 %v8557_v7  ;;  %v2125_v25 = vmul.f32 %v6615_v61, %v8572_v20  ;;  %vm2070_vm1 = vweird.f32 %v6516_v54 }
 0x240   : > { %v6652_v43 = vpop.eup %3039  ;;  %v2090_v59 = vand.u32 2147483648, %v8557_v7  ;;  %v2096_v56 = vsub.f32 1.0, %v2095_v4  ;;  %v2103_v22 = vand.u32 2147483647, %v8564_v0  ;;  %v6659_v33 = vsel %vm6571_vm4, %v2046_v29, %v2042_v38  ;;  %vm6676_vm3 = vmor %vm2069_vm15, %vm2070_vm1 }
 0x241   : > { %v2082_v53 = vmul.f32 %v6553_v18, %v2081_v62  ;;  %vm2099_vm0 = vweird.f32 %v8564_v0  ;;  %v2105_v42 = vand.u32 2147483648, %v8564_v0  ;;  %v2057_v37 = vsel %vm6641_vm2, %v6472_v31, %v2053_v21 }
 0x242   : > { %v2068_v27 = vadd.f32 %v6516_v54, %v2067_v57  ;;  %vm6668_vm5 = vcmp.eq.f32.partialorder %v2088_v2, 8.507059e+37  ;;  %v2111_v32 = vsub.f32 1.0, %v2110_v35  ;;  %v2140_v19 = vmul.f32 %v6637_v39, %v8575_v3 }
 0x243   : > { %vm2085_vm12 = vweird.f32 %v6553_v18  ;;  %v2118_v31 = vand.u32 2147483647, %v8569_v5  ;;  %v2126_v47 = vsub.f32 1.0, %v2125_v25  ;;  %v2155_v4 = vmul.f32 %v6652_v43, %v8576_v8 }
 0x244   : > { %v2091_v62 = vor.u32 1.1754944e-38, %v2090_v59  ;;  %v2097_v2 = vmul.f32 %v6582_v55, %v2096_v56  ;;  %vm6685_vm11 = vcmp.eq.f32.partialorder %v2103_v22, 8.507059e+37  ;;  %v2120_v13 = vand.u32 2147483648, %v8569_v5  ;;  %vm6701_vm7 = vmor %vm2084_vm6, %vm2085_vm12 }
 0x245   : > { %v6692_v21 = vsel %vm6609_vm8, %v2061_v52, %v2057_v37  ;;  %v2083_v57 = vadd.f32 %v6553_v18, %v2082_v53  ;;  %v2106_v35 = vor.u32 1.1754944e-38, %v2105_v42  ;;  %vm2114_vm4 = vweird.f32 %v8569_v5  ;;  %v3091_v5 = vld [vmem:[%s3336_s30 + $0x78] sm:$0xff] }
 0x246   : > { %v2072_v48 = vsel %vm6676_vm3, %v6516_v54, %v2068_v27  ;;  %vm2100_vm14 = vweird.f32 %v6582_v55  ;;  %v2112_v36 = vmul.f32 %v6596_v51, %v2111_v32  ;;  %v2141_v52 = vsub.f32 1.0, %v2140_v19  ;;  %v3079_v27 = vld [vmem:[%s3336_s30 + $0x18] sm:$0xff] }
 0x247   : > { %vm6707_vm10 = vcmp.eq.f32.partialorder %v2118_v31, 8.507059e+37  ;;  %v2127_v56 = vmul.f32 %v6615_v61, %v2126_v47  ;;  %v2133_v22 = vand.u32 2147483647, %v8572_v20  ;;  %v2156_v54 = vsub.f32 1.0, %v2155_v4  ;;  %vm6725_vm15 = vmor %vm2099_vm0, %vm2100_vm14 }
 0x248   : > { %v2098_v7 = vadd.f32 %v6582_v55, %v2097_v2  ;;  %vm2115_vm8 = vweird.f32 %v6596_v51  ;;  %v2121_v53 = vor.u32 1.1754944e-38, %v2120_v13  ;;  %vm2129_vm13 = vweird.f32 %v8572_v20 }
 0x249   : > { %v6718_v42 = vsel %vm6645_vm9, %v2076_v30, %v2072_v48  ;;  %v2087_v37 = vsel %vm6701_vm7, %v6553_v18, %v2083_v57  ;;  %vm2130_vm2 = vweird.f32 %v6615_v61  ;;  %v2135_v32 = vand.u32 2147483648, %v8572_v20  ;;  %vm6741_vm9 = vmor %vm2114_vm4, %vm2115_vm8 }
 0x24a   : > { %v2113_v15 = vadd.f32 %v6596_v51, %v2112_v36  ;;  %v2142_v30 = vmul.f32 %v6637_v39, %v2141_v52  ;;  %v2148_v19 = vand.u32 2147483647, %v8575_v3  ;;  %v2150_v18 = vand.u32 2147483648, %v8575_v3  ;;  %vm6757_vm1 = vmor %vm2129_vm13, %vm2130_vm2  ;;  %v3076_v52 = vld [vmem:[%s3336_s30] sm:$0xff]  ;;  %v3099_v36 = vld [vmem:[%s3336_s30 + $0xb8] sm:$0xff] }
 0x24b   : > { %v2128_v29 = vadd.f32 %v6615_v61, %v2127_v56  ;;  %vm6746_vm6 = vcmp.eq.f32.partialorder %v2133_v22, 8.507059e+37  ;;  %v2157_v47 = vmul.f32 %v6652_v43, %v2156_v54  ;;  %v2163_v4 = vand.u32 2147483647, %v8576_v8  ;;  %v3077_v56 = vld [vmem:[%s3336_s30 + $0x8] sm:$0xff]  ;;  %v3078_v54 = vld [vmem:[%s3336_s30 + $0x10] sm:$0xff] }
 0x24c   : > { %v2102_v2 = vsel %vm6725_vm15, %v6582_v55, %v2098_v7  ;;  %vm2144_vm0 = vweird.f32 %v8575_v3  ;;  %vm2145_vm3 = vweird.f32 %v6637_v39  ;;  %v2165_v13 = vand.u32 2147483648, %v8576_v8 }
 0x24d   : > { %v6766_v57 = vsel %vm6668_vm5, %v2091_v62, %v2087_v37  ;;  %v2136_v48 = vor.u32 1.1754944e-38, %v2135_v32  ;;  %vm2159_vm12 = vweird.f32 %v8576_v8  ;;  %vm2160_vm4 = vweird.f32 %v6652_v43  ;;  %vm6785_vm5 = vmor %vm2144_vm0, %vm2145_vm3 }
 0x24e   : > { %v2117_v20 = vsel %vm6741_vm9, %v6596_v51, %v2113_v15  ;;  %v2143_v55 = vadd.f32 %v6637_v39, %v2142_v30  ;;  %vm6774_vm7 = vcmp.eq.f32.partialorder %v2148_v19, 8.507059e+37  ;;  %v2151_v63 = vor.u32 1.1754944e-38, %v2150_v18  ;;  %vm6794_vm8 = vmor %vm2159_vm12, %vm2160_vm4  ;;  %v3083_v30 = vld [vmem:[%s3336_s30 + $0x38] sm:$0xff]  ;;  %v3084_v18 = vld [vmem:[%s3336_s30 + $0x40] sm:$0xff] }
 0x24f   : > { %v6780_v62 = vsel %vm6685_vm11, %v2106_v35, %v2102_v2  ;;  %v2132_v8 = vsel %vm6757_vm1, %v6615_v61, %v2128_v29  ;;  %v2158_v51 = vadd.f32 %v6652_v43, %v2157_v47  ;;  %vm6790_vm14 = vcmp.eq.f32.partialorder %v2163_v4, 8.507059e+37  ;;  %v3088_v47 = vld [vmem:[%s3336_s30 + $0x60] sm:$0xff]  ;;  %v3089_v4 = vld [vmem:[%s3336_s30 + $0x68] sm:$0xff]  ;;  %v3090_v2 = vld [vmem:[%s3336_s30 + $0x70] sm:$0xff] }
 0x250   : > { %v2166_v35 = vor.u32 1.1754944e-38, %v2165_v13  ;;  %v6800_v61 = vmul.f32 %v3076_v52, %v6075_v16  ;;  %v6804_v22 = vmul.f32 %v3077_v56, %v6080_v11  ;;  %v6808_v7 = vmul.f32 %v3078_v54, %v6095_v46  ;;  %v3080_v16 = vld [vmem:[%s3336_s30 + $0x20] sm:$0xff]  ;;  %v3081_v11 = vld [vmem:[%s3336_s30 + $0x28] sm:$0xff]  ;;  %v3102_v56 = vld [vmem:[%s3336_s30 + $0xd0] sm:$0xff] }
 0x251   : > { %v2122_v37 = vsel %vm6707_vm10, %v2121_v53, %v2117_v20  ;;  %v6814_v32 = vmul.f32 %v3079_v27, %v6155_v28  ;;  %v6818_v15 = vmul.f32 %v3080_v16, %v6160_v26  ;;  %v6822_v46 = vmul.f32 %v3081_v11, %v6168_v44  ;;  %v3082_v53 = vld [vmem:[%s3336_s30 + $0x30] sm:$0xff]  ;;  %v3101_v52 = vld [vmem:[%s3336_s30 + $0xc8] sm:$0xff]  ;;  %v3103_v54 = vld [vmem:[%s3336_s30 + $0xd8] sm:$0xff] }
 0x252   : > { %8611 = vst [vmem:[#allocation94_spill] sm:$0xff] %v6800_v61  ;;  %v2137_v59 = vsel %vm6746_vm6, %v2136_v48, %v2132_v8  ;;  %v2147_v28 = vsel %vm6785_vm5, %v6637_v39, %v2143_v55  ;;  %v6833_v26 = vmul.f32 %v3082_v53, %v6185_v24  ;;  %v6837_v44 = vmul.f32 %v3083_v30, %v6212_v6  ;;  %v3085_v39 = vld [vmem:[%s3336_s30 + $0x48] sm:$0xff]  ;;  %v3086_v24 = vld [vmem:[%s3336_s30 + $0x50] sm:$0xff]  ;;  %v3087_v6 = vld [vmem:[%s3336_s30 + $0x58] sm:$0xff] }
 0x253   : > { %8612 = vst [vmem:[#allocation189_spill] sm:$0xff] %v6804_v22  ;;  %v2162_v19 = vsel %vm6794_vm8, %v6652_v43, %v2158_v51  ;;  %v6844_v0 = vmul.f32 %v3084_v18, %v6221_v40  ;;  %v6848_v29 = vmul.f32 %v3085_v39, %v6234_v12  ;;  %v6852_v31 = vmul.f32 %v3086_v24, %v6245_v23  ;;  %v3094_v55 = vld [vmem:[%s3336_s30 + $0x90] sm:$0xff]  ;;  %v3105_v11 = vld [vmem:[%s3336_s30 + $0xe8] sm:$0xff]  ;;  %v8706_v22 = vld [vmem:[#allocation38_spill] sm:$0xff] }
 0x254   : > { %8613 = vst [vmem:[#allocation191_spill] sm:$0xff] %v6808_v7  ;;  %v6858_v43 = vmul.f32 %v3087_v6, %v6350_v60  ;;  %v6862_v40 = vmul.f32 %v3088_v47, %v6372_v9  ;;  %v6866_v12 = vmul.f32 %v3089_v4, %v6376_v14  ;;  %v6870_v23 = vmul.f32 %v3090_v2, %v6411_v10  ;;  %v3092_v9 = vld [vmem:[%s3336_s30 + $0x80] sm:$0xff]  ;;  %v3093_v14 = vld [vmem:[%s3336_s30 + $0x88] sm:$0xff]  ;;  %v3098_v51 = vld [vmem:[%s3336_s30 + $0xb0] sm:$0xff] }
 0x255   : > { %8614 = vst [vmem:[#allocation192_spill] sm:$0xff] %v6814_v32  ;;  %v2152_v60 = vsel %vm6774_vm7, %v2151_v63, %v2147_v28  ;;  %v6876_v13 = vmul.f32 %v3091_v5, %v6417_v58  ;;  %v6880_v48 = vmul.f32 %v3092_v9, %v6451_v34  ;;  %v6884_v20 = vmul.f32 %v3093_v14, %v6476_v1  ;;  %v3095_v58 = vld [vmem:[%s3336_s30 + $0x98] sm:$0xff]  ;;  %v3096_v34 = vld [vmem:[%s3336_s30 + $0xa0] sm:$0xff]  ;;  %v3097_v1 = vld [vmem:[%s3336_s30 + $0xa8] sm:$0xff] }
 0x256   : > { %8615 = vst [vmem:[#allocation95_spill] sm:$0xff] %v6818_v15  ;;  %v2167_v10 = vsel %vm6790_vm14, %v2166_v35, %v2162_v19  ;;  %v6890_v3 = vmul.f32 %v3094_v55, %v6540_v17  ;;  %v6894_v63 = vmul.f32 %v3095_v58, %v6569_v49  ;;  %v6898_v8 = vmul.f32 %v3096_v34, %v6601_v50  ;;  %v3100_v50 = vld [vmem:[%s3336_s30 + $0xc0] sm:$0xff]  ;;  %v8645_v39 = vld [vmem:[#allocation12_spill] sm:$0xff]  ;;  %v8650_v2 = vld [vmem:[#allocation14_spill] sm:$0xff] }
 0x257   : > { %8616 = vst [vmem:[#allocation169_spill] sm:$0xff] %v6822_v46  ;;  %v6903_v25 = vmul.f32 %v3097_v1, %v6623_v41  ;;  %v6907_v17 = vmul.f32 %v3098_v51, %v6627_v45  ;;  %v6911_v49 = vmul.f32 %v3099_v36, %v6659_v33  ;;  %v2202_v38 = vstv %s2201_s5  ;;  %v3104_v33 = vld [vmem:[%s3336_s30 + $0xe0] sm:$0xff]  ;;  %v8654_v55 = vld [vmem:[#allocation16_spill] sm:$0xff]  ;;  %v8656_v1 = vld [vmem:[#allocation17_spill] sm:$0xff] }
 0x258   : > { %8617 = vst [vmem:[#allocation96_spill] sm:$0xff] %v6833_v26  ;;  %v6915_v35 = vmul.f32 %v3100_v50, %v6692_v21  ;;  %v6919_v41 = vmul.f32 %v3101_v52, %v6718_v42  ;;  %v6923_v45 = vmul.f32 %v3102_v56, %v6766_v57  ;;  %v6927_v27 = vmul.f32 %v3103_v54, %v6780_v62  ;;  %v3106_v21 = vld [vmem:[%s3336_s30 + $0xf0] sm:$0xff]  ;;  %v3107_v42 = vld [vmem:[%s3336_s30 + $0xf8] sm:$0xff]  ;;  %v8643_v19 = vld [vmem:[#allocation11_spill] sm:$0xff]  ;;  %s3170_s30 = scalar_lea.hbm %s7641_s2, 512 }
 0x259   : > { %8618 = vst [vmem:[#allocation170_spill] sm:$0xff] %v6837_v44  ;;  %v6930_v16 = vmul.f32 %v3104_v33, %v2122_v37  ;;  %v6933_v28 = vmul.f32 %v3105_v11, %v2137_v59  ;;  %v6936_v53 = vmul.f32 %v3106_v21, %v2152_v60  ;;  %v6939_v30 = vmul.f32 %v3107_v42, %v2167_v10  ;;  %v8648_v59 = vld [vmem:[#allocation13_spill] sm:$0xff]  ;;  %v8652_v9 = vld [vmem:[#allocation15_spill] sm:$0xff]  ;;  %v8658_v50 = vld [vmem:[#allocation18_spill] sm:$0xff]  ;;  %p3172_p1 = scmp.lt.s32.totalorder %s3170_s30, %s3166_s26 }
 0x25a   : > { %8619 = vst [vmem:[#allocation97_spill] sm:$0xff] %v6844_v0  ;;  %v8644_v18 = vmax.f32 %v8643_v19, 0.0  ;;  %v8646_v24 = vmax.f32 %v8645_v39, 0.0  ;;  %v6949_v6 = vstv %s2235_s6  ;;  %v6952_v37 = vstv %s6824_s4  ;;  %v8660_v54 = vld [vmem:[#allocation19_spill] sm:$0xff]  ;;  %v8662_v21 = vld [vmem:[#allocation20_spill] sm:$0xff]  ;;  %v8703_v32 = vld [vmem:[#allocation37_spill] sm:$0xff] }
 0x25b   : > { %8620 = vst [vmem:[#allocation98_spill] sm:$0xff] %v6848_v29  ;;  %v8649_v47 = vmax.f32 %v8648_v59, 0.0  ;;  %v8651_v60 = vmax.f32 %v8650_v2, 0.0  ;;  %v8653_v14 = vmax.f32 %v8652_v9, 0.0  ;;  %v8655_v58 = vmax.f32 %v8654_v55, 0.0  ;;  %v8694_v29 = vld [vmem:[#allocation34_spill] sm:$0xff]  ;;  %p3173_p3 = por %p3172_p1, %p3171_p0 }
 0x25c   : > { %8621 = vst [vmem:[#allocation171_spill] sm:$0xff] %v6852_v31  ;;  %v6943_v57 = vmul.f32 %v2202_v38, %v8644_v18  ;;  %v6947_v62 = vmul.f32 %v2202_v38, %v8646_v24  ;;  %v8657_v51 = vmax.f32 %v8656_v1, 0.0  ;;  %v8659_v52 = vmax.f32 %v8658_v50, 0.0  ;;  %v8664_v24 = vld [vmem:[#allocation21_spill] sm:$0xff]  ;;  %v8697_v44 = vld [vmem:[#allocation35_spill] sm:$0xff]  ;;  %v8700_v46 = vld [vmem:[#allocation36_spill] sm:$0xff] }
 0x25d   : > { %8622 = vst [vmem:[#allocation99_spill] sm:$0xff] %v6858_v43  ;;  %v6956_v4 = vmul.f32 %v2202_v38, %v8649_v47  ;;  %v6960_v5 = vmul.f32 %v2202_v38, %v8651_v60  ;;  %v6964_v10 = vmul.f32 %v2202_v38, %v8653_v14  ;;  %v6968_v34 = vmul.f32 %v2202_v38, %v8655_v58  ;;  %v8666_v14 = vld [vmem:[#allocation22_spill] sm:$0xff]  ;;  %v8691_v43 = vld [vmem:[#allocation33_spill] sm:$0xff]  ;;  %p3174_p4 = pnand %p3173_p3, %p3169_p13 }
 0x25e   : > { %8623 = vst [vmem:[#allocation172_spill] sm:$0xff] %v6862_v40  ;;  %v6972_v36 = vmul.f32 %v2202_v38, %v8657_v51  ;;  %v6976_v56 = vmul.f32 %v2202_v38, %v8659_v52  ;;  %v8661_v33 = vmax.f32 %v8660_v54, 0.0  ;;  %v8663_v42 = vmax.f32 %v8662_v21, 0.0 }
 0x25f   : > { %8624 = vst [vmem:[#allocation175_spill] sm:$0xff] %v6866_v12  ;;  %v8665_v47 = vmax.f32 %v8664_v24, 0.0  ;;  %v8667_v58 = vmax.f32 %v8666_v14, 0.0  ;;  %v8688_v12 = vld [vmem:[#allocation32_spill] sm:$0xff]  ;;  %v8692_v31 = vmax.f32 %v8691_v43, 0.0  ;;  %v8695_v0 = vmax.f32 %v8694_v29, 0.0 }
 0x260   : > { %8625 = vst [vmem:[#allocation176_spill] sm:$0xff] %v6870_v23  ;;  %v6980_v11 = vmul.f32 %v2202_v38, %v8661_v33  ;;  %v6984_v18 = vmul.f32 %v2202_v38, %v8663_v42  ;;  %v8689_v40 = vmax.f32 %v8688_v12, 0.0  ;;  %v8698_v26 = vmax.f32 %v8697_v44, 0.0 }
 0x261   : > { %8626 = vst [vmem:[#allocation100_spill] sm:$0xff] %v6876_v13  ;;  %v6988_v60 = vmul.f32 %v2202_v38, %v8665_v47  ;;  %v6992_v51 = vmul.f32 %v2202_v38, %v8667_v58  ;;  %v8685_v13 = vld [vmem:[#allocation31_spill] sm:$0xff]  ;;  %v8701_v15 = vmax.f32 %v8700_v46, 0.0  ;;  %v8704_v7 = vmax.f32 %v8703_v32, 0.0 }
 0x262   : > { %8627 = vst [vmem:[#allocation101_spill] sm:$0xff] %v6880_v48  ;;  %v8686_v23 = vmax.f32 %v8685_v13, 0.0  ;;  %v8707_v61 = vmax.f32 %v8706_v22, 0.0 }
 0x263   : > { %8628 = vst [vmem:[#allocation177_spill] sm:$0xff] %v6884_v20  ;;  %v8682_v20 = vld [vmem:[#allocation30_spill] sm:$0xff] }
 0x264   : > { %8629 = vst [vmem:[#allocation179_spill] sm:$0xff] %v6890_v3  ;;  %v8683_v48 = vmax.f32 %v8682_v20, 0.0 }
 0x265   : > { %8630 = vst [vmem:[#allocation102_spill] sm:$0xff] %v6894_v63  ;;  %v8680_v63 = vld [vmem:[#allocation29_spill] sm:$0xff] }
 0x266   : > { %8631 = vst [vmem:[#allocation103_spill] sm:$0xff] %v6898_v8  ;;  %v8681_v3 = vmax.f32 %v8680_v63, 0.0 }
 0x267   : > { %8632 = vst [vmem:[#allocation180_spill] sm:$0xff] %v6903_v25  ;;  %v8678_v25 = vld [vmem:[#allocation28_spill] sm:$0xff] }
 0x268   : > { %8633 = vst [vmem:[#allocation182_spill] sm:$0xff] %v6907_v17  ;;  %v8679_v8 = vmax.f32 %v8678_v25, 0.0 }
 0x269   : > { %8634 = vst [vmem:[#allocation104_spill] sm:$0xff] %v6911_v49  ;;  %v8676_v49 = vld [vmem:[#allocation27_spill] sm:$0xff] }
 0x26a   : > { %8635 = vst [vmem:[#allocation183_spill] sm:$0xff] %v6915_v35  ;;  %v8677_v17 = vmax.f32 %v8676_v49, 0.0 }
 0x26b   : > { %8636 = vst [vmem:[#allocation105_spill] sm:$0xff] %v6919_v41  ;;  %v8674_v41 = vld [vmem:[#allocation26_spill] sm:$0xff] }
 0x26c   : > { %8637 = vst [vmem:[#allocation184_spill] sm:$0xff] %v6923_v45  ;;  %v8675_v35 = vmax.f32 %v8674_v41, 0.0  ;;  %v7012_v58 = vmul.f32 %v2202_v38, %v8677_v17  ;;  %v7032_v17 = vmul.f32 %v2202_v38, %v8689_v40  ;;  %v7052_v40 = vmul.f32 %v2202_v38, %v8704_v7 }
 0x26d   : > { %8638 = vst [vmem:[#allocation187_spill] sm:$0xff] %v6927_v27  ;;  %v8672_v27 = vld [vmem:[#allocation25_spill] sm:$0xff] }
 0x26e   : > { %8639 = vst [vmem:[#allocation106_spill] sm:$0xff] %v6930_v16  ;;  %v8673_v45 = vmax.f32 %v8672_v27, 0.0  ;;  %v7008_v47 = vmul.f32 %v2202_v38, %v8675_v35  ;;  %v7028_v35 = vmul.f32 %v2202_v38, %v8686_v23  ;;  %v7048_v23 = vmul.f32 %v2202_v38, %v8701_v15 }
 0x26f   : > { %8640 = vst [vmem:[#allocation190_spill] sm:$0xff] %v6933_v28  ;;  %v8670_v28 = vld [vmem:[#allocation24_spill] sm:$0xff] }
 0x270   : > { %8641 = vst [vmem:[#allocation199_spill] sm:$0xff] %v6936_v53  ;;  %v8671_v16 = vmax.f32 %v8670_v28, 0.0  ;;  %v7004_v42 = vmul.f32 %v2202_v38, %v8673_v45  ;;  %v7024_v45 = vmul.f32 %v2202_v38, %v8683_v48  ;;  %v7044_v48 = vmul.f32 %v2202_v38, %v8698_v26 }
 0x271   : > { %8642 = vst [vmem:[#allocation200_spill] sm:$0xff] %v6939_v30  ;;  %v8668_v30 = vld [vmem:[#allocation23_spill] sm:$0xff] }
 0x272   : > { %8647 = vst [vmem:[#allocation107_spill] sm:$0xff] %v6952_v37  ;;  %v8669_v53 = vmax.f32 %v8668_v30, 0.0  ;;  %v7000_v33 = vmul.f32 %v2202_v38, %v8671_v16  ;;  %v7020_v16 = vmul.f32 %v2202_v38, %v8681_v3  ;;  %v7040_v3 = vmul.f32 %v2202_v38, %v8695_v0  ;;  %v8709_v37 = vld [vmem:[#allocation39_spill] sm:$0xff] }
 0x273   : > { %8684 = vst [vmem:[#allocation201_spill] sm:$0xff] %v7024_v45 }
 0x274   : > { %v6996_v52 = vmul.f32 %v2202_v38, %v8669_v53  ;;  %v7016_v53 = vmul.f32 %v2202_v38, %v8679_v8  ;;  %8687 = vst [vmem:[#allocation108_spill] sm:$0xff] %v7028_v35  ;;  %v7036_v8 = vmul.f32 %v2202_v38, %v8692_v31  ;;  %v7056_v31 = vmul.f32 %v2202_v38, %v8707_v61 }
 0x275   : > { %8690 = vst [vmem:[#allocation109_spill] sm:$0xff] %v7032_v17 }
 0x276   : > { %8693 = vst [vmem:[#allocation89_spill] sm:$0xff] %v7036_v8  ;;  %v8710_v8 = vmax.f32 %v8709_v37, 0.0 }
 0x277   : > { %8696 = vst [vmem:[#allocation110_spill] sm:$0xff] %v7040_v3  ;;  %v8712_v3 = vld [vmem:[#allocation40_spill] sm:$0xff] }
 0x278   : > { %8699 = vst [vmem:[#allocation111_spill] sm:$0xff] %v7044_v48  ;;  %v7060_v0 = vmul.f32 %v2202_v38, %v8710_v8  ;;  %v8713_v17 = vmax.f32 %v8712_v3, 0.0  ;;  %v8715_v48 = vld [vmem:[#allocation41_spill] sm:$0xff] }
 0x279   : > { %8702 = vst [vmem:[#allocation112_spill] sm:$0xff] %v7048_v23  ;;  %v8716_v35 = vmax.f32 %v8715_v48, 0.0  ;;  %v8718_v23 = vld [vmem:[#allocation42_spill] sm:$0xff] }
 0x27a   : > { %8705 = vst [vmem:[#allocation113_spill] sm:$0xff] %v7052_v40  ;;  %v7064_v26 = vmul.f32 %v2202_v38, %v8713_v17  ;;  %v8719_v45 = vmax.f32 %v8718_v23, 0.0  ;;  %v8720_v40 = vmin.f32 %v8643_v19, 0.0  ;;  %v8725_v19 = vmin.f32 %v8654_v55, 0.0 }
 0x27b   : > { %8708 = vst [vmem:[#allocation114_spill] sm:$0xff] %v7056_v31  ;;  %v7068_v15 = vmul.f32 %v2202_v38, %v8716_v35  ;;  %v8721_v31 = vmin.f32 %v8645_v39, 0.0  ;;  %v8726_v39 = vmin.f32 %v8656_v1, 0.0  ;;  %v8730_v55 = vmin.f32 %v8664_v24, 0.0 }
 0x27c   : > { %8711 = vst [vmem:[#allocation115_spill] sm:$0xff] %v7060_v0  ;;  %v7072_v7 = vmul.f32 %v2202_v38, %v8719_v45  ;;  %v2237_v61 = vmul.f32 %v6949_v6, %v8720_v40  ;;  %v8722_v0 = vmin.f32 %v8648_v59, 0.0  ;;  %v2242_v45 = vmul.f32 %v6949_v6, %v8725_v19 }
 0x27d   : > { %8714 = vst [vmem:[#allocation116_spill] sm:$0xff] %v7064_v26  ;;  %v2238_v8 = vmul.f32 %v6949_v6, %v8721_v31  ;;  %v8723_v26 = vmin.f32 %v8650_v2, 0.0  ;;  %v2243_v40 = vmul.f32 %v6949_v6, %v8726_v39  ;;  %v8727_v59 = vmin.f32 %v8658_v50, 0.0 }
 0x27e   : > { %8717 = vst [vmem:[#allocation117_spill] sm:$0xff] %v7068_v15  ;;  %v2239_v17 = vmul.f32 %v6949_v6, %v8722_v0  ;;  %v8724_v15 = vmin.f32 %v8652_v9, 0.0  ;;  %v8728_v2 = vmin.f32 %v8660_v54, 0.0  ;;  %v8729_v9 = vmin.f32 %v8662_v21, 0.0 }
 0x27f   : > { %v2240_v35 = vmul.f32 %v6949_v6, %v8723_v26  ;;  %v2244_v31 = vmul.f32 %v6949_v6, %v8727_v59  ;;  %v8731_v1 = vmin.f32 %v8666_v14, 0.0  ;;  %v8732_v50 = vmin.f32 %v8668_v30, 0.0 }
 0x280   : > { %v2241_v38 = vmul.f32 %v6949_v6, %v8724_v15  ;;  %v2245_v0 = vmul.f32 %v6949_v6, %v8728_v2  ;;  %v2246_v26 = vmul.f32 %v6949_v6, %v8729_v9  ;;  %v2247_v15 = vmul.f32 %v6949_v6, %v8730_v55 }
 0x281   : > { %v2248_v19 = vmul.f32 %v6949_v6, %v8731_v1  ;;  %v2249_v39 = vmul.f32 %v6949_v6, %v8732_v50  ;;  %v8733_v54 = vmin.f32 %v8670_v28, 0.0  ;;  %v8734_v21 = vmin.f32 %v8672_v27, 0.0 }
 0x282   : > { %v8735_v24 = vmin.f32 %v8674_v41, 0.0  ;;  %v8736_v14 = vmin.f32 %v8676_v49, 0.0  ;;  %v8737_v30 = vmin.f32 %v8678_v25, 0.0  ;;  %v8738_v28 = vmin.f32 %v8680_v63, 0.0 }
 0x283   : > { %v2250_v59 = vmul.f32 %v6949_v6, %v8733_v54  ;;  %v2251_v2 = vmul.f32 %v6949_v6, %v8734_v21  ;;  %v8739_v27 = vmin.f32 %v8682_v20, 0.0  ;;  %v8740_v41 = vmin.f32 %v8685_v13, 0.0 }
 0x284   : > { %v2252_v9 = vmul.f32 %v6949_v6, %v8735_v24  ;;  %v2253_v55 = vmul.f32 %v6949_v6, %v8736_v14  ;;  %v2254_v1 = vmul.f32 %v6949_v6, %v8737_v30  ;;  %v2255_v50 = vmul.f32 %v6949_v6, %v8738_v28 }
 0x285   : > { %v2256_v54 = vmul.f32 %v6949_v6, %v8739_v27  ;;  %v2257_v21 = vmul.f32 %v6949_v6, %v8740_v41  ;;  %v8741_v49 = vmin.f32 %v8688_v12, 0.0  ;;  %v8742_v25 = vmin.f32 %v8691_v43, 0.0 }
 0x286   : > { %v8743_v63 = vmin.f32 %v8694_v29, 0.0  ;;  %v8744_v20 = vmin.f32 %v8697_v44, 0.0  ;;  %v8745_v13 = vmin.f32 %v8700_v46, 0.0  ;;  %v8746_v12 = vmin.f32 %v8703_v32, 0.0 }
 0x287   : > { %v2258_v24 = vmul.f32 %v6949_v6, %v8741_v49  ;;  %v2259_v14 = vmul.f32 %v6949_v6, %v8742_v25  ;;  %v8747_v43 = vmin.f32 %v8706_v22, 0.0  ;;  %v8748_v29 = vmin.f32 %v8709_v37, 0.0 }
 0x288   : > { %v2260_v30 = vmul.f32 %v6949_v6, %v8743_v63  ;;  %v2261_v28 = vmul.f32 %v6949_v6, %v8744_v20  ;;  %v2262_v27 = vmul.f32 %v6949_v6, %v8745_v13  ;;  %v2263_v41 = vmul.f32 %v6949_v6, %v8746_v12 }
 0x289   : > { %v2264_v49 = vmul.f32 %v6949_v6, %v8747_v43  ;;  %v2265_v25 = vmul.f32 %v6949_v6, %v8748_v29  ;;  %v8749_v44 = vmin.f32 %v8712_v3, 0.0  ;;  %v8750_v46 = vmin.f32 %v8715_v48, 0.0  ;;  %v8781_v29 = vld [vmem:[#allocation80_spill] sm:$0xff] }
 0x28a   : > { %v8751_v32 = vmin.f32 %v8718_v23, 0.0  ;;  %v7171_v22 = vadd.f32 %v2237_v61, %v6943_v57  ;;  %v7174_v12 = vadd.f32 %v2238_v8, %v6947_v62  ;;  %v7177_v37 = vadd.f32 %v2239_v17, %v6956_v4 }
 0x28b   : > { %v2266_v63 = vmul.f32 %v6949_v6, %v8749_v44  ;;  %v2267_v20 = vmul.f32 %v6949_v6, %v8750_v46  ;;  %v7180_v3 = vadd.f32 %v2240_v35, %v6960_v5  ;;  %v7183_v48 = vadd.f32 %v2241_v38, %v6964_v10 }
 0x28c   : > { %v2268_v13 = vmul.f32 %v6949_v6, %v8751_v32  ;;  %v7186_v43 = vadd.f32 %v2242_v45, %v6968_v34  ;;  %v7189_v6 = vadd.f32 %v2243_v40, %v6972_v36  ;;  %v7192_v57 = vadd.f32 %v2244_v31, %v6976_v56  ;;  %v8764_v40 = vld [vmem:[#allocation113_spill] sm:$0xff] }
 0x28d   : > { %v7195_v62 = vadd.f32 %v2245_v0, %v6980_v11  ;;  %v7198_v4 = vadd.f32 %v2246_v26, %v6984_v18  ;;  %v7201_v5 = vadd.f32 %v2247_v15, %v6988_v60  ;;  %v7204_v10 = vadd.f32 %v2248_v19, %v6992_v51  ;;  %v8766_v0 = vld [vmem:[#allocation114_spill] sm:$0xff]  ;;  %v8768_v15 = vld [vmem:[#allocation115_spill] sm:$0xff] }
 0x28e   : > { %v7207_v34 = vadd.f32 %v2249_v39, %v6996_v52  ;;  %v7210_v36 = vadd.f32 %v2250_v59, %v7000_v33  ;;  %v7213_v56 = vadd.f32 %v2251_v2, %v7004_v42  ;;  %v7216_v11 = vadd.f32 %v2252_v9, %v7008_v47  ;;  %v8752_v52 = vld [vmem:[#allocation201_spill] sm:$0xff]  ;;  %v8753_v33 = vld [vmem:[#allocation108_spill] sm:$0xff] }
 0x28f   : > { %v7219_v18 = vadd.f32 %v2253_v55, %v7012_v58  ;;  %v7222_v60 = vadd.f32 %v2254_v1, %v7016_v53  ;;  %v7225_v51 = vadd.f32 %v2255_v50, %v7020_v16  ;;  %v7228_v23 = vadd.f32 %v2256_v54, %v8752_v52  ;;  %v8754_v42 = vld [vmem:[#allocation109_spill] sm:$0xff]  ;;  %v8758_v58 = vld [vmem:[#allocation110_spill] sm:$0xff]  ;;  %v8760_v53 = vld [vmem:[#allocation111_spill] sm:$0xff] }
 0x290   : > { %v7231_v61 = vadd.f32 %v2257_v21, %v8753_v33  ;;  %v7234_v8 = vadd.f32 %v2258_v24, %v8754_v42  ;;  %v8756_v47 = vld [vmem:[#allocation89_spill] sm:$0xff]  ;;  %v7240_v35 = vadd.f32 %v2260_v30, %v8758_v58  ;;  %v7243_v38 = vadd.f32 %v2261_v28, %v8760_v53  ;;  %v8762_v16 = vld [vmem:[#allocation112_spill] sm:$0xff]  ;;  %v8775_v1 = vld [vmem:[#allocation107_spill] sm:$0xff] }
 0x291   : > { %v7237_v17 = vadd.f32 %v2259_v14, %v8756_v47  ;;  %v7246_v45 = vadd.f32 %v2262_v27, %v8762_v16  ;;  %v7249_v31 = vadd.f32 %v2263_v41, %v8764_v40  ;;  %v7252_v26 = vadd.f32 %v2264_v49, %v8766_v0  ;;  %v8770_v39 = vld [vmem:[#allocation116_spill] sm:$0xff]  ;;  %v8772_v2 = vld [vmem:[#allocation117_spill] sm:$0xff]  ;;  %v8776_v50 = vld [vmem:[#allocation43_spill] sm:$0xff] }
 0x292   : > { %8755 = vst [vmem:[#allocation118_spill] sm:$0xff] %v7234_v8  ;;  %v7255_v19 = vadd.f32 %v2265_v25, %v8768_v15  ;;  %v7258_v59 = vadd.f32 %v2266_v63, %v8770_v39  ;;  %v7261_v9 = vadd.f32 %v2267_v20, %v8772_v2  ;;  %v7264_v55 = vadd.f32 %v2268_v13, %v7072_v7  ;;  %v8777_v21 = vld [vmem:[#allocation44_spill] sm:$0xff]  ;;  %v8778_v14 = vld [vmem:[#allocation45_spill] sm:$0xff]  ;;  %v8779_v28 = vld [vmem:[#allocation46_spill] sm:$0xff] }
 0x293   : > { %8757 = vst [vmem:[#allocation119_spill] sm:$0xff] %v7237_v17  ;;  %v2302_v54 = vmul.f32 %v8776_v50, %v8775_v1  ;;  %v2303_v24 = vmul.f32 %v8777_v21, %v8775_v1  ;;  %v2304_v30 = vmul.f32 %v8778_v14, %v8775_v1  ;;  %v2305_v27 = vmul.f32 %v8779_v28, %v8775_v1  ;;  %v8780_v41 = vld [vmem:[#allocation79_spill] sm:$0xff]  ;;  %v8782_v7 = vld [vmem:[#allocation81_spill] sm:$0xff]  ;;  %v8783_v63 = vld [vmem:[#allocation82_spill] sm:$0xff] }
 0x294   : > { %8759 = vst [vmem:[#allocation159_spill] sm:$0xff] %v7240_v35  ;;  %v2306_v49 = vmul.f32 %v8780_v41, %v8775_v1  ;;  %v2307_v25 = vmul.f32 %v8781_v29, %v8775_v1  ;;  %v2308_v44 = vmul.f32 %v8782_v7, %v8775_v1  ;;  %v2309_v46 = vmul.f32 %v8783_v63, %v8775_v1  ;;  %v8784_v20 = vld [vmem:[#allocation83_spill] sm:$0xff]  ;;  %v8785_v13 = vld [vmem:[#allocation84_spill] sm:$0xff]  ;;  %v8786_v33 = vld [vmem:[#allocation85_spill] sm:$0xff] }
 0x295   : > { %8761 = vst [vmem:[#allocation161_spill] sm:$0xff] %v7243_v38  ;;  %v2310_v32 = vmul.f32 %v8784_v20, %v8775_v1  ;;  %v2311_v52 = vmul.f32 %v8785_v13, %v8775_v1  ;;  %v2312_v42 = vmul.f32 %v8786_v33, %v8775_v1  ;;  %v8787_v47 = vld [vmem:[#allocation86_spill] sm:$0xff]  ;;  %v8788_v53 = vld [vmem:[#allocation87_spill] sm:$0xff]  ;;  %v8789_v40 = vld [vmem:[#allocation88_spill] sm:$0xff]  ;;  %v2335_v38 = vadd.f32 %v2303_v24, %v7174_v12 }
 0x296   : > { %8763 = vst [vmem:[#allocation163_spill] sm:$0xff] %v7246_v45  ;;  %v2313_v58 = vmul.f32 %v8787_v47, %v8775_v1  ;;  %v2314_v16 = vmul.f32 %v8788_v53, %v8775_v1  ;;  %v2315_v0 = vmul.f32 %v8789_v40, %v8775_v1  ;;  %v8790_v15 = vld [vmem:[#allocation140_spill] sm:$0xff]  ;;  %v8794_v29 = vld [vmem:[#allocation154_spill] sm:$0xff]  ;;  %v8795_v63 = vld [vmem:[#allocation155_spill] sm:$0xff]  ;;  %v2338_v35 = vadd.f32 %v2306_v49, %v7183_v48 }
 0x297   : > { %8765 = vst [vmem:[#allocation47_spill] sm:$0xff] %v7249_v31  ;;  %v2316_v39 = vmul.f32 %v8790_v15, %v8775_v1  ;;  %v8791_v2 = vld [vmem:[#allocation144_spill] sm:$0xff]  ;;  %v2320_v7 = vmul.f32 %v8794_v29, %v8775_v1  ;;  %v2321_v20 = vmul.f32 %v8795_v63, %v8775_v1  ;;  %v8797_v47 = vld [vmem:[#allocation157_spill] sm:$0xff]  ;;  %v8798_v40 = vld [vmem:[#allocation158_spill] sm:$0xff]  ;;  %v2340_v17 = vadd.f32 %v2308_v44, %v7189_v6 }
 0x298   : > { %8767 = vst [vmem:[#allocation48_spill] sm:$0xff] %v7252_v26  ;;  %v2317_v50 = vmul.f32 %v8791_v2, %v8775_v1  ;;  %v8792_v21 = vld [vmem:[#allocation148_spill] sm:$0xff]  ;;  %v2323_v53 = vmul.f32 %v8797_v47, %v8775_v1  ;;  %v2324_v15 = vmul.f32 %v8798_v40, %v8775_v1  ;;  %v8802_v63 = vld [vmem:[#allocation165_spill] sm:$0xff]  ;;  %v8804_v47 = vld [vmem:[#allocation167_spill] sm:$0xff]  ;;  %v2341_v8 = vadd.f32 %v2309_v46, %v7192_v57 }
 0x299   : > { %8769 = vst [vmem:[#allocation49_spill] sm:$0xff] %v7255_v19  ;;  %v2318_v14 = vmul.f32 %v8792_v21, %v8775_v1  ;;  %v8793_v28 = vld [vmem:[#allocation152_spill] sm:$0xff]  ;;  %v2330_v26 = vmul.f32 %v8804_v47, %v8775_v1  ;;  %v2337_v47 = vadd.f32 %v2305_v27, %v7180_v3  ;;  %v7350_v12 = vadd.f32 %v2313_v58, %v7204_v10  ;;  %v8818_v58 = vld [vmem:[#allocation122_spill] sm:$0xff] }
 0x29a   : > { %8771 = vst [vmem:[#allocation50_spill] sm:$0xff] %v7258_v59  ;;  %v2319_v41 = vmul.f32 %v8793_v28, %v8775_v1  ;;  %v8796_v13 = vld [vmem:[#allocation156_spill] sm:$0xff]  ;;  %v8800_v28 = vld [vmem:[#allocation162_spill] sm:$0xff]  ;;  %v2328_v59 = vmul.f32 %v8802_v63, %v8775_v1  ;;  %v2334_v63 = vadd.f32 %v2302_v54, %v7171_v22  ;;  %v7347_v22 = vadd.f32 %v2312_v42, %v7201_v5 }
 0x29b   : > { %8773 = vst [vmem:[#allocation51_spill] sm:$0xff] %v7261_v9  ;;  %v2322_v33 = vmul.f32 %v8796_v13, %v8775_v1  ;;  %v8799_v2 = vld [vmem:[#allocation160_spill] sm:$0xff]  ;;  %v8803_v13 = vld [vmem:[#allocation166_spill] sm:$0xff]  ;;  %v7356_v3 = vstv %s7286_s7  ;;  %v7359_v48 = vadd.f32 %v2315_v0, %v7210_v36  ;;  %v7365_v6 = vadd.f32 %v2317_v50, %v7216_v11 }
 0x29c   : > { %8774 = vst [vmem:[#allocation52_spill] sm:$0xff] %v7264_v55  ;;  %v2325_v21 = vmul.f32 %v8799_v2, %v8775_v1  ;;  %v2326_v55 = vmul.f32 %v8800_v28, %v8775_v1  ;;  %v8801_v29 = vld [vmem:[#allocation164_spill] sm:$0xff]  ;;  %v2329_v19 = vmul.f32 %v8803_v13, %v8775_v1  ;;  %v8806_v2 = vld [vmem:[#allocation197_spill] sm:$0xff]  ;;  %v2336_v13 = vadd.f32 %v2304_v30, %v7177_v37 }
 0x29d   : > { %v2327_v9 = vmul.f32 %v8801_v29, %v8775_v1  ;;  %v8805_v40 = vld [vmem:[#allocation196_spill] sm:$0xff]  ;;  %v2332_v28 = vmul.f32 %v8806_v2, %v8775_v1  ;;  %v8807_v29 = vld [vmem:[#allocation198_spill] sm:$0xff]  ;;  %v2342_v2 = vadd.f32 %v2310_v32, %v7195_v62  ;;  %v7353_v37 = vadd.f32 %v2314_v16, %v7207_v34 }
 0x29e   : > { %v2331_v31 = vmul.f32 %v8805_v40, %v8775_v1  ;;  %v2333_v45 = vmul.f32 %v8807_v29, %v8775_v1  ;;  %v2339_v40 = vadd.f32 %v2307_v25, %v7186_v43  ;;  %v7344_v1 = vadd.f32 %v2311_v52, %v7198_v4  ;;  %v8808_v34 = vld [vmem:[#allocation118_spill] sm:$0xff]  ;;  %v8815_v25 = vld [vmem:[#allocation121_spill] sm:$0xff]  ;;  %v8816_v46 = vld [vmem:[#allocation47_spill] sm:$0xff] }
 0x29f   : > { %v7362_v43 = vadd.f32 %v2316_v39, %v7213_v56  ;;  %v7368_v57 = vadd.f32 %v2318_v14, %v7219_v18  ;;  %v7371_v62 = vadd.f32 %v2319_v41, %v7222_v60  ;;  %v7374_v4 = vadd.f32 %v2320_v7, %v7225_v51  ;;  %v8809_v56 = vld [vmem:[#allocation119_spill] sm:$0xff]  ;;  %v8810_v18 = vld [vmem:[#allocation93_spill] sm:$0xff]  ;;  %v8811_v60 = vld [vmem:[#allocation120_spill] sm:$0xff] }
 0x2a0   : > { %v7377_v5 = vadd.f32 %v2321_v20, %v7228_v23  ;;  %v7380_v10 = vadd.f32 %v2322_v33, %v7231_v61  ;;  %v7383_v36 = vadd.f32 %v2323_v53, %v8808_v34  ;;  %v7386_v11 = vadd.f32 %v2324_v15, %v8809_v56  ;;  %v8812_v51 = vld [vmem:[#allocation159_spill] sm:$0xff]  ;;  %v8813_v23 = vld [vmem:[#allocation161_spill] sm:$0xff]  ;;  %v8817_v52 = vld [vmem:[#allocation48_spill] sm:$0xff] }
 0x2a1   : > { %v2367_v54 = vmul.f32 %v7356_v3, %v8810_v18  ;;  %v2368_v24 = vmul.f32 %v7356_v3, %v8811_v60  ;;  %v7393_v30 = vadd.f32 %v2325_v21, %v8812_v51  ;;  %v7396_v27 = vadd.f32 %v2326_v55, %v8813_v23  ;;  %v8814_v61 = vld [vmem:[#allocation163_spill] sm:$0xff]  ;;  %v8819_v39 = vld [vmem:[#allocation49_spill] sm:$0xff]  ;;  %v8820_v50 = vld [vmem:[#allocation50_spill] sm:$0xff] }
 0x2a2   : > { %v7399_v49 = vadd.f32 %v2327_v9, %v8814_v61  ;;  %v2369_v44 = vmul.f32 %v7356_v3, %v8815_v25  ;;  %v7404_v32 = vadd.f32 %v2328_v59, %v8816_v46  ;;  %v7407_v42 = vadd.f32 %v2329_v19, %v8817_v52  ;;  %v8821_v14 = vld [vmem:[#allocation51_spill] sm:$0xff]  ;;  %v8823_v20 = vld [vmem:[#allocation124_spill] sm:$0xff]  ;;  %v8824_v33 = vld [vmem:[#allocation125_spill] sm:$0xff] }
 0x2a3   : > { %v2370_v16 = vmul.f32 %v7356_v3, %v8818_v58  ;;  %v7412_v0 = vstv %s7328_s8  ;;  %v7415_v55 = vadd.f32 %v2330_v26, %v8819_v39  ;;  %v7418_v9 = vadd.f32 %v2331_v31, %v8820_v50  ;;  %v8822_v7 = vld [vmem:[#allocation123_spill] sm:$0xff]  ;;  %v8825_v26 = vld [vmem:[#allocation94_spill] sm:$0xff]  ;;  %v8826_v31 = vld [vmem:[#allocation189_spill] sm:$0xff] }
 0x2a4   : > { %v7421_v41 = vadd.f32 %v2332_v28, %v8821_v14  ;;  %v2371_v59 = vmul.f32 %v7356_v3, %v8822_v7  ;;  %v2372_v19 = vmul.f32 %v7356_v3, %v8823_v20  ;;  %v2373_v53 = vmul.f32 %v7356_v3, %v8824_v33  ;;  %v8827_v28 = vld [vmem:[#allocation191_spill] sm:$0xff]  ;;  %v8828_v60 = vld [vmem:[#allocation52_spill] sm:$0xff]  ;;  %v8829_v23 = vld [vmem:[#allocation126_spill] sm:$0xff] }
 0x2a5   : > { %v2399_v15 = vadd.f32 %v2367_v54, %v2334_v63  ;;  %v2400_v21 = vadd.f32 %v2368_v24, %v2335_v38  ;;  %v2401_v29 = vadd.f32 %v2369_v44, %v2336_v13  ;;  %v2432_v34 = vmul.f32 %v7412_v0, %v8825_v26  ;;  %v8830_v46 = vld [vmem:[#allocation192_spill] sm:$0xff]  ;;  %v8831_v63 = vld [vmem:[#allocation127_spill] sm:$0xff]  ;;  %v8834_v39 = vld [vmem:[#allocation129_spill] sm:$0xff] }
 0x2a6   : > { %v2433_v56 = vmul.f32 %v7412_v0, %v8826_v31  ;;  %v2434_v18 = vmul.f32 %v7412_v0, %v8827_v28  ;;  %v7436_v51 = vadd.f32 %v2333_v45, %v8828_v60  ;;  %v2374_v61 = vmul.f32 %v7356_v3, %v8829_v23  ;;  %v8832_v54 = vld [vmem:[#allocation128_spill] sm:$0xff]  ;;  %v8833_v52 = vld [vmem:[#allocation95_spill] sm:$0xff]  ;;  %v8837_v28 = vld [vmem:[#allocation130_spill] sm:$0xff] }
 0x2a7   : > { %v2402_v25 = vadd.f32 %v2370_v16, %v2337_v47  ;;  %v2435_v38 = vmul.f32 %v7412_v0, %v8830_v46  ;;  %v2375_v13 = vmul.f32 %v7356_v3, %v8831_v63  ;;  %v2376_v24 = vmul.f32 %v7356_v3, %v8832_v54  ;;  %v8835_v47 = vld [vmem:[#allocation169_spill] sm:$0xff]  ;;  %v8836_v7 = vld [vmem:[#allocation96_spill] sm:$0xff]  ;;  %v8838_v60 = vld [vmem:[#allocation170_spill] sm:$0xff] }
 0x2a8   : > { %v2403_v44 = vadd.f32 %v2371_v59, %v2338_v35  ;;  %v2436_v58 = vmul.f32 %v7412_v0, %v8833_v52  ;;  %v2377_v45 = vmul.f32 %v7356_v3, %v8834_v39  ;;  %v2404_v50 = vadd.f32 %v2372_v19, %v2339_v40  ;;  %v8839_v63 = vld [vmem:[#allocation131_spill] sm:$0xff]  ;;  %v8840_v19 = vld [vmem:[#allocation97_spill] sm:$0xff] }
 0x2a9   : > { %v2405_v14 = vadd.f32 %v2373_v53, %v2340_v17  ;;  %v2437_v16 = vmul.f32 %v7412_v0, %v8835_v47  ;;  %v2438_v20 = vmul.f32 %v7412_v0, %v8836_v7  ;;  %v2464_v33 = vadd.f32 %v2432_v34, %v2399_v15  ;;  %v8846_v52 = vld [vmem:[#allocation99_spill] sm:$0xff]  ;;  %v8848_v47 = vld [vmem:[#allocation172_spill] sm:$0xff] }
 0x2aa   : > { %v2465_v26 = vadd.f32 %v2433_v56, %v2400_v21  ;;  %v2466_v31 = vadd.f32 %v2434_v18, %v2401_v29  ;;  %v2378_v35 = vmul.f32 %v7356_v3, %v8837_v28  ;;  %v2406_v59 = vadd.f32 %v2374_v61, %v2341_v8  ;;  %v8841_v8 = vld [vmem:[#allocation132_spill] sm:$0xff]  ;;  %v8842_v29 = vld [vmem:[#allocation98_spill] sm:$0xff]  ;;  %v8843_v56 = vld [vmem:[#allocation133_spill] sm:$0xff] }
 0x2ab   : > { %v2439_v23 = vmul.f32 %v7412_v0, %v8838_v60  ;;  %v2467_v46 = vadd.f32 %v2435_v38, %v2402_v25  ;;  %v2379_v17 = vmul.f32 %v7356_v3, %v8839_v63  ;;  %v2407_v40 = vadd.f32 %v2375_v13, %v2342_v2  ;;  %2496 = vst [vmem:[%s7464_s9] sm:$0xff] %v2464_v33  ;;  %v8844_v25 = vld [vmem:[#allocation171_spill] sm:$0xff]  ;;  %v8849_v7 = vld [vmem:[#allocation136_spill] sm:$0xff]  ;;  %v8851_v28 = vld [vmem:[#allocation137_spill] sm:$0xff] }
 0x2ac   : > { %v2440_v53 = vmul.f32 %v7412_v0, %v8840_v19  ;;  %v2468_v54 = vadd.f32 %v2436_v58, %v2403_v44  ;;  %v2380_v15 = vmul.f32 %v7356_v3, %v8841_v8  ;;  %v2408_v21 = vadd.f32 %v2376_v24, %v7344_v1  ;;  %2497 = vst [vmem:[%s7464_s9 + $0x8] sm:$0xff] %v2465_v26  ;;  %v8845_v44 = vld [vmem:[#allocation134_spill] sm:$0xff]  ;;  %v8850_v33 = vld [vmem:[#allocation175_spill] sm:$0xff]  ;;  %v8856_v8 = vld [vmem:[#allocation101_spill] sm:$0xff] }
 0x2ad   : > { %v2441_v2 = vmul.f32 %v7412_v0, %v8842_v29  ;;  %v2469_v34 = vadd.f32 %v2437_v16, %v2404_v50  ;;  %v2381_v18 = vmul.f32 %v7356_v3, %v8843_v56  ;;  %v2409_v61 = vadd.f32 %v2377_v45, %v7347_v22  ;;  %2498 = vst [vmem:[%s7464_s9 + $0x10] sm:$0xff] %v2466_v31  ;;  %v8847_v50 = vld [vmem:[#allocation135_spill] sm:$0xff]  ;;  %v8857_v29 = vld [vmem:[#allocation141_spill] sm:$0xff] }
 0x2ae   : > { %v2442_v38 = vmul.f32 %v7412_v0, %v8844_v25  ;;  %v2470_v13 = vadd.f32 %v2438_v20, %v2405_v14  ;;  %v2382_v1 = vmul.f32 %v7356_v3, %v8845_v44  ;;  %v2410_v24 = vadd.f32 %v2378_v35, %v7350_v12  ;;  %2499 = vst [vmem:[%s7464_s9 + $0x18] sm:$0xff] %v2467_v46  ;;  %v8853_v46 = vld [vmem:[#allocation138_spill] sm:$0xff] }
 0x2af   : > { %v2443_v58 = vmul.f32 %v7412_v0, %v8846_v52  ;;  %v2471_v39 = vadd.f32 %v2439_v23, %v2406_v59  ;;  %v2383_v22 = vmul.f32 %v7356_v3, %v8847_v50  ;;  %v2411_v45 = vadd.f32 %v2379_v17, %v7353_v37  ;;  %2500 = vst [vmem:[%s7464_s9 + $0x20] sm:$0xff] %v2468_v54  ;;  %v8852_v59 = vld [vmem:[#allocation176_spill] sm:$0xff]  ;;  %v8862_v52 = vld [vmem:[#allocation102_spill] sm:$0xff]  ;;  %v8863_v50 = vld [vmem:[#allocation149_spill] sm:$0xff] }
 0x2b0   : > { %v2444_v14 = vmul.f32 %v7412_v0, %v8848_v47  ;;  %v2472_v16 = vadd.f32 %v2440_v53, %v2407_v40  ;;  %v2384_v12 = vmul.f32 %v7356_v3, %v8849_v7  ;;  %v2412_v20 = vadd.f32 %v2380_v15, %v7359_v48  ;;  %2501 = vst [vmem:[%s7464_s9 + $0x28] sm:$0xff] %v2469_v34  ;;  %v8854_v17 = vld [vmem:[#allocation100_spill] sm:$0xff]  ;;  %v8855_v53 = vld [vmem:[#allocation139_spill] sm:$0xff]  ;;  %v8858_v34 = vld [vmem:[#allocation177_spill] sm:$0xff] }
 0x2b1   : > { %v2445_v26 = vmul.f32 %v7412_v0, %v8850_v33  ;;  %v2473_v31 = vadd.f32 %v2441_v2, %v2408_v21  ;;  %v2385_v37 = vmul.f32 %v7356_v3, %v8851_v28  ;;  %v2413_v35 = vadd.f32 %v2381_v18, %v7362_v43  ;;  %2502 = vst [vmem:[%s7464_s9 + $0x30] sm:$0xff] %v2470_v13  ;;  %v8868_v28 = vld [vmem:[#allocation182_spill] sm:$0xff] }
 0x2b2   : > { %v2446_v60 = vmul.f32 %v7412_v0, %v8852_v59  ;;  %v2474_v23 = vadd.f32 %v2442_v38, %v2409_v61  ;;  %v2386_v48 = vmul.f32 %v7356_v3, %v8853_v46  ;;  %v2414_v63 = vadd.f32 %v2382_v1, %v7365_v6  ;;  %2503 = vst [vmem:[%s7464_s9 + $0x38] sm:$0xff] %v2471_v39  ;;  %v8859_v61 = vld [vmem:[#allocation142_spill] sm:$0xff]  ;;  %v8860_v38 = vld [vmem:[#allocation179_spill] sm:$0xff] }
 0x2b3   : > { %v2447_v40 = vmul.f32 %v7412_v0, %v8854_v17  ;;  %v2475_v19 = vadd.f32 %v2443_v58, %v2410_v24  ;;  %v2387_v43 = vmul.f32 %v7356_v3, %v8855_v53  ;;  %v2415_v54 = vadd.f32 %v2383_v22, %v7368_v57  ;;  %2504 = vst [vmem:[%s7464_s9 + $0x40] sm:$0xff] %v2472_v16  ;;  %v8861_v1 = vld [vmem:[#allocation146_spill] sm:$0xff]  ;;  %v8869_v59 = vld [vmem:[#allocation143_spill] sm:$0xff] }
 0x2b4   : > { %v2448_v15 = vmul.f32 %v7412_v0, %v8856_v8  ;;  %v2476_v21 = vadd.f32 %v2444_v14, %v2411_v45  ;;  %v2388_v6 = vmul.f32 %v7356_v3, %v8857_v29  ;;  %v2416_v2 = vadd.f32 %v2384_v12, %v7371_v62  ;;  %2505 = vst [vmem:[%s7464_s9 + $0x48] sm:$0xff] %v2473_v31  ;;  %v8864_v45 = vld [vmem:[#allocation103_spill] sm:$0xff]  ;;  %v8865_v16 = vld [vmem:[#allocation150_spill] sm:$0xff]  ;;  %v8866_v12 = vld [vmem:[#allocation180_spill] sm:$0xff] }
 0x2b5   : > { %v2449_v56 = vmul.f32 %v7412_v0, %v8858_v34  ;;  %v2477_v18 = vadd.f32 %v2445_v26, %v2412_v20  ;;  %v2389_v57 = vmul.f32 %v7356_v3, %v8859_v61  ;;  %v2417_v25 = vadd.f32 %v2385_v37, %v7374_v4  ;;  %2506 = vst [vmem:[%s7464_s9 + $0x50] sm:$0xff] %v2474_v23  ;;  %v8867_v26 = vld [vmem:[#allocation151_spill] sm:$0xff]  ;;  %v8870_v23 = vld [vmem:[#allocation104_spill] sm:$0xff]  ;;  %v8874_v8 = vld [vmem:[#allocation105_spill] sm:$0xff] }
 0x2b6   : > { %v2450_v13 = vmul.f32 %v7412_v0, %v8860_v38  ;;  %v2478_v44 = vadd.f32 %v2446_v60, %v2413_v35  ;;  %v2390_v62 = vmul.f32 %v7356_v3, %v8861_v1  ;;  %v2418_v24 = vadd.f32 %v2386_v48, %v7377_v5  ;;  %2507 = vst [vmem:[%s7464_s9 + $0x58] sm:$0xff] %v2475_v19  ;;  %v8875_v29 = vld [vmem:[#allocation153_spill] sm:$0xff] }
 0x2b7   : > { %v2451_v58 = vmul.f32 %v7412_v0, %v8862_v52  ;;  %v2479_v39 = vadd.f32 %v2447_v40, %v2414_v63  ;;  %v2391_v4 = vmul.f32 %v7356_v3, %v8863_v50  ;;  %v2419_v22 = vadd.f32 %v2387_v43, %v7380_v10  ;;  %2508 = vst [vmem:[%s7464_s9 + $0x60] sm:$0xff] %v2476_v21  ;;  %v8871_v63 = vld [vmem:[#allocation145_spill] sm:$0xff]  ;;  %v8872_v40 = vld [vmem:[#allocation183_spill] sm:$0xff]  ;;  %v8882_v50 = vld [vmem:[#allocation200_spill] sm:$0xff] }
 0x2b8   : > { %v2452_v47 = vmul.f32 %v7412_v0, %v8864_v45  ;;  %v2480_v14 = vadd.f32 %v2448_v15, %v2415_v54  ;;  %v2392_v5 = vmul.f32 %v7356_v3, %v8865_v16  ;;  %v2420_v7 = vadd.f32 %v2388_v6, %v7383_v36  ;;  %2509 = vst [vmem:[%s7464_s9 + $0x68] sm:$0xff] %v2477_v18  ;;  %v8873_v43 = vld [vmem:[#allocation147_spill] sm:$0xff]  ;;  %v8877_v18 = vld [vmem:[#allocation193_spill] sm:$0xff] }
 0x2b9   : > { %v2453_v20 = vmul.f32 %v7412_v0, %v8866_v12  ;;  %v2481_v33 = vadd.f32 %v2449_v56, %v2416_v2  ;;  %v2393_v10 = vmul.f32 %v7356_v3, %v8867_v26  ;;  %v2421_v31 = vadd.f32 %v2389_v57, %v7386_v11  ;;  %2510 = vst [vmem:[%s7464_s9 + $0x70] sm:$0xff] %v2478_v44  ;;  %v8876_v2 = vld [vmem:[#allocation184_spill] sm:$0xff]  ;;  %v8878_v57 = vld [vmem:[#allocation187_spill] sm:$0xff] }
 0x2ba   : > { %v2454_v37 = vmul.f32 %v7412_v0, %v8868_v28  ;;  %v2482_v35 = vadd.f32 %v2450_v13, %v2417_v25  ;;  %v2394_v36 = vmul.f32 %v7356_v3, %v8869_v59  ;;  %v2422_v60 = vadd.f32 %v2390_v62, %v7393_v30  ;;  %2511 = vst [vmem:[%s7464_s9 + $0x78] sm:$0xff] %v2479_v39  ;;  %v8879_v13 = vld [vmem:[#allocation106_spill] sm:$0xff] }
 0x2bb   : > { %v2455_v46 = vmul.f32 %v7412_v0, %v8870_v23  ;;  %v2483_v48 = vadd.f32 %v2451_v58, %v2418_v24  ;;  %v2395_v11 = vmul.f32 %v7356_v3, %v8871_v63  ;;  %v2423_v17 = vadd.f32 %v2391_v4, %v7396_v27  ;;  %2512 = vst [vmem:[%s7464_s9 + $0x80] sm:$0xff] %v2480_v14  ;;  %v8880_v62 = vld [vmem:[#allocation190_spill] sm:$0xff]  ;;  %v8881_v58 = vld [vmem:[#allocation199_spill] sm:$0xff] }
 0x2bc   : > { %v2456_v19 = vmul.f32 %v7412_v0, %v8872_v40  ;;  %v2484_v53 = vadd.f32 %v2452_v47, %v2419_v22  ;;  %v2396_v30 = vmul.f32 %v7356_v3, %v8873_v43  ;;  %v2424_v54 = vadd.f32 %v2392_v5, %v7399_v49  ;;  %2513 = vst [vmem:[%s7464_s9 + $0x88] sm:$0xff] %v2481_v33 }
 0x2bd   : > { %v2457_v15 = vmul.f32 %v7412_v0, %v8874_v8  ;;  %v2485_v21 = vadd.f32 %v2453_v20, %v2420_v7  ;;  %v2397_v27 = vmul.f32 %v7356_v3, %v8875_v29  ;;  %v2425_v6 = vadd.f32 %v2393_v10, %v7404_v32  ;;  %2514 = vst [vmem:[%s7464_s9 + $0x90] sm:$0xff] %v2482_v35 }
 0x2be   : > { %v2458_v34 = vmul.f32 %v7412_v0, %v8876_v2  ;;  %v2486_v56 = vadd.f32 %v2454_v37, %v2421_v31  ;;  %v2398_v49 = vmul.f32 %v7356_v3, %v8877_v18  ;;  %v2426_v61 = vadd.f32 %v2394_v36, %v7407_v42  ;;  %2515 = vst [vmem:[%s7464_s9 + $0x98] sm:$0xff] %v2483_v48 }
 0x2bf   : > { %v2459_v25 = vmul.f32 %v7412_v0, %v8878_v57  ;;  %v2487_v38 = vadd.f32 %v2455_v46, %v2422_v60  ;;  %v2427_v32 = vadd.f32 %v2395_v11, %v7415_v55  ;;  %v2460_v44 = vmul.f32 %v7412_v0, %v8879_v13  ;;  %2516 = vst [vmem:[%s7464_s9 + $0xa0] sm:$0xff] %v2484_v53 }
 0x2c0   : > { %v2488_v1 = vadd.f32 %v2456_v19, %v2423_v17  ;;  %v2428_v3 = vadd.f32 %v2396_v30, %v7418_v9  ;;  %v2461_v42 = vmul.f32 %v7412_v0, %v8880_v62  ;;  %v2489_v24 = vadd.f32 %v2457_v15, %v2424_v54  ;;  %2517 = vst [vmem:[%s7464_s9 + $0xa8] sm:$0xff] %v2485_v21 }
 0x2c1   : > { %v2429_v52 = vadd.f32 %v2397_v27, %v7421_v41  ;;  %v2462_v55 = vmul.f32 %v7412_v0, %v8881_v58  ;;  %v2490_v39 = vadd.f32 %v2458_v34, %v2425_v6  ;;  %2518 = vst [vmem:[%s7464_s9 + $0xb0] sm:$0xff] %v2486_v56  ;;  %v2430_v9 = vadd.f32 %v2398_v49, %v7436_v51 }
 0x2c2   : > { %v2463_v4 = vmul.f32 %v7412_v0, %v8882_v50  ;;  %v2491_v22 = vadd.f32 %v2459_v25, %v2426_v61  ;;  %2519 = vst [vmem:[%s7464_s9 + $0xb8] sm:$0xff] %v2487_v38  ;;  %v2492_v41 = vadd.f32 %v2460_v44, %v2427_v32  ;;  %v2493_v45 = vadd.f32 %v2461_v42, %v2428_v3 }
 0x2c3   : > { %2520 = vst [vmem:[%s7464_s9 + $0xc0] sm:$0xff] %v2488_v1  ;;  %v2494_v47 = vadd.f32 %v2462_v55, %v2429_v52 }
 0x2c4   : > { %2521 = vst [vmem:[%s7464_s9 + $0xc8] sm:$0xff] %v2489_v24  ;;  %v2495_v14 = vadd.f32 %v2463_v4, %v2430_v9 }
 0x2c5   : > { %2522 = vst [vmem:[%s7464_s9 + $0xd0] sm:$0xff] %v2490_v39 }
 0x2c6   : > { %2523 = vst [vmem:[%s7464_s9 + $0xd8] sm:$0xff] %v2491_v22 }
 0x2c7   : > { %2524 = vst [vmem:[%s7464_s9 + $0xe0] sm:$0xff] %v2492_v41 }
 0x2c8   : > { %2525 = vst [vmem:[%s7464_s9 + $0xe8] sm:$0xff] %v2493_v45 }
 0x2c9   : > { %2526 = vst [vmem:[%s7464_s9 + $0xf0] sm:$0xff] %v2494_v47 }
 0x2ca   : > { %2527 = vst [vmem:[%s7464_s9 + $0xf8] sm:$0xff] %v2495_v14 }
 0x2cb   : > { %3177 = shalt.err (!%p3174_p4)
}
 0x2cc   : > { %s3224_s27 = smov 128   ;;  %s3225_s4 = smov 8  }
 0x2cd   : > { %2671 = dma.vmem_to_hbm [thread:$0]  (%p3294_p11), %s2542_s17, 4096, %s2544_s19, %s2529_s20, %s3224_s27, %s3224_s27, %s3225_s4  }
 0x2ce PF: > { %s2558_s5 = sand.u32 1, %s3206_s13   ;;  %p8883_p7 = scmp.ge.s32.totalorder %s3218_s16, 2 }
 0x2cf   : > { %s2559_s6 = scalar_lea.sflag [#allocation6], %s2558_s5 }
 0x2d0   : > { %p2678_p5 = pnand %p8883_p7, %p3298_p12 }
 0x2d2   : > { %p2679_p8 = pneg %p2678_p5 }
 0x2d4   : > { %3201 = dma.done.wait (%p2679_p8), %s2559_s6, 4096  }
 0x2d5   : > { %3203 = vsyncadd (%p2679_p8), %s2559_s6, 4294963200  ;;  %p23_p10 = scmp.ge.s32.totalorder %s3269_s18, 4   ;;  %s8884_s13 = smov %s3210_s14 }
 0x2d6   : > { %s8885_s14 = smov %s3214_s15  ;;  %s8886_s15 = smov %s3281_s21 }
 0x2d7   : > { %s8887_s16 = smov %s3269_s18  ;;  %25 = sbr.rel (!%p23_p10) target bundleno = 11 (0xb), region = 69 }
 0x2dc   :  { %2565 = vsyncpa [#allocation5], 1 }
 0x2dd   :  { %2567 = vsyncpa [#allocation5 + $0x1], 1 }
 0x2de   :  { %2568 = vsyncpa [#allocation6], 1 }
 0x2df   :  { %2570 = vsyncpa [#allocation6 + $0x1], 1 }

</bundles_post_ra>
